<compile_context>
chip_gen: v6e
topology: v6e:2x2x1
jax: 0.10.0
libtpu: 0.0.40
codegen_flags: <defaults>
</compile_context>

<pallas_src>
import functools
import math

import jax
import jax.numpy as jnp
from jax import lax
from jax.experimental import pallas as pl
from jax.experimental.pallas import tpu as pltpu

EPS = 1e-7
NEG = -1e9
F32 = jnp.float32
BF16 = jnp.bfloat16
VMEM_LIMIT = 32 * 1024 * 1024


# ----------------------------- in-kernel helpers ----------------------------

def _layernorm(y, g, b):
    mu = jnp.mean(y, axis=-1, keepdims=True)
    yc = y - mu
    var = jnp.mean(yc * yc, axis=-1, keepdims=True)
    return yc * lax.rsqrt(var + 1e-5) * g + b


def _softmax_rows(s, exact):
    m = jnp.max(s, axis=-1, keepdims=True)
    e = jnp.exp(s - m)
    den = jnp.sum(e, axis=-1, keepdims=True)
    if exact:                     # exact division on paths that feed the loss
        return e / den
    return e * pl.reciprocal(den, approx=True)


def _attend(q, k, v, bias, scale, exact=False):
    """q:(T,hd) k,v:(S,hd) bias broadcastable to (T,S).  bf16 MXU, f32 accum."""
    s = lax.dot_general(q.astype(BF16), k.astype(BF16),
                        (((1,), (1,)), ((), ())),
                        preferred_element_type=F32) * scale + bias
    p = _softmax_rows(s, exact)
    o = jnp.dot(p.astype(BF16), v.astype(BF16), preferred_element_type=F32)
    return o, p


def _self_attn_block(x, wqkv, bqkv, wo, bo, g, b, bias, nheads, scale):
    E = x.shape[-1]
    hd = E // nheads
    qkv = jnp.dot(x.astype(BF16), wqkv, preferred_element_type=F32) + bqkv
    heads = []
    for h in range(nheads):
        o, _ = _attend(qkv[:, h * hd:(h + 1) * hd],
                       qkv[:, E + h * hd:E + (h + 1) * hd],
                       qkv[:, 2 * E + h * hd:2 * E + (h + 1) * hd],
                       bias, scale)
        heads.append(o)
    o = jnp.concatenate(heads, axis=-1)                       # lane-dense (T,E)
    y = jnp.dot(o.astype(BF16), wo, preferred_element_type=F32) + bo + x
    return _layernorm(y, g, b)


def _cross_attn_block(x, mem, wq, bq, wkv, bkv, wo, bo, g, b, bias, nheads, scale):
    E = x.shape[-1]
    hd = E // nheads
    q = jnp.dot(x.astype(BF16), wq, preferred_element_type=F32) + bq
    kv = jnp.dot(mem.astype(BF16), wkv, preferred_element_type=F32) + bkv
    heads = []
    p_sum = None
    for h in range(nheads):
        o, p = _attend(q[:, h * hd:(h + 1) * hd],
                       kv[:, h * hd:(h + 1) * hd],
                       kv[:, E + h * hd:E + (h + 1) * hd],
                       bias, scale, exact=True)
        p_sum = p if p_sum is None else p_sum + p
        heads.append(o)
    o = jnp.concatenate(heads, axis=-1)
    y = jnp.dot(o.astype(BF16), wo, preferred_element_type=F32) + bo + x
    return _layernorm(y, g, b), p_sum * (1.0 / nheads)         # head-averaged probs


def _ffn_block(x, w1, b1, w2, b2, g, b):
    h1 = jnp.maximum(jnp.dot(x.astype(BF16), w1, preferred_element_type=F32) + b1, 0.0)
    y = jnp.dot(h1.astype(BF16), w2, preferred_element_type=F32) + b2 + x
    return _layernorm(y, g, b)


# --------------------------- fused encoder stack ----------------------------

def _encoder_stack_kernel(x0_ref, pad_ref,
                          wqkv_ref, bqkv_ref, wo_ref, bo_ref, ln1g_ref, ln1b_ref,
                          w1_ref, fb1_ref, w2_ref, fb2_ref, ln2g_ref, ln2b_ref,
                          out_ref, x_sc, *, nheads, scale):
    l = pl.program_id(1)

    @pl.when(l == 0)
    def _():
        x_sc[...] = x0_ref[0]

    x = x_sc[...]                                              # (S, E) f32
    x = _self_attn_block(x, wqkv_ref[0], bqkv_ref[0], wo_ref[0], bo_ref[0],
                         ln1g_ref[0], ln1b_ref[0], pad_ref[0], nheads, scale)
    x = _ffn_block(x, w1_ref[0], fb1_ref[0], w2_ref[0], fb2_ref[0],
                   ln2g_ref[0], ln2b_ref[0])
    x_sc[...] = x

    @pl.when(l == pl.num_programs(1) - 1)
    def _():
        out_ref[0] = x


_ENC_KEYS = ("w_qkv", "b_qkv", "wo", "bo", "ln1_g", "ln1_b",
             "w1", "b1", "w2", "b2", "ln2_g", "ln2_b")


def _layer_spec(arr):
    nd = arr.ndim
    return pl.BlockSpec((1,) + arr.shape[1:], lambda b, l: (l,) + (0,) * (nd - 1))


def _batch_spec(arr):
    nd = arr.ndim
    return pl.BlockSpec((1,) + arr.shape[1:], lambda b, l: (b,) + (0,) * (nd - 1))


def _const_spec(arr):
    nd = arr.ndim
    return pl.BlockSpec(arr.shape, lambda b, l: (0,) * nd)


def encoder_stack(x0, pad_bias, p, nheads):
    """x0:(B,S,E) f32; pad_bias:(B,1,S) additive.  One call, grid=(B, layers)."""
    B, S, E = x0.shape
    nl = p["w_qkv"].shape[0]
    scale = 1.0 / math.sqrt(E // nheads)
    return pl.pallas_call(
        functools.partial(_encoder_stack_kernel, nheads=nheads, scale=scale),
        out_shape=jax.ShapeDtypeStruct((B, S, E), F32),
        grid_spec=pltpu.PrefetchScalarGridSpec(
            num_scalar_prefetch=0,
            grid=(B, nl),
            in_specs=[_batch_spec(x0), _batch_spec(pad_bias)]
                     + [_layer_spec(p[k]) for k in _ENC_KEYS],
            out_specs=pl.BlockSpec((1, S, E), lambda b, l: (b, 0, 0)),
            scratch_shapes=[pltpu.VMEM((S, E), F32)]),
        compiler_params=pltpu.CompilerParams(
            dimension_semantics=("parallel", "arbitrary"),
            vmem_limit_bytes=VMEM_LIMIT),
    )(x0, pad_bias, *(p[k] for k in _ENC_KEYS))


# --------------------------- fused decoder stack ----------------------------

def _decoder_stack_kernel(dec_ref, mem_ref, pad_ref, srcp_ref, whead_ref, bhead_ref,
                          sa_wqkv_ref, sa_bqkv_ref, sa_wo_ref, sa_bo_ref,
                          ln1g_ref, ln1b_ref,
                          ca_wq_ref, ca_bq_ref, ca_wkv_ref, ca_bkv_ref,
                          ca_wo_ref, ca_bo_ref, ln2g_ref, ln2b_ref,
                          w1_ref, fb1_ref, w2_ref, fb2_ref, ln3g_ref, ln3b_ref,
                          head_ref, srctr_ref, x_sc, *, nheads, scale):
    l = pl.program_id(1)
    L = x_sc.shape[0]

    @pl.when(l == 0)
    def _():
        x_sc[...] = dec_ref[0]

    x = x_sc[...]                                              # (L, E) f32

    # causal mask built in-kernel (no HBM bias tensor)
    row = lax.broadcasted_iota(jnp.int32, (L, L), 0)
    col = lax.broadcasted_iota(jnp.int32, (L, L), 1)
    causal = jnp.where(col > row, NEG, 0.0).astype(F32)

    x = _self_attn_block(x, sa_wqkv_ref[0], sa_bqkv_ref[0], sa_wo_ref[0], sa_bo_ref[0],
                         ln1g_ref[0], ln1b_ref[0], causal, nheads, scale)
    x, p_avg = _cross_attn_block(x, mem_ref[0],
                                 ca_wq_ref[0], ca_bq_ref[0],
                                 ca_wkv_ref[0], ca_bkv_ref[0],
                                 ca_wo_ref[0], ca_bo_ref[0],
                                 ln2g_ref[0], ln2b_ref[0],
                                 pad_ref[0], nheads, scale)
    x = _ffn_block(x, w1_ref[0], fb1_ref[0], w2_ref[0], fb2_ref[0],
                   ln3g_ref[0], ln3b_ref[0])
    x_sc[...] = x

    @pl.when(l == pl.num_programs(1) - 1)
    def _():
        # extra softmax over source positions (F.softmax(src_att_weights, -1)),
        # then @ src_copy_proj -- all kept in VMEM (exact math: feeds jnp.log).
        m2 = jnp.max(p_avg, axis=-1, keepdims=True)
        e2 = jnp.exp(p_avg - m2)
        sp = e2 / jnp.sum(e2, axis=-1, keepdims=True)          # (L, S)
        srctr_ref[0] = jnp.dot(sp, srcp_ref[0], preferred_element_type=F32)
        # fused seq_picker + proj head GEMM
        head = jnp.dot(x.astype(BF16), whead_ref[...],
                       preferred_element_type=F32) + bhead_ref[...]
        head_ref[0] = head


_DEC_KEYS = ("sa_wqkv", "sa_bqkv", "sa_wo", "sa_bo", "ln1_g", "ln1_b",
             "ca_wq", "ca_bq", "ca_wkv", "ca_bkv", "ca_wo", "ca_bo",
             "ln2_g", "ln2_b",
             "w1", "b1", "w2", "b2", "ln3_g", "ln3_b")


def decoder_stack(dec_inp, memory, pad_bias, src_proj, p, w_head, b_head, nheads):
    B, L, E = dec_inp.shape
    n_codes = src_proj.shape[-1]
    nl = p["sa_wqkv"].shape[0]
    scale = 1.0 / math.sqrt(E // nheads)
    nhead_cols = w_head.shape[1]
    in_specs = ([_batch_spec(dec_inp), _batch_spec(memory), _batch_spec(pad_bias),
                 _batch_spec(src_proj), _const_spec(w_head), _const_spec(b_head)]
                + [_layer_spec(p[k]) for k in _DEC_KEYS])
    return pl.pallas_call(
        functools.partial(_decoder_stack_kernel, nheads=nheads, scale=scale),
        out_shape=(jax.ShapeDtypeStruct((B, L, nhead_cols), F32),
                   jax.ShapeDtypeStruct((B, L, n_codes), F32)),
        grid_spec=pltpu.PrefetchScalarGridSpec(
            num_scalar_prefetch=0,
            grid=(B, nl),
            in_specs=in_specs,
            out_specs=(pl.BlockSpec((1, L, nhead_cols), lambda b, l: (b, 0, 0)),
                       pl.BlockSpec((1, L, n_codes), lambda b, l: (b, 0, 0))),
            scratch_shapes=[pltpu.VMEM((L, E), F32)]),
        compiler_params=pltpu.CompilerParams(
            dimension_semantics=("parallel", "arbitrary"),
            vmem_limit_bytes=VMEM_LIMIT),
    )(dec_inp, memory, pad_bias, src_proj, w_head, b_head,
      *(p[k] for k in _DEC_KEYS))


# ------------------------------ VQ-VAE encode -------------------------------

def _conv_gemm_kernel(p_ref, w_ref, b_ref, o_ref, *, relu):
    y = jnp.dot(p_ref[...].astype(BF16), w_ref[...],
                preferred_element_type=F32) + b_ref[...]
    if relu:
        y = jnp.maximum(y, 0.0)
    o_ref[...] = y


def conv_gemm(patches, w, b, relu=False):
    M = patches.shape[0]
    N = w.shape[1]
    return pl.pallas_call(
        functools.partial(_conv_gemm_kernel, relu=relu),
        out_shape=jax.ShapeDtypeStruct((M, N), F32),
    )(patches, w, b.reshape(1, N).astype(F32))


def _conv_vq_kernel(p_ref, w_ref, b_ref, cbt_ref, enc_ref):
    # conv2 GEMM (bf16 MXU, f32 accum)
    z = jnp.dot(p_ref[...].astype(BF16), w_ref[...],
                preferred_element_type=F32) + b_ref[...]       # (M, edim)
    cbt = cbt_ref[...]                                         # (edim, n_codes) f32
    # nearest-code search in f32 (|z|^2 is row-constant, dropped for argmin)
    cross = jnp.dot(z, cbt, preferred_element_type=F32)        # (M, n_codes)
    cc = jnp.sum(cbt * cbt, axis=0, keepdims=True)             # (1, n_codes)
    d = cc - 2.0 * cross
    col = lax.broadcasted_iota(jnp.int32, d.shape, 1)
    mind = jnp.min(d, axis=-1, keepdims=True)
    enc_ref[...] = jnp.min(jnp.where(d <= mind, col, d.shape[1]),
                           axis=-1, keepdims=True)             # first-min index


def conv_vq(patches, w, b, codebook):
    M = patches.shape[0]
    return pl.pallas_call(
        _conv_vq_kernel,
        out_shape=jax.ShapeDtypeStruct((M, 1), jnp.int32),
    )(patches, w, b.reshape(1, -1).astype(F32), codebook.T.astype(F32))


def im2col(x, kh, kw, stride, pad):
    B, C, H, W = x.shape
    xp = jnp.pad(x, ((0, 0), (0, 0), (pad, pad), (pad, pad)))
    oH = (H + 2 * pad - kh) // stride + 1
    oW = (W + 2 * pad - kw) // stride + 1
    cols = []
    for ci in range(kh):
        for cj in range(kw):
            cols.append(xp[:, :, ci:ci + stride * oH:stride, cj:cj + stride * oW:stride])
    patches = jnp.stack(cols, axis=2)             # (B, C, kh*kw, oH, oW)
    patches = patches.transpose(0, 3, 4, 1, 2)    # (B, oH, oW, C, kh*kw)
    return patches.reshape(B * oH * oW, C * kh * kw), oH, oW


def vqvae_encode(x, p):
    B = x.shape[0]
    # conv1 (k4 s2 p1) + ReLU, im2col + fused GEMM
    patches1, oH1, oW1 = im2col(x, 4, 4, 2, 1)
    h = conv_gemm(patches1, p["conv1_w"], p["conv1_b"], relu=True)
    dim = h.shape[-1]
    h_nchw = h.reshape(B, oH1, oW1, dim).transpose(0, 3, 1, 2)
    # conv2 (k4 s2 p1) + codebook nearest-neighbour fused in one kernel
    patches2, oH2, oW2 = im2col(h_nchw, 4, 4, 2, 1)
    enc = conv_vq(patches2, p["conv2_w"], p["conv2_b"], p["codebook"])
    return enc.reshape(B, oH2, oW2)                            # (B, Hl, Wl) int32


# ------------------------------ CVQVAE forward ------------------------------

def cvqvae_forward(params, x, cmd, cfg):
    pad_idx = cfg["pad_idx"]
    nheads = cfg["nheads"]
    E = cfg["rnn_dim"]
    n_codes = cfg["n_codes"]
    _, Hl, Wl = cfg["latent_shape"]
    L = Hl * Wl
    S, B = cmd.shape

    # --- source encoder (batch-major internally) ---
    cmd_bm = cmd.T                                                    # (B, S)
    cmd_embd = (jnp.take(params["inp_embed"], cmd_bm, axis=0)
                + params["inp_pos_embed"][:S, 0, :][None])            # (B, S, E)
    # nn.Dropout(0.2) / nn.Dropout(0.5): identity in eval mode.
    pad_bias = jnp.where(cmd_bm == pad_idx, NEG, 0.0).astype(F32).reshape(B, 1, S)

    memory = encoder_stack(cmd_embd, pad_bias, params["encoder"], nheads)  # (B,S,E)

    # --- discrete latent codes from the VQ-VAE encoder ---
    encodings = vqvae_encode(x, params["vqvae"])                       # (B, Hl, Wl)
    enc_bl = encodings.reshape(B, L)                                   # (B, L)

    dec_ids = enc_bl[:, :-1]
    idx = jnp.arange(L - 1)
    # matches the reference: both index with latent_shape[1] (works since Hl == Wl)
    posx = params["out_posx_embed"][idx % Hl, 0, :]
    posy = params["out_posy_embed"][idx // Hl, 0, :]
    out_pos = jnp.concatenate((posx, posy), axis=-1)[None]             # (1, L-1, E)
    out_emb = jnp.take(params["out_embed"], dec_ids, axis=0) + out_pos
    start = jnp.broadcast_to(params["start_embed"].reshape(1, 1, E), (B, 1, E))
    dec_inp = jnp.concatenate((start, out_emb), axis=1)                # (B, L, E)

    src_proj = jnp.take(params["src_copy_proj"], cmd_bm, axis=0)       # (B, S, n_codes)

    head, src_translate = decoder_stack(
        dec_inp, memory, pad_bias, src_proj, params["decoder"],
        params["w_head"], params["b_head"], nheads)
    # head: (B, L, 1 + n_codes) = [seq_picker | proj]; src_translate: (B, L, n_codes)

    # reorder to the reference's (L, B) flattening
    seq_logits = head[:, :, 0].T.reshape(-1)                           # (L*B,)
    proj_logits = head[:, :, 1:].transpose(1, 0, 2).reshape(-1, n_codes)
    src_tr = src_translate.transpose(1, 0, 2).reshape(-1, n_codes)
    output = enc_bl.T.reshape(-1)                                      # (L*B,)

    picked = src_tr[jnp.arange(src_tr.shape[0]), output]
    must_copied = (picked > 0.05).astype(F32)

    # BCEWithLogitsLoss(seq_logits, must_copied)
    xl = seq_logits
    loss1 = jnp.mean(jnp.maximum(xl, 0.0) - xl * must_copied
                     + jnp.log1p(jnp.exp(-jnp.abs(xl))))

    seq_weight = jnp.exp(seq_logits)[:, None]
    logits = seq_weight * jnp.log(src_tr + EPS) + jax.nn.log_softmax(proj_logits, axis=-1)
    lse = jax.scipy.special.logsumexp(logits, axis=-1)
    nll = lse - logits[jnp.arange(logits.shape[0]), output]
    loss = jnp.mean(nll)
    return loss + loss1


# ----------------------------- parameter init -------------------------------

def init_params(key, cfg):
    E, n_codes = cfg["rnn_dim"], cfg["n_codes"]
    vocab, max_len = cfg["vocab_size"], cfg["max_len"]
    input_dim, dim, edim = cfg["input_dim"], cfg["dim"], cfg["edim"]
    Hl, Wl = cfg["latent_shape"][1], cfg["latent_shape"][2]
    ff = 4 * E
    nl = 4

    keys = iter(jax.random.split(key, 64))

    def rnd(shape, scale=0.05):
        return (scale * jax.random.normal(next(keys), shape)).astype(F32)

    zeros = lambda s: jnp.zeros(s, F32)
    ones = lambda s: jnp.ones(s, F32)
    # per-layer weights stacked along a leading layer axis; matmul weights bf16
    stack_w = lambda shape, scale=0.05: rnd((nl,) + shape, scale).astype(BF16)
    stack_b = lambda n: zeros((nl, 1, n))
    stack_1 = lambda n: ones((nl, 1, n))

    encoder = {
        "w_qkv": stack_w((E, 3 * E)), "b_qkv": stack_b(3 * E),
        "wo": stack_w((E, E)), "bo": stack_b(E),
        "ln1_g": stack_1(E), "ln1_b": stack_b(E),
        "w1": stack_w((E, ff)), "b1": stack_b(ff),
        "w2": stack_w((ff, E)), "b2": stack_b(E),
        "ln2_g": stack_1(E), "ln2_b": stack_b(E),
    }
    decoder = {
        "sa_wqkv": stack_w((E, 3 * E)), "sa_bqkv": stack_b(3 * E),
        "sa_wo": stack_w((E, E)), "sa_bo": stack_b(E),
        "ln1_g": stack_1(E), "ln1_b": stack_b(E),
        "ca_wq": stack_w((E, E)), "ca_bq": stack_b(E),
        "ca_wkv": stack_w((E, 2 * E)), "ca_bkv": stack_b(2 * E),
        "ca_wo": stack_w((E, E)), "ca_bo": stack_b(E),
        "ln2_g": stack_1(E), "ln2_b": stack_b(E),
        "w1": stack_w((E, ff)), "b1": stack_b(ff),
        "w2": stack_w((ff, E)), "b2": stack_b(E),
        "ln3_g": stack_1(E), "ln3_b": stack_b(E),
    }

    inp_embed = rnd((vocab, E), 0.1).at[cfg["pad_idx"]].set(0.0)   # padding_idx row
    lexicon = rnd((vocab, n_codes), 1.0)

    conv1_w = rnd((dim, input_dim, 4, 4), 0.1).reshape(dim, -1).T.astype(BF16)
    conv2_w = rnd((edim, dim, 4, 4), 0.1).reshape(edim, -1).T.astype(BF16)

    seq_w = rnd((E, 1))
    proj_w = rnd((E, n_codes))
    w_head = jnp.concatenate((seq_w, proj_w), axis=1).astype(BF16)    # (E, 1+n_codes)
    b_head = zeros((1, 1 + n_codes))

    return {
        "vqvae": {"conv1_w": conv1_w, "conv1_b": zeros((dim,)),
                  "conv2_w": conv2_w, "conv2_b": zeros((edim,)),
                  "codebook": rnd((n_codes, edim), 0.5)},
        "inp_embed": inp_embed,
        "inp_pos_embed": rnd((max_len, 1, E), 0.02),
        "encoder": encoder,
        "out_embed": rnd((n_codes, E), 0.1),
        "out_posx_embed": rnd((Hl, 1, E // 2), 0.02),
        "out_posy_embed": rnd((Wl, 1, E // 2), 0.02),
        "start_embed": rnd((1, 1, E), 0.02),
        "decoder": decoder,
        "w_head": w_head, "b_head": b_head,
        # mimics get_src_lexicon(): row-softmaxed lexicon as src_copy_proj weights
        "src_copy_proj": jax.nn.softmax(lexicon, axis=1),
    }


if __name__ == "__main__":
    cfg = dict(
        input_dim=3, dim=32, edim=16, n_codes=32,
        rnn_dim=128, nheads=4, vocab_size=16, pad_idx=0, max_len=50,
        latent_shape=(16, 4, 4),      # (edim, H/4, W/4) for 16x16 inputs
    )
    key = jax.random.PRNGKey(0)
    kp, kx, kc = jax.random.split(key, 3)
    params = init_params(kp, cfg)

    B, S = 2, 8
    x = jax.random.normal(kx, (B, cfg["input_dim"], 16, 16), jnp.float32)
    cmd = jax.random.randint(kc, (S, B), 1, cfg["vocab_size"])
    cmd = cmd.at[-1, 0].set(cfg["pad_idx"])   # one padded source token

    fwd = jax.jit(functools.partial(cvqvae_forward, cfg=cfg))
    loss = fwd(params, x, cmd)
    jax.block_until_ready(loss)
    assert bool(jnp.isfinite(loss)), "non-finite loss"
    print("KERNEL_OK")
</pallas_src>

<mosaic_0001>
module attributes {stable_mosaic.version = 11 : i64} {
  func.func @_conv_gemm_kernel(%arg0: memref<128x48xf32, #tpu.memory_space<vmem>>, %arg1: memref<48x32xbf16, #tpu.memory_space<vmem>>, %arg2: memref<1x32xf32, #tpu.memory_space<vmem>>, %arg3: memref<128x32xf32, #tpu.memory_space<vmem>>) attributes {dimension_semantics = [], scalar_prefetch = 0 : i64, scratch_operands = 0 : i64, tpu.core_type = #tpu.core_type<tc>} {
    %c0 = arith.constant 0 : index
    %c0_0 = arith.constant 0 : index
    %0 = vector.load %arg0[%c0, %c0_0] : memref<128x48xf32, #tpu.memory_space<vmem>>, vector<128x48xf32>
    %1 = arith.truncf %0 : vector<128x48xf32> to vector<128x48xbf16>
    %c0_1 = arith.constant 0 : index
    %c0_2 = arith.constant 0 : index
    %2 = vector.load %arg1[%c0_1, %c0_2] : memref<48x32xbf16, #tpu.memory_space<vmem>>, vector<48x32xbf16>
    %cst = arith.constant dense<0.000000e+00> : vector<128x32xf32>
    %3 = tpu.matmul %1, %2, %cst {dimension_numbers = #tpu.dot_dimension_numbers<[1], [0], [0], [1], [0, 0, 1, 1], [], []>} : vector<128x48xbf16>, vector<48x32xbf16>, vector<128x32xf32> -> vector<128x32xf32>
    %c0_3 = arith.constant 0 : index
    %c0_4 = arith.constant 0 : index
    %4 = vector.load %arg2[%c0_3, %c0_4] : memref<1x32xf32, #tpu.memory_space<vmem>>, vector<1x32xf32>
    %5 = vector.broadcast %4 : vector<1x32xf32> to vector<128x32xf32>
    %6 = arith.addf %3, %5 : vector<128x32xf32>
    %cst_5 = arith.constant 0.000000e+00 : f32
    %7 = vector.broadcast %cst_5 : f32 to vector<128x32xf32>
    %8 = arith.maximumf %6, %7 : vector<128x32xf32>
    %c0_6 = arith.constant 0 : index
    %c0_7 = arith.constant 0 : index
    %9 = vector.load %arg3[%c0_6, %c0_7] : memref<128x32xf32, #tpu.memory_space<vmem>>, vector<128x32xf32>
    tpu.vector_store %arg3[%c0_6, %c0_7], %8 {strides = array<i32>} : memref<128x32xf32, #tpu.memory_space<vmem>>, vector<128x32xf32>,
    return
  }
}

module attributes {stable_mosaic.version = 11 : i64} {
  func.func @_conv_vq_kernel(%arg0: memref<32x512xf32, #tpu.memory_space<vmem>>, %arg1: memref<512x16xbf16, #tpu.memory_space<vmem>>, %arg2: memref<1x16xf32, #tpu.memory_space<vmem>>, %arg3: memref<16x32xf32, #tpu.memory_space<vmem>>, %arg4: memref<32x1xi32, #tpu.memory_space<vmem>>) attributes {dimension_semantics = [], scalar_prefetch = 0 : i64, scratch_operands = 0 : i64, tpu.core_type = #tpu.core_type<tc>} {
    %c0 = arith.constant 0 : index
    %c0_0 = arith.constant 0 : index
    %0 = vector.load %arg0[%c0, %c0_0] : memref<32x512xf32, #tpu.memory_space<vmem>>, vector<32x512xf32>
    %1 = arith.truncf %0 : vector<32x512xf32> to vector<32x512xbf16>
    %c0_1 = arith.constant 0 : index
    %c0_2 = arith.constant 0 : index
    %2 = vector.load %arg1[%c0_1, %c0_2] : memref<512x16xbf16, #tpu.memory_space<vmem>>, vector<512x16xbf16>
    %cst = arith.constant dense<0.000000e+00> : vector<32x16xf32>
    %3 = tpu.matmul %1, %2, %cst {dimension_numbers = #tpu.dot_dimension_numbers<[1], [0], [0], [1], [0, 0, 1, 1], [], []>} : vector<32x512xbf16>, vector<512x16xbf16>, vector<32x16xf32> -> vector<32x16xf32>
    %c0_3 = arith.constant 0 : index
    %c0_4 = arith.constant 0 : index
    %4 = vector.load %arg2[%c0_3, %c0_4] : memref<1x16xf32, #tpu.memory_space<vmem>>, vector<1x16xf32>
    %5 = vector.broadcast %4 : vector<1x16xf32> to vector<32x16xf32>
    %6 = arith.addf %3, %5 : vector<32x16xf32>
    %c0_5 = arith.constant 0 : index
    %c0_6 = arith.constant 0 : index
    %7 = vector.load %arg3[%c0_5, %c0_6] : memref<16x32xf32, #tpu.memory_space<vmem>>, vector<16x32xf32>
    %cst_7 = arith.constant dense<0.000000e+00> : vector<32x32xf32>
    %8 = tpu.matmul %6, %7, %cst_7 {dimension_numbers = #tpu.dot_dimension_numbers<[1], [0], [0], [1], [0, 0, 1, 1], [], []>} : vector<32x16xf32>, vector<16x32xf32>, vector<32x32xf32> -> vector<32x32xf32>
    %9 = arith.mulf %7, %7 : vector<16x32xf32>
    %cst_8 = arith.constant dense<0.000000e+00> : vector<32xf32>
    %10 = vector.multi_reduction <add>, %9, %cst_8 [0] : vector<16x32xf32> to vector<32xf32>
    %11 = vector.shape_cast %10 : vector<32xf32> to vector<1x32xf32>
    %cst_9 = arith.constant 2.000000e+00 : f32
    %12 = vector.broadcast %cst_9 : f32 to vector<32x32xf32>
    %13 = arith.mulf %12, %8 : vector<32x32xf32>
    %14 = vector.broadcast %11 : vector<1x32xf32> to vector<32x32xf32>
    %15 = arith.subf %14, %13 : vector<32x32xf32>
    %16 = tpu.iota {dimensions = array<i32: 1>} : vector<32x32xi32>
    %cst_10 = arith.constant dense<0x7F800000> : vector<32xf32>
    %17 = vector.multi_reduction <minimumf>, %15, %cst_10 [1] : vector<32x32xf32> to vector<32xf32>
    %18 = vector.shape_cast %17 : vector<32xf32> to vector<32x1xf32>
    %19 = vector.broadcast %18 : vector<32x1xf32> to vector<32x32xf32>
    %20 = arith.cmpf ole, %15, %19 : vector<32x32xf32>
    %c32_i32 = arith.constant 32 : i32
    %21 = vector.broadcast %c32_i32 : i32 to vector<32x32xi32>
    %22 = arith.select %20, %16, %21 : vector<32x32xi1>, vector<32x32xi32>
    %cst_11 = arith.constant dense<2147483647> : vector<32xi32>
    %23 = vector.multi_reduction <minsi>, %22, %cst_11 [1] : vector<32x32xi32> to vector<32xi32>
    %24 = vector.shape_cast %23 : vector<32xi32> to vector<32x1xi32>
    %c0_12 = arith.constant 0 : index
    %c0_13 = arith.constant 0 : index
    %25 = vector.load %arg4[%c0_12, %c0_13] : memref<32x1xi32, #tpu.memory_space<vmem>>, vector<32x1xi32>
    tpu.vector_store %arg4[%c0_12, %c0_13], %24 {strides = array<i32>} : memref<32x1xi32, #tpu.memory_space<vmem>>, vector<32x1xi32>,
    return
  }
}

module attributes {stable_mosaic.version = 11 : i64} {
  func.func @_encoder_stack_kernel(%arg0: i32, %arg1: i32, %arg2: memref<1x8x128xf32, #tpu.memory_space<vmem>>, %arg3: memref<1x1x8xf32, #tpu.memory_space<vmem>>, %arg4: memref<1x128x384xbf16, #tpu.memory_space<vmem>>, %arg5: memref<1x1x384xf32, #tpu.memory_space<vmem>>, %arg6: memref<1x128x128xbf16, #tpu.memory_space<vmem>>, %arg7: memref<1x1x128xf32, #tpu.memory_space<vmem>>, %arg8: memref<1x1x128xf32, #tpu.memory_space<vmem>>, %arg9: memref<1x1x128xf32, #tpu.memory_space<vmem>>, %arg10: memref<1x128x512xbf16, #tpu.memory_space<vmem>>, %arg11: memref<1x1x512xf32, #tpu.memory_space<vmem>>, %arg12: memref<1x512x128xbf16, #tpu.memory_space<vmem>>, %arg13: memref<1x1x128xf32, #tpu.memory_space<vmem>>, %arg14: memref<1x1x128xf32, #tpu.memory_space<vmem>>, %arg15: memref<1x1x128xf32, #tpu.memory_space<vmem>>, %arg16: memref<1x8x128xf32, #tpu.memory_space<vmem>>, %arg17: memref<8x128xf32, #tpu.memory_space<vmem>>) attributes {dimension_semantics = [#tpu.dimension_semantics<parallel>, #tpu.dimension_semantics<arbitrary>], iteration_bounds = array<i64: 2, 4>, scalar_prefetch = 0 : i64, scratch_operands = 1 : i64, tpu.core_type = #tpu.core_type<tc>, window_params = [{transform_indices = @transform_0, window_bounds = array<i64: 1, 8, 128>}, {transform_indices = @transform_1, window_bounds = array<i64: 1, 1, 8>}, {transform_indices = @transform_2, window_bounds = array<i64: 1, 128, 384>}, {transform_indices = @transform_3, window_bounds = array<i64: 1, 1, 384>}, {transform_indices = @transform_4, window_bounds = array<i64: 1, 128, 128>}, {transform_indices = @transform_5, window_bounds = array<i64: 1, 1, 128>}, {transform_indices = @transform_6, window_bounds = array<i64: 1, 1, 128>}, {transform_indices = @transform_7, window_bounds = array<i64: 1, 1, 128>}, {transform_indices = @transform_8, window_bounds = array<i64: 1, 128, 512>}, {transform_indices = @transform_9, window_bounds = array<i64: 1, 1, 512>}, {transform_indices = @transform_10, window_bounds = array<i64: 1, 512, 128>}, {transform_indices = @transform_11, window_bounds = array<i64: 1, 1, 128>}, {transform_indices = @transform_12, window_bounds = array<i64: 1, 1, 128>}, {transform_indices = @transform_13, window_bounds = array<i64: 1, 1, 128>}, {transform_indices = @transform_14, window_bounds = array<i64: 1, 8, 128>}]} {
    %c0_i32 = arith.constant 0 : i32
    %0 = arith.cmpi eq, %arg1, %c0_i32 : i32
    %1 = arith.extui %0 : i1 to i32
    %c0_i32_0 = arith.constant 0 : i32
    %2 = arith.cmpi ne, %1, %c0_i32_0 : i32
    scf.if %2 {
      %c0_78 = arith.constant 0 : index
      %c0_79 = arith.constant 0 : index
      %c0_80 = arith.constant 0 : index
      %187 = vector.load %arg2[%c0_78, %c0_79, %c0_80] : memref<1x8x128xf32, #tpu.memory_space<vmem>>, vector<1x8x128xf32>
      %188 = vector.shape_cast %187 : vector<1x8x128xf32> to vector<8x128xf32>
      %c0_81 = arith.constant 0 : index
      %c0_82 = arith.constant 0 : index
      %189 = vector.load %arg17[%c0_81, %c0_82] : memref<8x128xf32, #tpu.memory_space<vmem>>, vector<8x128xf32>
      tpu.vector_store %arg17[%c0_81, %c0_82], %188 {strides = array<i32>} : memref<8x128xf32, #tpu.memory_space<vmem>>, vector<8x128xf32>,
    } else {
    }
    %c0 = arith.constant 0 : index
    %c0_1 = arith.constant 0 : index
    %3 = vector.load %arg17[%c0, %c0_1] : memref<8x128xf32, #tpu.memory_space<vmem>>, vector<8x128xf32>
    %c0_2 = arith.constant 0 : index
    %c0_3 = arith.constant 0 : index
    %c0_4 = arith.constant 0 : index
    %4 = vector.load %arg4[%c0_2, %c0_3, %c0_4] : memref<1x128x384xbf16, #tpu.memory_space<vmem>>, vector<1x128x384xbf16>
    %5 = vector.shape_cast %4 : vector<1x128x384xbf16> to vector<128x384xbf16>
    %c0_5 = arith.constant 0 : index
    %c0_6 = arith.constant 0 : index
    %c0_7 = arith.constant 0 : index
    %6 = vector.load %arg5[%c0_5, %c0_6, %c0_7] : memref<1x1x384xf32, #tpu.memory_space<vmem>>, vector<1x1x384xf32>
    %7 = vector.shape_cast %6 : vector<1x1x384xf32> to vector<1x384xf32>
    %c0_8 = arith.constant 0 : index
    %c0_9 = arith.constant 0 : index
    %c0_10 = arith.constant 0 : index
    %8 = vector.load %arg6[%c0_8, %c0_9, %c0_10] : memref<1x128x128xbf16, #tpu.memory_space<vmem>>, vector<1x128x128xbf16>
    %9 = vector.shape_cast %8 : vector<1x128x128xbf16> to vector<128x128xbf16>
    %c0_11 = arith.constant 0 : index
    %c0_12 = arith.constant 0 : index
    %c0_13 = arith.constant 0 : index
    %10 = vector.load %arg7[%c0_11, %c0_12, %c0_13] : memref<1x1x128xf32, #tpu.memory_space<vmem>>, vector<1x1x128xf32>
    %11 = vector.shape_cast %10 : vector<1x1x128xf32> to vector<1x128xf32>
    %c0_14 = arith.constant 0 : index
    %c0_15 = arith.constant 0 : index
    %c0_16 = arith.constant 0 : index
    %12 = vector.load %arg8[%c0_14, %c0_15, %c0_16] : memref<1x1x128xf32, #tpu.memory_space<vmem>>, vector<1x1x128xf32>
    %13 = vector.shape_cast %12 : vector<1x1x128xf32> to vector<1x128xf32>
    %c0_17 = arith.constant 0 : index
    %c0_18 = arith.constant 0 : index
    %c0_19 = arith.constant 0 : index
    %14 = vector.load %arg9[%c0_17, %c0_18, %c0_19] : memref<1x1x128xf32, #tpu.memory_space<vmem>>, vector<1x1x128xf32>
    %15 = vector.shape_cast %14 : vector<1x1x128xf32> to vector<1x128xf32>
    %c0_20 = arith.constant 0 : index
    %c0_21 = arith.constant 0 : index
    %c0_22 = arith.constant 0 : index
    %16 = vector.load %arg3[%c0_20, %c0_21, %c0_22] : memref<1x1x8xf32, #tpu.memory_space<vmem>>, vector<1x1x8xf32>
    %17 = vector.shape_cast %16 : vector<1x1x8xf32> to vector<1x8xf32>
    %18 = arith.truncf %3 : vector<8x128xf32> to vector<8x128xbf16>
    %cst = arith.constant dense<0.000000e+00> : vector<8x384xf32>
    %19 = tpu.matmul %18, %5, %cst {dimension_numbers = #tpu.dot_dimension_numbers<[1], [0], [0], [1], [0, 0, 1, 1], [], []>} : vector<8x128xbf16>, vector<128x384xbf16>, vector<8x384xf32> -> vector<8x384xf32>
    %20 = vector.broadcast %7 : vector<1x384xf32> to vector<8x384xf32>
    %21 = arith.addf %19, %20 : vector<8x384xf32>
    %22 = vector.extract_strided_slice %21 {offsets = [0, 0], sizes = [8, 32], strides = [1, 1]} : vector<8x384xf32> to vector<8x32xf32>
    %23 = vector.extract_strided_slice %21 {offsets = [0, 128], sizes = [8, 32], strides = [1, 1]} : vector<8x384xf32> to vector<8x32xf32>
    %24 = vector.extract_strided_slice %21 {offsets = [0, 256], sizes = [8, 32], strides = [1, 1]} : vector<8x384xf32> to vector<8x32xf32>
    %25 = arith.truncf %22 : vector<8x32xf32> to vector<8x32xbf16>
    %26 = arith.truncf %23 : vector<8x32xf32> to vector<8x32xbf16>
    %cst_23 = arith.constant dense<0.000000e+00> : vector<8x8xf32>
    %27 = tpu.matmul %25, %26, %cst_23 {dimension_numbers = #tpu.dot_dimension_numbers<[1], [1], [0], [0], [0, 0, 1, 0], [], []>} : vector<8x32xbf16>, vector<8x32xbf16>, vector<8x8xf32> -> vector<8x8xf32>
    %cst_24 = arith.constant 0.176776692 : f32
    %28 = vector.broadcast %cst_24 : f32 to vector<8x8xf32>
    %29 = arith.mulf %27, %28 : vector<8x8xf32>
    %30 = vector.broadcast %17 : vector<1x8xf32> to vector<8x8xf32>
    %31 = arith.addf %29, %30 : vector<8x8xf32>
    %cst_25 = arith.constant dense<0xFF800000> : vector<8xf32>
    %32 = vector.multi_reduction <maximumf>, %31, %cst_25 [1] : vector<8x8xf32> to vector<8xf32>
    %33 = vector.shape_cast %32 : vector<8xf32> to vector<8x1xf32>
    %34 = vector.broadcast %33 : vector<8x1xf32> to vector<8x8xf32>
    %35 = arith.subf %31, %34 : vector<8x8xf32>
    %36 = math.exp %35 : vector<8x8xf32>
    %cst_26 = arith.constant dense<0.000000e+00> : vector<8xf32>
    %37 = vector.multi_reduction <add>, %36, %cst_26 [1] : vector<8x8xf32> to vector<8xf32>
    %38 = vector.shape_cast %37 : vector<8xf32> to vector<8x1xf32>
    %39 = tpu.reciprocal %38 {approx = true} : vector<8x1xf32> -> vector<8x1xf32>
    %40 = vector.broadcast %39 : vector<8x1xf32> to vector<8x8xf32>
    %41 = arith.mulf %36, %40 : vector<8x8xf32>
    %42 = arith.truncf %41 : vector<8x8xf32> to vector<8x8xbf16>
    %43 = arith.truncf %24 : vector<8x32xf32> to vector<8x32xbf16>
    %cst_27 = arith.constant dense<0.000000e+00> : vector<8x32xf32>
    %44 = tpu.matmul %42, %43, %cst_27 {dimension_numbers = #tpu.dot_dimension_numbers<[1], [0], [0], [1], [0, 0, 1, 1], [], []>} : vector<8x8xbf16>, vector<8x32xbf16>, vector<8x32xf32> -> vector<8x32xf32>
    %45 = vector.extract_strided_slice %21 {offsets = [0, 32], sizes = [8, 32], strides = [1, 1]} : vector<8x384xf32> to vector<8x32xf32>
    %46 = vector.extract_strided_slice %21 {offsets = [0, 160], sizes = [8, 32], strides = [1, 1]} : vector<8x384xf32> to vector<8x32xf32>
    %47 = vector.extract_strided_slice %21 {offsets = [0, 288], sizes = [8, 32], strides = [1, 1]} : vector<8x384xf32> to vector<8x32xf32>
    %48 = arith.truncf %45 : vector<8x32xf32> to vector<8x32xbf16>
    %49 = arith.truncf %46 : vector<8x32xf32> to vector<8x32xbf16>
    %cst_28 = arith.constant dense<0.000000e+00> : vector<8x8xf32>
    %50 = tpu.matmul %48, %49, %cst_28 {dimension_numbers = #tpu.dot_dimension_numbers<[1], [1], [0], [0], [0, 0, 1, 0], [], []>} : vector<8x32xbf16>, vector<8x32xbf16>, vector<8x8xf32> -> vector<8x8xf32>
    %cst_29 = arith.constant 0.176776692 : f32
    %51 = vector.broadcast %cst_29 : f32 to vector<8x8xf32>
    %52 = arith.mulf %50, %51 : vector<8x8xf32>
    %53 = vector.broadcast %17 : vector<1x8xf32> to vector<8x8xf32>
    %54 = arith.addf %52, %53 : vector<8x8xf32>
    %cst_30 = arith.constant dense<0xFF800000> : vector<8xf32>
    %55 = vector.multi_reduction <maximumf>, %54, %cst_30 [1] : vector<8x8xf32> to vector<8xf32>
    %56 = vector.shape_cast %55 : vector<8xf32> to vector<8x1xf32>
    %57 = vector.broadcast %56 : vector<8x1xf32> to vector<8x8xf32>
    %58 = arith.subf %54, %57 : vector<8x8xf32>
    %59 = math.exp %58 : vector<8x8xf32>
    %cst_31 = arith.constant dense<0.000000e+00> : vector<8xf32>
    %60 = vector.multi_reduction <add>, %59, %cst_31 [1] : vector<8x8xf32> to vector<8xf32>
    %61 = vector.shape_cast %60 : vector<8xf32> to vector<8x1xf32>
    %62 = tpu.reciprocal %61 {approx = true} : vector<8x1xf32> -> vector<8x1xf32>
    %63 = vector.broadcast %62 : vector<8x1xf32> to vector<8x8xf32>
    %64 = arith.mulf %59, %63 : vector<8x8xf32>
    %65 = arith.truncf %64 : vector<8x8xf32> to vector<8x8xbf16>
    %66 = arith.truncf %47 : vector<8x32xf32> to vector<8x32xbf16>
    %cst_32 = arith.constant dense<0.000000e+00> : vector<8x32xf32>
    %67 = tpu.matmul %65, %66, %cst_32 {dimension_numbers = #tpu.dot_dimension_numbers<[1], [0], [0], [1], [0, 0, 1, 1], [], []>} : vector<8x8xbf16>, vector<8x32xbf16>, vector<8x32xf32> -> vector<8x32xf32>
    %68 = vector.extract_strided_slice %21 {offsets = [0, 64], sizes = [8, 32], strides = [1, 1]} : vector<8x384xf32> to vector<8x32xf32>
    %69 = vector.extract_strided_slice %21 {offsets = [0, 192], sizes = [8, 32], strides = [1, 1]} : vector<8x384xf32> to vector<8x32xf32>
    %70 = vector.extract_strided_slice %21 {offsets = [0, 320], sizes = [8, 32], strides = [1, 1]} : vector<8x384xf32> to vector<8x32xf32>
    %71 = arith.truncf %68 : vector<8x32xf32> to vector<8x32xbf16>
    %72 = arith.truncf %69 : vector<8x32xf32> to vector<8x32xbf16>
    %cst_33 = arith.constant dense<0.000000e+00> : vector<8x8xf32>
    %73 = tpu.matmul %71, %72, %cst_33 {dimension_numbers = #tpu.dot_dimension_numbers<[1], [1], [0], [0], [0, 0, 1, 0], [], []>} : vector<8x32xbf16>, vector<8x32xbf16>, vector<8x8xf32> -> vector<8x8xf32>
    %cst_34 = arith.constant 0.176776692 : f32
    %74 = vector.broadcast %cst_34 : f32 to vector<8x8xf32>
    %75 = arith.mulf %73, %74 : vector<8x8xf32>
    %76 = vector.broadcast %17 : vector<1x8xf32> to vector<8x8xf32>
    %77 = arith.addf %75, %76 : vector<8x8xf32>
    %cst_35 = arith.constant dense<0xFF800000> : vector<8xf32>
    %78 = vector.multi_reduction <maximumf>, %77, %cst_35 [1] : vector<8x8xf32> to vector<8xf32>
    %79 = vector.shape_cast %78 : vector<8xf32> to vector<8x1xf32>
    %80 = vector.broadcast %79 : vector<8x1xf32> to vector<8x8xf32>
    %81 = arith.subf %77, %80 : vector<8x8xf32>
    %82 = math.exp %81 : vector<8x8xf32>
    %cst_36 = arith.constant dense<0.000000e+00> : vector<8xf32>
    %83 = vector.multi_reduction <add>, %82, %cst_36 [1] : vector<8x8xf32> to vector<8xf32>
    %84 = vector.shape_cast %83 : vector<8xf32> to vector<8x1xf32>
    %85 = tpu.reciprocal %84 {approx = true} : vector<8x1xf32> -> vector<8x1xf32>
    %86 = vector.broadcast %85 : vector<8x1xf32> to vector<8x8xf32>
    %87 = arith.mulf %82, %86 : vector<8x8xf32>
    %88 = arith.truncf %87 : vector<8x8xf32> to vector<8x8xbf16>
    %89 = arith.truncf %70 : vector<8x32xf32> to vector<8x32xbf16>
    %cst_37 = arith.constant dense<0.000000e+00> : vector<8x32xf32>
    %90 = tpu.matmul %88, %89, %cst_37 {dimension_numbers = #tpu.dot_dimension_numbers<[1], [0], [0], [1], [0, 0, 1, 1], [], []>} : vector<8x8xbf16>, vector<8x32xbf16>, vector<8x32xf32> -> vector<8x32xf32>
    %91 = vector.extract_strided_slice %21 {offsets = [0, 96], sizes = [8, 32], strides = [1, 1]} : vector<8x384xf32> to vector<8x32xf32>
    %92 = vector.extract_strided_slice %21 {offsets = [0, 224], sizes = [8, 32], strides = [1, 1]} : vector<8x384xf32> to vector<8x32xf32>
    %93 = vector.extract_strided_slice %21 {offsets = [0, 352], sizes = [8, 32], strides = [1, 1]} : vector<8x384xf32> to vector<8x32xf32>
    %94 = arith.truncf %91 : vector<8x32xf32> to vector<8x32xbf16>
    %95 = arith.truncf %92 : vector<8x32xf32> to vector<8x32xbf16>
    %cst_38 = arith.constant dense<0.000000e+00> : vector<8x8xf32>
    %96 = tpu.matmul %94, %95, %cst_38 {dimension_numbers = #tpu.dot_dimension_numbers<[1], [1], [0], [0], [0, 0, 1, 0], [], []>} : vector<8x32xbf16>, vector<8x32xbf16>, vector<8x8xf32> -> vector<8x8xf32>
    %cst_39 = arith.constant 0.176776692 : f32
    %97 = vector.broadcast %cst_39 : f32 to vector<8x8xf32>
    %98 = arith.mulf %96, %97 : vector<8x8xf32>
    %99 = vector.broadcast %17 : vector<1x8xf32> to vector<8x8xf32>
    %100 = arith.addf %98, %99 : vector<8x8xf32>
    %cst_40 = arith.constant dense<0xFF800000> : vector<8xf32>
    %101 = vector.multi_reduction <maximumf>, %100, %cst_40 [1] : vector<8x8xf32> to vector<8xf32>
    %102 = vector.shape_cast %101 : vector<8xf32> to vector<8x1xf32>
    %103 = vector.broadcast %102 : vector<8x1xf32> to vector<8x8xf32>
    %104 = arith.subf %100, %103 : vector<8x8xf32>
    %105 = math.exp %104 : vector<8x8xf32>
    %cst_41 = arith.constant dense<0.000000e+00> : vector<8xf32>
    %106 = vector.multi_reduction <add>, %105, %cst_41 [1] : vector<8x8xf32> to vector<8xf32>
    %107 = vector.shape_cast %106 : vector<8xf32> to vector<8x1xf32>
    %108 = tpu.reciprocal %107 {approx = true} : vector<8x1xf32> -> vector<8x1xf32>
    %109 = vector.broadcast %108 : vector<8x1xf32> to vector<8x8xf32>
    %110 = arith.mulf %105, %109 : vector<8x8xf32>
    %111 = arith.truncf %110 : vector<8x8xf32> to vector<8x8xbf16>
    %112 = arith.truncf %93 : vector<8x32xf32> to vector<8x32xbf16>
    %cst_42 = arith.constant dense<0.000000e+00> : vector<8x32xf32>
    %113 = tpu.matmul %111, %112, %cst_42 {dimension_numbers = #tpu.dot_dimension_numbers<[1], [0], [0], [1], [0, 0, 1, 1], [], []>} : vector<8x8xbf16>, vector<8x32xbf16>, vector<8x32xf32> -> vector<8x32xf32>
    %114 = tpu.concatenate %44, %67, %90, %113 in 1 : vector<8x32xf32>, vector<8x32xf32>, vector<8x32xf32>, vector<8x32xf32> -> vector<8x128xf32>
    %115 = arith.truncf %114 : vector<8x128xf32> to vector<8x128xbf16>
    %cst_43 = arith.constant dense<0.000000e+00> : vector<8x128xf32>
    %116 = tpu.matmul %115, %9, %cst_43 {dimension_numbers = #tpu.dot_dimension_numbers<[1], [0], [0], [1], [0, 0, 1, 1], [], []>} : vector<8x128xbf16>, vector<128x128xbf16>, vector<8x128xf32> -> vector<8x128xf32>
    %117 = vector.broadcast %11 : vector<1x128xf32> to vector<8x128xf32>
    %118 = arith.addf %116, %117 : vector<8x128xf32>
    %119 = arith.addf %118, %3 : vector<8x128xf32>
    %cst_44 = arith.constant dense<0.000000e+00> : vector<8xf32>
    %120 = vector.multi_reduction <add>, %119, %cst_44 [1] : vector<8x128xf32> to vector<8xf32>
    %121 = vector.shape_cast %120 : vector<8xf32> to vector<8x1xf32>
    %cst_45 = arith.constant 1.280000e+02 : f32
    %122 = vector.broadcast %cst_45 : f32 to vector<8x1xf32>
    %123 = arith.divf %121, %122 : vector<8x1xf32>
    %124 = vector.broadcast %123 : vector<8x1xf32> to vector<8x128xf32>
    %125 = arith.subf %119, %124 : vector<8x128xf32>
    %126 = arith.mulf %125, %125 : vector<8x128xf32>
    %cst_46 = arith.constant dense<0.000000e+00> : vector<8xf32>
    %127 = vector.multi_reduction <add>, %126, %cst_46 [1] : vector<8x128xf32> to vector<8xf32>
    %128 = vector.shape_cast %127 : vector<8xf32> to vector<8x1xf32>
    %cst_47 = arith.constant 1.280000e+02 : f32
    %129 = vector.broadcast %cst_47 : f32 to vector<8x1xf32>
    %130 = arith.divf %128, %129 : vector<8x1xf32>
    %cst_48 = arith.constant 9.99999974E-6 : f32
    %131 = vector.broadcast %cst_48 : f32 to vector<8x1xf32>
    %132 = arith.addf %130, %131 : vector<8x1xf32>
    %133 = math.rsqrt %132 : vector<8x1xf32>
    %134 = vector.broadcast %133 : vector<8x1xf32> to vector<8x128xf32>
    %135 = arith.mulf %125, %134 : vector<8x128xf32>
    %136 = vector.broadcast %13 : vector<1x128xf32> to vector<8x128xf32>
    %137 = arith.mulf %135, %136 : vector<8x128xf32>
    %138 = vector.broadcast %15 : vector<1x128xf32> to vector<8x128xf32>
    %139 = arith.addf %137, %138 : vector<8x128xf32>
    %c0_49 = arith.constant 0 : index
    %c0_50 = arith.constant 0 : index
    %c0_51 = arith.constant 0 : index
    %140 = vector.load %arg10[%c0_49, %c0_50, %c0_51] : memref<1x128x512xbf16, #tpu.memory_space<vmem>>, vector<1x128x512xbf16>
    %141 = vector.shape_cast %140 : vector<1x128x512xbf16> to vector<128x512xbf16>
    %c0_52 = arith.constant 0 : index
    %c0_53 = arith.constant 0 : index
    %c0_54 = arith.constant 0 : index
    %142 = vector.load %arg11[%c0_52, %c0_53, %c0_54] : memref<1x1x512xf32, #tpu.memory_space<vmem>>, vector<1x1x512xf32>
    %143 = vector.shape_cast %142 : vector<1x1x512xf32> to vector<1x512xf32>
    %c0_55 = arith.constant 0 : index
    %c0_56 = arith.constant 0 : index
    %c0_57 = arith.constant 0 : index
    %144 = vector.load %arg12[%c0_55, %c0_56, %c0_57] : memref<1x512x128xbf16, #tpu.memory_space<vmem>>, vector<1x512x128xbf16>
    %145 = vector.shape_cast %144 : vector<1x512x128xbf16> to vector<512x128xbf16>
    %c0_58 = arith.constant 0 : index
    %c0_59 = arith.constant 0 : index
    %c0_60 = arith.constant 0 : index
    %146 = vector.load %arg13[%c0_58, %c0_59, %c0_60] : memref<1x1x128xf32, #tpu.memory_space<vmem>>, vector<1x1x128xf32>
    %147 = vector.shape_cast %146 : vector<1x1x128xf32> to vector<1x128xf32>
    %c0_61 = arith.constant 0 : index
    %c0_62 = arith.constant 0 : index
    %c0_63 = arith.constant 0 : index
    %148 = vector.load %arg14[%c0_61, %c0_62, %c0_63] : memref<1x1x128xf32, #tpu.memory_space<vmem>>, vector<1x1x128xf32>
    %149 = vector.shape_cast %148 : vector<1x1x128xf32> to vector<1x128xf32>
    %c0_64 = arith.constant 0 : index
    %c0_65 = arith.constant 0 : index
    %c0_66 = arith.constant 0 : index
    %150 = vector.load %arg15[%c0_64, %c0_65, %c0_66] : memref<1x1x128xf32, #tpu.memory_space<vmem>>, vector<1x1x128xf32>
    %151 = vector.shape_cast %150 : vector<1x1x128xf32> to vector<1x128xf32>
    %152 = arith.truncf %139 : vector<8x128xf32> to vector<8x128xbf16>
    %cst_67 = arith.constant dense<0.000000e+00> : vector<8x512xf32>
    %153 = tpu.matmul %152, %141, %cst_67 {dimension_numbers = #tpu.dot_dimension_numbers<[1], [0], [0], [1], [0, 0, 1, 1], [], []>} : vector<8x128xbf16>, vector<128x512xbf16>, vector<8x512xf32> -> vector<8x512xf32>
    %154 = vector.broadcast %143 : vector<1x512xf32> to vector<8x512xf32>
    %155 = arith.addf %153, %154 : vector<8x512xf32>
    %cst_68 = arith.constant 0.000000e+00 : f32
    %156 = vector.broadcast %cst_68 : f32 to vector<8x512xf32>
    %157 = arith.maximumf %155, %156 : vector<8x512xf32>
    %158 = arith.truncf %157 : vector<8x512xf32> to vector<8x512xbf16>
    %cst_69 = arith.constant dense<0.000000e+00> : vector<8x128xf32>
    %159 = tpu.matmul %158, %145, %cst_69 {dimension_numbers = #tpu.dot_dimension_numbers<[1], [0], [0], [1], [0, 0, 1, 1], [], []>} : vector<8x512xbf16>, vector<512x128xbf16>, vector<8x128xf32> -> vector<8x128xf32>
    %160 = vector.broadcast %147 : vector<1x128xf32> to vector<8x128xf32>
    %161 = arith.addf %159, %160 : vector<8x128xf32>
    %162 = arith.addf %161, %139 : vector<8x128xf32>
    %cst_70 = arith.constant dense<0.000000e+00> : vector<8xf32>
    %163 = vector.multi_reduction <add>, %162, %cst_70 [1] : vector<8x128xf32> to vector<8xf32>
    %164 = vector.shape_cast %163 : vector<8xf32> to vector<8x1xf32>
    %cst_71 = arith.constant 1.280000e+02 : f32
    %165 = vector.broadcast %cst_71 : f32 to vector<8x1xf32>
    %166 = arith.divf %164, %165 : vector<8x1xf32>
    %167 = vector.broadcast %166 : vector<8x1xf32> to vector<8x128xf32>
    %168 = arith.subf %162, %167 : vector<8x128xf32>
    %169 = arith.mulf %168, %168 : vector<8x128xf32>
    %cst_72 = arith.constant dense<0.000000e+00> : vector<8xf32>
    %170 = vector.multi_reduction <add>, %169, %cst_72 [1] : vector<8x128xf32> to vector<8xf32>
    %171 = vector.shape_cast %170 : vector<8xf32> to vector<8x1xf32>
    %cst_73 = arith.constant 1.280000e+02 : f32
    %172 = vector.broadcast %cst_73 : f32 to vector<8x1xf32>
    %173 = arith.divf %171, %172 : vector<8x1xf32>
    %cst_74 = arith.constant 9.99999974E-6 : f32
    %174 = vector.broadcast %cst_74 : f32 to vector<8x1xf32>
    %175 = arith.addf %173, %174 : vector<8x1xf32>
    %176 = math.rsqrt %175 : vector<8x1xf32>
    %177 = vector.broadcast %176 : vector<8x1xf32> to vector<8x128xf32>
    %178 = arith.mulf %168, %177 : vector<8x128xf32>
    %179 = vector.broadcast %149 : vector<1x128xf32> to vector<8x128xf32>
    %180 = arith.mulf %178, %179 : vector<8x128xf32>
    %181 = vector.broadcast %151 : vector<1x128xf32> to vector<8x128xf32>
    %182 = arith.addf %180, %181 : vector<8x128xf32>
    %c0_75 = arith.constant 0 : index
    %c0_76 = arith.constant 0 : index
    %183 = vector.load %arg17[%c0_75, %c0_76] : memref<8x128xf32, #tpu.memory_space<vmem>>, vector<8x128xf32>
    tpu.vector_store %arg17[%c0_75, %c0_76], %182 {strides = array<i32>} : memref<8x128xf32, #tpu.memory_space<vmem>>, vector<8x128xf32>,
    %c3_i32 = arith.constant 3 : i32
    %184 = arith.cmpi eq, %arg1, %c3_i32 : i32
    %185 = arith.extui %184 : i1 to i32
    %c0_i32_77 = arith.constant 0 : i32
    %186 = arith.cmpi ne, %185, %c0_i32_77 : i32
    scf.if %186 {
      %c0_78 = arith.constant 0 : index
      %c0_79 = arith.constant 0 : index
      %c0_80 = arith.constant 0 : index
      %187 = vector.load %arg16[%c0_78, %c0_79, %c0_80] : memref<1x8x128xf32, #tpu.memory_space<vmem>>, vector<1x8x128xf32>
      %188 = vector.shape_cast %187 : vector<1x8x128xf32> to vector<8x128xf32>
      %189 = vector.shape_cast %182 : vector<8x128xf32> to vector<1x8x128xf32>
      tpu.vector_store %arg16[%c0_78, %c0_79, %c0_80], %189 {strides = array<i32>} : memref<1x8x128xf32, #tpu.memory_space<vmem>>, vector<1x8x128xf32>,
    } else {
    }
    return
  }
  func.func @transform_0(%arg0: i32, %arg1: i32) -> (i32, i32, i32) {
    %c0_i32 = arith.constant 0 : i32
    %c0_i32_0 = arith.constant 0 : i32
    %c0_i32_1 = arith.constant 0 : i32
    return %arg0, %c0_i32, %c0_i32_0 : i32, i32, i32
  }
  func.func @transform_1(%arg0: i32, %arg1: i32) -> (i32, i32, i32) {
    %c0_i32 = arith.constant 0 : i32
    %c0_i32_0 = arith.constant 0 : i32
    %c0_i32_1 = arith.constant 0 : i32
    return %arg0, %c0_i32, %c0_i32_0 : i32, i32, i32
  }
  func.func @transform_2(%arg0: i32, %arg1: i32) -> (i32, i32, i32) {
    %c0_i32 = arith.constant 0 : i32
    %c0_i32_0 = arith.constant 0 : i32
    %c0_i32_1 = arith.constant 0 : i32
    return %arg1, %c0_i32, %c0_i32_0 : i32, i32, i32
  }
  func.func @transform_3(%arg0: i32, %arg1: i32) -> (i32, i32, i32) {
    %c0_i32 = arith.constant 0 : i32
    %c0_i32_0 = arith.constant 0 : i32
    %c0_i32_1 = arith.constant 0 : i32
    return %arg1, %c0_i32, %c0_i32_0 : i32, i32, i32
  }
  func.func @transform_4(%arg0: i32, %arg1: i32) -> (i32, i32, i32) {
    %c0_i32 = arith.constant 0 : i32
    %c0_i32_0 = arith.constant 0 : i32
    %c0_i32_1 = arith.constant 0 : i32
    return %arg1, %c0_i32, %c0_i32_0 : i32, i32, i32
  }
  func.func @transform_5(%arg0: i32, %arg1: i32) -> (i32, i32, i32) {
    %c0_i32 = arith.constant 0 : i32
    %c0_i32_0 = arith.constant 0 : i32
    %c0_i32_1 = arith.constant 0 : i32
    return %arg1, %c0_i32, %c0_i32_0 : i32, i32, i32
  }
  func.func @transform_6(%arg0: i32, %arg1: i32) -> (i32, i32, i32) {
    %c0_i32 = arith.constant 0 : i32
    %c0_i32_0 = arith.constant 0 : i32
    %c0_i32_1 = arith.constant 0 : i32
    return %arg1, %c0_i32, %c0_i32_0 : i32, i32, i32
  }
  func.func @transform_7(%arg0: i32, %arg1: i32) -> (i32, i32, i32) {
    %c0_i32 = arith.constant 0 : i32
    %c0_i32_0 = arith.constant 0 : i32
    %c0_i32_1 = arith.constant 0 : i32
    return %arg1, %c0_i32, %c0_i32_0 : i32, i32, i32
  }
  func.func @transform_8(%arg0: i32, %arg1: i32) -> (i32, i32, i32) {
    %c0_i32 = arith.constant 0 : i32
    %c0_i32_0 = arith.constant 0 : i32
    %c0_i32_1 = arith.constant 0 : i32
    return %arg1, %c0_i32, %c0_i32_0 : i32, i32, i32
  }
  func.func @transform_9(%arg0: i32, %arg1: i32) -> (i32, i32, i32) {
    %c0_i32 = arith.constant 0 : i32
    %c0_i32_0 = arith.constant 0 : i32
    %c0_i32_1 = arith.constant 0 : i32
    return %arg1, %c0_i32, %c0_i32_0 : i32, i32, i32
  }
  func.func @transform_10(%arg0: i32, %arg1: i32) -> (i32, i32, i32) {
    %c0_i32 = arith.constant 0 : i32
    %c0_i32_0 = arith.constant 0 : i32
    %c0_i32_1 = arith.constant 0 : i32
    return %arg1, %c0_i32, %c0_i32_0 : i32, i32, i32
  }
  func.func @transform_11(%arg0: i32, %arg1: i32) -> (i32, i32, i32) {
    %c0_i32 = arith.constant 0 : i32
    %c0_i32_0 = arith.constant 0 : i32
    %c0_i32_1 = arith.constant 0 : i32
    return %arg1, %c0_i32, %c0_i32_0 : i32, i32, i32
  }
  func.func @transform_12(%arg0: i32, %arg1: i32) -> (i32, i32, i32) {
    %c0_i32 = arith.constant 0 : i32
    %c0_i32_0 = arith.constant 0 : i32
    %c0_i32_1 = arith.constant 0 : i32
    return %arg1, %c0_i32, %c0_i32_0 : i32, i32, i32
  }
  func.func @transform_13(%arg0: i32, %arg1: i32) -> (i32, i32, i32) {
    %c0_i32 = arith.constant 0 : i32
    %c0_i32_0 = arith.constant 0 : i32
    %c0_i32_1 = arith.constant 0 : i32
    return %arg1, %c0_i32, %c0_i32_0 : i32, i32, i32
  }
  func.func @transform_14(%arg0: i32, %arg1: i32) -> (i32, i32, i32) {
    %c0_i32 = arith.constant 0 : i32
    %c0_i32_0 = arith.constant 0 : i32
    %c0_i32_1 = arith.constant 0 : i32
    return %arg0, %c0_i32, %c0_i32_0 : i32, i32, i32
  }
}

module attributes {stable_mosaic.version = 11 : i64} {
  func.func @_decoder_stack_kernel(%arg0: i32, %arg1: i32, %arg2: memref<1x16x128xf32, #tpu.memory_space<vmem>>, %arg3: memref<1x8x128xf32, #tpu.memory_space<vmem>>, %arg4: memref<1x1x8xf32, #tpu.memory_space<vmem>>, %arg5: memref<1x8x32xf32, #tpu.memory_space<vmem>>, %arg6: memref<128x33xbf16, #tpu.memory_space<vmem>>, %arg7: memref<1x33xf32, #tpu.memory_space<vmem>>, %arg8: memref<1x128x384xbf16, #tpu.memory_space<vmem>>, %arg9: memref<1x1x384xf32, #tpu.memory_space<vmem>>, %arg10: memref<1x128x128xbf16, #tpu.memory_space<vmem>>, %arg11: memref<1x1x128xf32, #tpu.memory_space<vmem>>, %arg12: memref<1x1x128xf32, #tpu.memory_space<vmem>>, %arg13: memref<1x1x128xf32, #tpu.memory_space<vmem>>, %arg14: memref<1x128x128xbf16, #tpu.memory_space<vmem>>, %arg15: memref<1x1x128xf32, #tpu.memory_space<vmem>>, %arg16: memref<1x128x256xbf16, #tpu.memory_space<vmem>>, %arg17: memref<1x1x256xf32, #tpu.memory_space<vmem>>, %arg18: memref<1x128x128xbf16, #tpu.memory_space<vmem>>, %arg19: memref<1x1x128xf32, #tpu.memory_space<vmem>>, %arg20: memref<1x1x128xf32, #tpu.memory_space<vmem>>, %arg21: memref<1x1x128xf32, #tpu.memory_space<vmem>>, %arg22: memref<1x128x512xbf16, #tpu.memory_space<vmem>>, %arg23: memref<1x1x512xf32, #tpu.memory_space<vmem>>, %arg24: memref<1x512x128xbf16, #tpu.memory_space<vmem>>, %arg25: memref<1x1x128xf32, #tpu.memory_space<vmem>>, %arg26: memref<1x1x128xf32, #tpu.memory_space<vmem>>, %arg27: memref<1x1x128xf32, #tpu.memory_space<vmem>>, %arg28: memref<1x16x33xf32, #tpu.memory_space<vmem>>, %arg29: memref<1x16x32xf32, #tpu.memory_space<vmem>>, %arg30: memref<16x128xf32, #tpu.memory_space<vmem>>) attributes {dimension_semantics = [#tpu.dimension_semantics<parallel>, #tpu.dimension_semantics<arbitrary>], iteration_bounds = array<i64: 2, 4>, scalar_prefetch = 0 : i64, scratch_operands = 1 : i64, tpu.core_type = #tpu.core_type<tc>, window_params = [{transform_indices = @transform_0, window_bounds = array<i64: 1, 16, 128>}, {transform_indices = @transform_1, window_bounds = array<i64: 1, 8, 128>}, {transform_indices = @transform_2, window_bounds = array<i64: 1, 1, 8>}, {transform_indices = @transform_3, window_bounds = array<i64: 1, 8, 32>}, {pipeline_mode = #tpu.pipeline_mode<synchronous>, transform_indices = @transform_4, window_bounds = array<i64: 128, 33>}, {pipeline_mode = #tpu.pipeline_mode<synchronous>, transform_indices = @transform_5, window_bounds = array<i64: 1, 33>}, {transform_indices = @transform_6, window_bounds = array<i64: 1, 128, 384>}, {transform_indices = @transform_7, window_bounds = array<i64: 1, 1, 384>}, {transform_indices = @transform_8, window_bounds = array<i64: 1, 128, 128>}, {transform_indices = @transform_9, window_bounds = array<i64: 1, 1, 128>}, {transform_indices = @transform_10, window_bounds = array<i64: 1, 1, 128>}, {transform_indices = @transform_11, window_bounds = array<i64: 1, 1, 128>}, {transform_indices = @transform_12, window_bounds = array<i64: 1, 128, 128>}, {transform_indices = @transform_13, window_bounds = array<i64: 1, 1, 128>}, {transform_indices = @transform_14, window_bounds = array<i64: 1, 128, 256>}, {transform_indices = @transform_15, window_bounds = array<i64: 1, 1, 256>}, {transform_indices = @transform_16, window_bounds = array<i64: 1, 128, 128>}, {transform_indices = @transform_17, window_bounds = array<i64: 1, 1, 128>}, {transform_indices = @transform_18, window_bounds = array<i64: 1, 1, 128>}, {transform_indices = @transform_19, window_bounds = array<i64: 1, 1, 128>}, {transform_indices = @transform_20, window_bounds = array<i64: 1, 128, 512>}, {transform_indices = @transform_21, window_bounds = array<i64: 1, 1, 512>}, {transform_indices = @transform_22, window_bounds = array<i64: 1, 512, 128>}, {transform_indices = @transform_23, window_bounds = array<i64: 1, 1, 128>}, {transform_indices = @transform_24, window_bounds = array<i64: 1, 1, 128>}, {transform_indices = @transform_25, window_bounds = array<i64: 1, 1, 128>}, {transform_indices = @transform_26, window_bounds = array<i64: 1, 16, 33>}, {transform_indices = @transform_27, window_bounds = array<i64: 1, 16, 32>}]} {
    %c0_i32 = arith.constant 0 : i32
    %0 = arith.cmpi eq, %arg1, %c0_i32 : i32
    %1 = arith.extui %0 : i1 to i32
    %c0_i32_0 = arith.constant 0 : i32
    %2 = arith.cmpi ne, %1, %c0_i32_0 : i32
    scf.if %2 {
      %c0_136 = arith.constant 0 : index
      %c0_137 = arith.constant 0 : index
      %c0_138 = arith.constant 0 : index
      %334 = vector.load %arg2[%c0_136, %c0_137, %c0_138] : memref<1x16x128xf32, #tpu.memory_space<vmem>>, vector<1x16x128xf32>
      %335 = vector.shape_cast %334 : vector<1x16x128xf32> to vector<16x128xf32>
      %c0_139 = arith.constant 0 : index
      %c0_140 = arith.constant 0 : index
      %336 = vector.load %arg30[%c0_139, %c0_140] : memref<16x128xf32, #tpu.memory_space<vmem>>, vector<16x128xf32>
      tpu.vector_store %arg30[%c0_139, %c0_140], %335 {strides = array<i32>} : memref<16x128xf32, #tpu.memory_space<vmem>>, vector<16x128xf32>,
    } else {
    }
    %c0 = arith.constant 0 : index
    %c0_1 = arith.constant 0 : index
    %3 = vector.load %arg30[%c0, %c0_1] : memref<16x128xf32, #tpu.memory_space<vmem>>, vector<16x128xf32>
    %4 = tpu.iota {dimensions = array<i32: 0>} : vector<16x16xi32>
    %5 = tpu.iota {dimensions = array<i32: 1>} : vector<16x16xi32>
    %6 = arith.cmpi sgt, %5, %4 : vector<16x16xi32>
    %cst = arith.constant -1.000000e+09 : f32
    %cst_2 = arith.constant 0.000000e+00 : f32
    %7 = vector.broadcast %cst : f32 to vector<16x16xf32>
    %8 = vector.broadcast %cst_2 : f32 to vector<16x16xf32>
    %9 = arith.select %6, %7, %8 : vector<16x16xi1>, vector<16x16xf32>
    %c0_3 = arith.constant 0 : index
    %c0_4 = arith.constant 0 : index
    %c0_5 = arith.constant 0 : index
    %10 = vector.load %arg8[%c0_3, %c0_4, %c0_5] : memref<1x128x384xbf16, #tpu.memory_space<vmem>>, vector<1x128x384xbf16>
    %11 = vector.shape_cast %10 : vector<1x128x384xbf16> to vector<128x384xbf16>
    %c0_6 = arith.constant 0 : index
    %c0_7 = arith.constant 0 : index
    %c0_8 = arith.constant 0 : index
    %12 = vector.load %arg9[%c0_6, %c0_7, %c0_8] : memref<1x1x384xf32, #tpu.memory_space<vmem>>, vector<1x1x384xf32>
    %13 = vector.shape_cast %12 : vector<1x1x384xf32> to vector<1x384xf32>
    %c0_9 = arith.constant 0 : index
    %c0_10 = arith.constant 0 : index
    %c0_11 = arith.constant 0 : index
    %14 = vector.load %arg10[%c0_9, %c0_10, %c0_11] : memref<1x128x128xbf16, #tpu.memory_space<vmem>>, vector<1x128x128xbf16>
    %15 = vector.shape_cast %14 : vector<1x128x128xbf16> to vector<128x128xbf16>
    %c0_12 = arith.constant 0 : index
    %c0_13 = arith.constant 0 : index
    %c0_14 = arith.constant 0 : index
    %16 = vector.load %arg11[%c0_12, %c0_13, %c0_14] : memref<1x1x128xf32, #tpu.memory_space<vmem>>, vector<1x1x128xf32>
    %17 = vector.shape_cast %16 : vector<1x1x128xf32> to vector<1x128xf32>
    %c0_15 = arith.constant 0 : index
    %c0_16 = arith.constant 0 : index
    %c0_17 = arith.constant 0 : index
    %18 = vector.load %arg12[%c0_15, %c0_16, %c0_17] : memref<1x1x128xf32, #tpu.memory_space<vmem>>, vector<1x1x128xf32>
    %19 = vector.shape_cast %18 : vector<1x1x128xf32> to vector<1x128xf32>
    %c0_18 = arith.constant 0 : index
    %c0_19 = arith.constant 0 : index
    %c0_20 = arith.constant 0 : index
    %20 = vector.load %arg13[%c0_18, %c0_19, %c0_20] : memref<1x1x128xf32, #tpu.memory_space<vmem>>, vector<1x1x128xf32>
    %21 = vector.shape_cast %20 : vector<1x1x128xf32> to vector<1x128xf32>
    %22 = arith.truncf %3 : vector<16x128xf32> to vector<16x128xbf16>
    %cst_21 = arith.constant dense<0.000000e+00> : vector<16x384xf32>
    %23 = tpu.matmul %22, %11, %cst_21 {dimension_numbers = #tpu.dot_dimension_numbers<[1], [0], [0], [1], [0, 0, 1, 1], [], []>} : vector<16x128xbf16>, vector<128x384xbf16>, vector<16x384xf32> -> vector<16x384xf32>
    %24 = vector.broadcast %13 : vector<1x384xf32> to vector<16x384xf32>
    %25 = arith.addf %23, %24 : vector<16x384xf32>
    %26 = vector.extract_strided_slice %25 {offsets = [0, 0], sizes = [16, 32], strides = [1, 1]} : vector<16x384xf32> to vector<16x32xf32>
    %27 = vector.extract_strided_slice %25 {offsets = [0, 128], sizes = [16, 32], strides = [1, 1]} : vector<16x384xf32> to vector<16x32xf32>
    %28 = vector.extract_strided_slice %25 {offsets = [0, 256], sizes = [16, 32], strides = [1, 1]} : vector<16x384xf32> to vector<16x32xf32>
    %29 = arith.truncf %26 : vector<16x32xf32> to vector<16x32xbf16>
    %30 = arith.truncf %27 : vector<16x32xf32> to vector<16x32xbf16>
    %cst_22 = arith.constant dense<0.000000e+00> : vector<16x16xf32>
    %31 = tpu.matmul %29, %30, %cst_22 {dimension_numbers = #tpu.dot_dimension_numbers<[1], [1], [0], [0], [0, 0, 1, 0], [], []>} : vector<16x32xbf16>, vector<16x32xbf16>, vector<16x16xf32> -> vector<16x16xf32>
    %cst_23 = arith.constant 0.176776692 : f32
    %32 = vector.broadcast %cst_23 : f32 to vector<16x16xf32>
    %33 = arith.mulf %31, %32 : vector<16x16xf32>
    %34 = arith.addf %33, %9 : vector<16x16xf32>
    %cst_24 = arith.constant dense<0xFF800000> : vector<16xf32>
    %35 = vector.multi_reduction <maximumf>, %34, %cst_24 [1] : vector<16x16xf32> to vector<16xf32>
    %36 = vector.shape_cast %35 : vector<16xf32> to vector<16x1xf32>
    %37 = vector.broadcast %36 : vector<16x1xf32> to vector<16x16xf32>
    %38 = arith.subf %34, %37 : vector<16x16xf32>
    %39 = math.exp %38 : vector<16x16xf32>
    %cst_25 = arith.constant dense<0.000000e+00> : vector<16xf32>
    %40 = vector.multi_reduction <add>, %39, %cst_25 [1] : vector<16x16xf32> to vector<16xf32>
    %41 = vector.shape_cast %40 : vector<16xf32> to vector<16x1xf32>
    %42 = tpu.reciprocal %41 {approx = true} : vector<16x1xf32> -> vector<16x1xf32>
    %43 = vector.broadcast %42 : vector<16x1xf32> to vector<16x16xf32>
    %44 = arith.mulf %39, %43 : vector<16x16xf32>
    %45 = arith.truncf %44 : vector<16x16xf32> to vector<16x16xbf16>
    %46 = arith.truncf %28 : vector<16x32xf32> to vector<16x32xbf16>
    %cst_26 = arith.constant dense<0.000000e+00> : vector<16x32xf32>
    %47 = tpu.matmul %45, %46, %cst_26 {dimension_numbers = #tpu.dot_dimension_numbers<[1], [0], [0], [1], [0, 0, 1, 1], [], []>} : vector<16x16xbf16>, vector<16x32xbf16>, vector<16x32xf32> -> vector<16x32xf32>
    %48 = vector.extract_strided_slice %25 {offsets = [0, 32], sizes = [16, 32], strides = [1, 1]} : vector<16x384xf32> to vector<16x32xf32>
    %49 = vector.extract_strided_slice %25 {offsets = [0, 160], sizes = [16, 32], strides = [1, 1]} : vector<16x384xf32> to vector<16x32xf32>
    %50 = vector.extract_strided_slice %25 {offsets = [0, 288], sizes = [16, 32], strides = [1, 1]} : vector<16x384xf32> to vector<16x32xf32>
    %51 = arith.truncf %48 : vector<16x32xf32> to vector<16x32xbf16>
    %52 = arith.truncf %49 : vector<16x32xf32> to vector<16x32xbf16>
    %cst_27 = arith.constant dense<0.000000e+00> : vector<16x16xf32>
    %53 = tpu.matmul %51, %52, %cst_27 {dimension_numbers = #tpu.dot_dimension_numbers<[1], [1], [0], [0], [0, 0, 1, 0], [], []>} : vector<16x32xbf16>, vector<16x32xbf16>, vector<16x16xf32> -> vector<16x16xf32>
    %cst_28 = arith.constant 0.176776692 : f32
    %54 = vector.broadcast %cst_28 : f32 to vector<16x16xf32>
    %55 = arith.mulf %53, %54 : vector<16x16xf32>
    %56 = arith.addf %55, %9 : vector<16x16xf32>
    %cst_29 = arith.constant dense<0xFF800000> : vector<16xf32>
    %57 = vector.multi_reduction <maximumf>, %56, %cst_29 [1] : vector<16x16xf32> to vector<16xf32>
    %58 = vector.shape_cast %57 : vector<16xf32> to vector<16x1xf32>
    %59 = vector.broadcast %58 : vector<16x1xf32> to vector<16x16xf32>
    %60 = arith.subf %56, %59 : vector<16x16xf32>
    %61 = math.exp %60 : vector<16x16xf32>
    %cst_30 = arith.constant dense<0.000000e+00> : vector<16xf32>
    %62 = vector.multi_reduction <add>, %61, %cst_30 [1] : vector<16x16xf32> to vector<16xf32>
    %63 = vector.shape_cast %62 : vector<16xf32> to vector<16x1xf32>
    %64 = tpu.reciprocal %63 {approx = true} : vector<16x1xf32> -> vector<16x1xf32>
    %65 = vector.broadcast %64 : vector<16x1xf32> to vector<16x16xf32>
    %66 = arith.mulf %61, %65 : vector<16x16xf32>
    %67 = arith.truncf %66 : vector<16x16xf32> to vector<16x16xbf16>
    %68 = arith.truncf %50 : vector<16x32xf32> to vector<16x32xbf16>
    %cst_31 = arith.constant dense<0.000000e+00> : vector<16x32xf32>
    %69 = tpu.matmul %67, %68, %cst_31 {dimension_numbers = #tpu.dot_dimension_numbers<[1], [0], [0], [1], [0, 0, 1, 1], [], []>} : vector<16x16xbf16>, vector<16x32xbf16>, vector<16x32xf32> -> vector<16x32xf32>
    %70 = vector.extract_strided_slice %25 {offsets = [0, 64], sizes = [16, 32], strides = [1, 1]} : vector<16x384xf32> to vector<16x32xf32>
    %71 = vector.extract_strided_slice %25 {offsets = [0, 192], sizes = [16, 32], strides = [1, 1]} : vector<16x384xf32> to vector<16x32xf32>
    %72 = vector.extract_strided_slice %25 {offsets = [0, 320], sizes = [16, 32], strides = [1, 1]} : vector<16x384xf32> to vector<16x32xf32>
    %73 = arith.truncf %70 : vector<16x32xf32> to vector<16x32xbf16>
    %74 = arith.truncf %71 : vector<16x32xf32> to vector<16x32xbf16>
    %cst_32 = arith.constant dense<0.000000e+00> : vector<16x16xf32>
    %75 = tpu.matmul %73, %74, %cst_32 {dimension_numbers = #tpu.dot_dimension_numbers<[1], [1], [0], [0], [0, 0, 1, 0], [], []>} : vector<16x32xbf16>, vector<16x32xbf16>, vector<16x16xf32> -> vector<16x16xf32>
    %cst_33 = arith.constant 0.176776692 : f32
    %76 = vector.broadcast %cst_33 : f32 to vector<16x16xf32>
    %77 = arith.mulf %75, %76 : vector<16x16xf32>
    %78 = arith.addf %77, %9 : vector<16x16xf32>
    %cst_34 = arith.constant dense<0xFF800000> : vector<16xf32>
    %79 = vector.multi_reduction <maximumf>, %78, %cst_34 [1] : vector<16x16xf32> to vector<16xf32>
    %80 = vector.shape_cast %79 : vector<16xf32> to vector<16x1xf32>
    %81 = vector.broadcast %80 : vector<16x1xf32> to vector<16x16xf32>
    %82 = arith.subf %78, %81 : vector<16x16xf32>
    %83 = math.exp %82 : vector<16x16xf32>
    %cst_35 = arith.constant dense<0.000000e+00> : vector<16xf32>
    %84 = vector.multi_reduction <add>, %83, %cst_35 [1] : vector<16x16xf32> to vector<16xf32>
    %85 = vector.shape_cast %84 : vector<16xf32> to vector<16x1xf32>
    %86 = tpu.reciprocal %85 {approx = true} : vector<16x1xf32> -> vector<16x1xf32>
    %87 = vector.broadcast %86 : vector<16x1xf32> to vector<16x16xf32>
    %88 = arith.mulf %83, %87 : vector<16x16xf32>
    %89 = arith.truncf %88 : vector<16x16xf32> to vector<16x16xbf16>
    %90 = arith.truncf %72 : vector<16x32xf32> to vector<16x32xbf16>
    %cst_36 = arith.constant dense<0.000000e+00> : vector<16x32xf32>
    %91 = tpu.matmul %89, %90, %cst_36 {dimension_numbers = #tpu.dot_dimension_numbers<[1], [0], [0], [1], [0, 0, 1, 1], [], []>} : vector<16x16xbf16>, vector<16x32xbf16>, vector<16x32xf32> -> vector<16x32xf32>
    %92 = vector.extract_strided_slice %25 {offsets = [0, 96], sizes = [16, 32], strides = [1, 1]} : vector<16x384xf32> to vector<16x32xf32>
    %93 = vector.extract_strided_slice %25 {offsets = [0, 224], sizes = [16, 32], strides = [1, 1]} : vector<16x384xf32> to vector<16x32xf32>
    %94 = vector.extract_strided_slice %25 {offsets = [0, 352], sizes = [16, 32], strides = [1, 1]} : vector<16x384xf32> to vector<16x32xf32>
    %95 = arith.truncf %92 : vector<16x32xf32> to vector<16x32xbf16>
    %96 = arith.truncf %93 : vector<16x32xf32> to vector<16x32xbf16>
    %cst_37 = arith.constant dense<0.000000e+00> : vector<16x16xf32>
    %97 = tpu.matmul %95, %96, %cst_37 {dimension_numbers = #tpu.dot_dimension_numbers<[1], [1], [0], [0], [0, 0, 1, 0], [], []>} : vector<16x32xbf16>, vector<16x32xbf16>, vector<16x16xf32> -> vector<16x16xf32>
    %cst_38 = arith.constant 0.176776692 : f32
    %98 = vector.broadcast %cst_38 : f32 to vector<16x16xf32>
    %99 = arith.mulf %97, %98 : vector<16x16xf32>
    %100 = arith.addf %99, %9 : vector<16x16xf32>
    %cst_39 = arith.constant dense<0xFF800000> : vector<16xf32>
    %101 = vector.multi_reduction <maximumf>, %100, %cst_39 [1] : vector<16x16xf32> to vector<16xf32>
    %102 = vector.shape_cast %101 : vector<16xf32> to vector<16x1xf32>
    %103 = vector.broadcast %102 : vector<16x1xf32> to vector<16x16xf32>
    %104 = arith.subf %100, %103 : vector<16x16xf32>
    %105 = math.exp %104 : vector<16x16xf32>
    %cst_40 = arith.constant dense<0.000000e+00> : vector<16xf32>
    %106 = vector.multi_reduction <add>, %105, %cst_40 [1] : vector<16x16xf32> to vector<16xf32>
    %107 = vector.shape_cast %106 : vector<16xf32> to vector<16x1xf32>
    %108 = tpu.reciprocal %107 {approx = true} : vector<16x1xf32> -> vector<16x1xf32>
    %109 = vector.broadcast %108 : vector<16x1xf32> to vector<16x16xf32>
    %110 = arith.mulf %105, %109 : vector<16x16xf32>
    %111 = arith.truncf %110 : vector<16x16xf32> to vector<16x16xbf16>
    %112 = arith.truncf %94 : vector<16x32xf32> to vector<16x32xbf16>
    %cst_41 = arith.constant dense<0.000000e+00> : vector<16x32xf32>
    %113 = tpu.matmul %111, %112, %cst_41 {dimension_numbers = #tpu.dot_dimension_numbers<[1], [0], [0], [1], [0, 0, 1, 1], [], []>} : vector<16x16xbf16>, vector<16x32xbf16>, vector<16x32xf32> -> vector<16x32xf32>
    %114 = tpu.concatenate %47, %69, %91, %113 in 1 : vector<16x32xf32>, vector<16x32xf32>, vector<16x32xf32>, vector<16x32xf32> -> vector<16x128xf32>
    %115 = arith.truncf %114 : vector<16x128xf32> to vector<16x128xbf16>
    %cst_42 = arith.constant dense<0.000000e+00> : vector<16x128xf32>
    %116 = tpu.matmul %115, %15, %cst_42 {dimension_numbers = #tpu.dot_dimension_numbers<[1], [0], [0], [1], [0, 0, 1, 1], [], []>} : vector<16x128xbf16>, vector<128x128xbf16>, vector<16x128xf32> -> vector<16x128xf32>
    %117 = vector.broadcast %17 : vector<1x128xf32> to vector<16x128xf32>
    %118 = arith.addf %116, %117 : vector<16x128xf32>
    %119 = arith.addf %118, %3 : vector<16x128xf32>
    %cst_43 = arith.constant dense<0.000000e+00> : vector<16xf32>
    %120 = vector.multi_reduction <add>, %119, %cst_43 [1] : vector<16x128xf32> to vector<16xf32>
    %121 = vector.shape_cast %120 : vector<16xf32> to vector<16x1xf32>
    %cst_44 = arith.constant 1.280000e+02 : f32
    %122 = vector.broadcast %cst_44 : f32 to vector<16x1xf32>
    %123 = arith.divf %121, %122 : vector<16x1xf32>
    %124 = vector.broadcast %123 : vector<16x1xf32> to vector<16x128xf32>
    %125 = arith.subf %119, %124 : vector<16x128xf32>
    %126 = arith.mulf %125, %125 : vector<16x128xf32>
    %cst_45 = arith.constant dense<0.000000e+00> : vector<16xf32>
    %127 = vector.multi_reduction <add>, %126, %cst_45 [1] : vector<16x128xf32> to vector<16xf32>
    %128 = vector.shape_cast %127 : vector<16xf32> to vector<16x1xf32>
    %cst_46 = arith.constant 1.280000e+02 : f32
    %129 = vector.broadcast %cst_46 : f32 to vector<16x1xf32>
    %130 = arith.divf %128, %129 : vector<16x1xf32>
    %cst_47 = arith.constant 9.99999974E-6 : f32
    %131 = vector.broadcast %cst_47 : f32 to vector<16x1xf32>
    %132 = arith.addf %130, %131 : vector<16x1xf32>
    %133 = math.rsqrt %132 : vector<16x1xf32>
    %134 = vector.broadcast %133 : vector<16x1xf32> to vector<16x128xf32>
    %135 = arith.mulf %125, %134 : vector<16x128xf32>
    %136 = vector.broadcast %19 : vector<1x128xf32> to vector<16x128xf32>
    %137 = arith.mulf %135, %136 : vector<16x128xf32>
    %138 = vector.broadcast %21 : vector<1x128xf32> to vector<16x128xf32>
    %139 = arith.addf %137, %138 : vector<16x128xf32>
    %c0_48 = arith.constant 0 : index
    %c0_49 = arith.constant 0 : index
    %c0_50 = arith.constant 0 : index
    %140 = vector.load %arg3[%c0_48, %c0_49, %c0_50] : memref<1x8x128xf32, #tpu.memory_space<vmem>>, vector<1x8x128xf32>
    %141 = vector.shape_cast %140 : vector<1x8x128xf32> to vector<8x128xf32>
    %c0_51 = arith.constant 0 : index
    %c0_52 = arith.constant 0 : index
    %c0_53 = arith.constant 0 : index
    %142 = vector.load %arg14[%c0_51, %c0_52, %c0_53] : memref<1x128x128xbf16, #tpu.memory_space<vmem>>, vector<1x128x128xbf16>
    %143 = vector.shape_cast %142 : vector<1x128x128xbf16> to vector<128x128xbf16>
    %c0_54 = arith.constant 0 : index
    %c0_55 = arith.constant 0 : index
    %c0_56 = arith.constant 0 : index
    %144 = vector.load %arg15[%c0_54, %c0_55, %c0_56] : memref<1x1x128xf32, #tpu.memory_space<vmem>>, vector<1x1x128xf32>
    %145 = vector.shape_cast %144 : vector<1x1x128xf32> to vector<1x128xf32>
    %c0_57 = arith.constant 0 : index
    %c0_58 = arith.constant 0 : index
    %c0_59 = arith.constant 0 : index
    %146 = vector.load %arg16[%c0_57, %c0_58, %c0_59] : memref<1x128x256xbf16, #tpu.memory_space<vmem>>, vector<1x128x256xbf16>
    %147 = vector.shape_cast %146 : vector<1x128x256xbf16> to vector<128x256xbf16>
    %c0_60 = arith.constant 0 : index
    %c0_61 = arith.constant 0 : index
    %c0_62 = arith.constant 0 : index
    %148 = vector.load %arg17[%c0_60, %c0_61, %c0_62] : memref<1x1x256xf32, #tpu.memory_space<vmem>>, vector<1x1x256xf32>
    %149 = vector.shape_cast %148 : vector<1x1x256xf32> to vector<1x256xf32>
    %c0_63 = arith.constant 0 : index
    %c0_64 = arith.constant 0 : index
    %c0_65 = arith.constant 0 : index
    %150 = vector.load %arg18[%c0_63, %c0_64, %c0_65] : memref<1x128x128xbf16, #tpu.memory_space<vmem>>, vector<1x128x128xbf16>
    %151 = vector.shape_cast %150 : vector<1x128x128xbf16> to vector<128x128xbf16>
    %c0_66 = arith.constant 0 : index
    %c0_67 = arith.constant 0 : index
    %c0_68 = arith.constant 0 : index
    %152 = vector.load %arg19[%c0_66, %c0_67, %c0_68] : memref<1x1x128xf32, #tpu.memory_space<vmem>>, vector<1x1x128xf32>
    %153 = vector.shape_cast %152 : vector<1x1x128xf32> to vector<1x128xf32>
    %c0_69 = arith.constant 0 : index
    %c0_70 = arith.constant 0 : index
    %c0_71 = arith.constant 0 : index
    %154 = vector.load %arg20[%c0_69, %c0_70, %c0_71] : memref<1x1x128xf32, #tpu.memory_space<vmem>>, vector<1x1x128xf32>
    %155 = vector.shape_cast %154 : vector<1x1x128xf32> to vector<1x128xf32>
    %c0_72 = arith.constant 0 : index
    %c0_73 = arith.constant 0 : index
    %c0_74 = arith.constant 0 : index
    %156 = vector.load %arg21[%c0_72, %c0_73, %c0_74] : memref<1x1x128xf32, #tpu.memory_space<vmem>>, vector<1x1x128xf32>
    %157 = vector.shape_cast %156 : vector<1x1x128xf32> to vector<1x128xf32>
    %c0_75 = arith.constant 0 : index
    %c0_76 = arith.constant 0 : index
    %c0_77 = arith.constant 0 : index
    %158 = vector.load %arg4[%c0_75, %c0_76, %c0_77] : memref<1x1x8xf32, #tpu.memory_space<vmem>>, vector<1x1x8xf32>
    %159 = vector.shape_cast %158 : vector<1x1x8xf32> to vector<1x8xf32>
    %160 = arith.truncf %139 : vector<16x128xf32> to vector<16x128xbf16>
    %cst_78 = arith.constant dense<0.000000e+00> : vector<16x128xf32>
    %161 = tpu.matmul %160, %143, %cst_78 {dimension_numbers = #tpu.dot_dimension_numbers<[1], [0], [0], [1], [0, 0, 1, 1], [], []>} : vector<16x128xbf16>, vector<128x128xbf16>, vector<16x128xf32> -> vector<16x128xf32>
    %162 = vector.broadcast %145 : vector<1x128xf32> to vector<16x128xf32>
    %163 = arith.addf %161, %162 : vector<16x128xf32>
    %164 = arith.truncf %141 : vector<8x128xf32> to vector<8x128xbf16>
    %cst_79 = arith.constant dense<0.000000e+00> : vector<8x256xf32>
    %165 = tpu.matmul %164, %147, %cst_79 {dimension_numbers = #tpu.dot_dimension_numbers<[1], [0], [0], [1], [0, 0, 1, 1], [], []>} : vector<8x128xbf16>, vector<128x256xbf16>, vector<8x256xf32> -> vector<8x256xf32>
    %166 = vector.broadcast %149 : vector<1x256xf32> to vector<8x256xf32>
    %167 = arith.addf %165, %166 : vector<8x256xf32>
    %168 = vector.extract_strided_slice %163 {offsets = [0, 0], sizes = [16, 32], strides = [1, 1]} : vector<16x128xf32> to vector<16x32xf32>
    %169 = vector.extract_strided_slice %167 {offsets = [0, 0], sizes = [8, 32], strides = [1, 1]} : vector<8x256xf32> to vector<8x32xf32>
    %170 = vector.extract_strided_slice %167 {offsets = [0, 128], sizes = [8, 32], strides = [1, 1]} : vector<8x256xf32> to vector<8x32xf32>
    %171 = arith.truncf %168 : vector<16x32xf32> to vector<16x32xbf16>
    %172 = arith.truncf %169 : vector<8x32xf32> to vector<8x32xbf16>
    %cst_80 = arith.constant dense<0.000000e+00> : vector<16x8xf32>
    %173 = tpu.matmul %171, %172, %cst_80 {dimension_numbers = #tpu.dot_dimension_numbers<[1], [1], [0], [0], [0, 0, 1, 0], [], []>} : vector<16x32xbf16>, vector<8x32xbf16>, vector<16x8xf32> -> vector<16x8xf32>
    %cst_81 = arith.constant 0.176776692 : f32
    %174 = vector.broadcast %cst_81 : f32 to vector<16x8xf32>
    %175 = arith.mulf %173, %174 : vector<16x8xf32>
    %176 = vector.broadcast %159 : vector<1x8xf32> to vector<16x8xf32>
    %177 = arith.addf %175, %176 : vector<16x8xf32>
    %cst_82 = arith.constant dense<0xFF800000> : vector<16xf32>
    %178 = vector.multi_reduction <maximumf>, %177, %cst_82 [1] : vector<16x8xf32> to vector<16xf32>
    %179 = vector.shape_cast %178 : vector<16xf32> to vector<16x1xf32>
    %180 = vector.broadcast %179 : vector<16x1xf32> to vector<16x8xf32>
    %181 = arith.subf %177, %180 : vector<16x8xf32>
    %182 = math.exp %181 : vector<16x8xf32>
    %cst_83 = arith.constant dense<0.000000e+00> : vector<16xf32>
    %183 = vector.multi_reduction <add>, %182, %cst_83 [1] : vector<16x8xf32> to vector<16xf32>
    %184 = vector.shape_cast %183 : vector<16xf32> to vector<16x1xf32>
    %185 = vector.broadcast %184 : vector<16x1xf32> to vector<16x8xf32>
    %186 = arith.divf %182, %185 : vector<16x8xf32>
    %187 = arith.truncf %186 : vector<16x8xf32> to vector<16x8xbf16>
    %188 = arith.truncf %170 : vector<8x32xf32> to vector<8x32xbf16>
    %cst_84 = arith.constant dense<0.000000e+00> : vector<16x32xf32>
    %189 = tpu.matmul %187, %188, %cst_84 {dimension_numbers = #tpu.dot_dimension_numbers<[1], [0], [0], [1], [0, 0, 1, 1], [], []>} : vector<16x8xbf16>, vector<8x32xbf16>, vector<16x32xf32> -> vector<16x32xf32>
    %190 = vector.extract_strided_slice %163 {offsets = [0, 32], sizes = [16, 32], strides = [1, 1]} : vector<16x128xf32> to vector<16x32xf32>
    %191 = vector.extract_strided_slice %167 {offsets = [0, 32], sizes = [8, 32], strides = [1, 1]} : vector<8x256xf32> to vector<8x32xf32>
    %192 = vector.extract_strided_slice %167 {offsets = [0, 160], sizes = [8, 32], strides = [1, 1]} : vector<8x256xf32> to vector<8x32xf32>
    %193 = arith.truncf %190 : vector<16x32xf32> to vector<16x32xbf16>
    %194 = arith.truncf %191 : vector<8x32xf32> to vector<8x32xbf16>
    %cst_85 = arith.constant dense<0.000000e+00> : vector<16x8xf32>
    %195 = tpu.matmul %193, %194, %cst_85 {dimension_numbers = #tpu.dot_dimension_numbers<[1], [1], [0], [0], [0, 0, 1, 0], [], []>} : vector<16x32xbf16>, vector<8x32xbf16>, vector<16x8xf32> -> vector<16x8xf32>
    %cst_86 = arith.constant 0.176776692 : f32
    %196 = vector.broadcast %cst_86 : f32 to vector<16x8xf32>
    %197 = arith.mulf %195, %196 : vector<16x8xf32>
    %198 = vector.broadcast %159 : vector<1x8xf32> to vector<16x8xf32>
    %199 = arith.addf %197, %198 : vector<16x8xf32>
    %cst_87 = arith.constant dense<0xFF800000> : vector<16xf32>
    %200 = vector.multi_reduction <maximumf>, %199, %cst_87 [1] : vector<16x8xf32> to vector<16xf32>
    %201 = vector.shape_cast %200 : vector<16xf32> to vector<16x1xf32>
    %202 = vector.broadcast %201 : vector<16x1xf32> to vector<16x8xf32>
    %203 = arith.subf %199, %202 : vector<16x8xf32>
    %204 = math.exp %203 : vector<16x8xf32>
    %cst_88 = arith.constant dense<0.000000e+00> : vector<16xf32>
    %205 = vector.multi_reduction <add>, %204, %cst_88 [1] : vector<16x8xf32> to vector<16xf32>
    %206 = vector.shape_cast %205 : vector<16xf32> to vector<16x1xf32>
    %207 = vector.broadcast %206 : vector<16x1xf32> to vector<16x8xf32>
    %208 = arith.divf %204, %207 : vector<16x8xf32>
    %209 = arith.truncf %208 : vector<16x8xf32> to vector<16x8xbf16>
    %210 = arith.truncf %192 : vector<8x32xf32> to vector<8x32xbf16>
    %cst_89 = arith.constant dense<0.000000e+00> : vector<16x32xf32>
    %211 = tpu.matmul %209, %210, %cst_89 {dimension_numbers = #tpu.dot_dimension_numbers<[1], [0], [0], [1], [0, 0, 1, 1], [], []>} : vector<16x8xbf16>, vector<8x32xbf16>, vector<16x32xf32> -> vector<16x32xf32>
    %212 = arith.addf %186, %208 : vector<16x8xf32>
    %213 = vector.extract_strided_slice %163 {offsets = [0, 64], sizes = [16, 32], strides = [1, 1]} : vector<16x128xf32> to vector<16x32xf32>
    %214 = vector.extract_strided_slice %167 {offsets = [0, 64], sizes = [8, 32], strides = [1, 1]} : vector<8x256xf32> to vector<8x32xf32>
    %215 = vector.extract_strided_slice %167 {offsets = [0, 192], sizes = [8, 32], strides = [1, 1]} : vector<8x256xf32> to vector<8x32xf32>
    %216 = arith.truncf %213 : vector<16x32xf32> to vector<16x32xbf16>
    %217 = arith.truncf %214 : vector<8x32xf32> to vector<8x32xbf16>
    %cst_90 = arith.constant dense<0.000000e+00> : vector<16x8xf32>
    %218 = tpu.matmul %216, %217, %cst_90 {dimension_numbers = #tpu.dot_dimension_numbers<[1], [1], [0], [0], [0, 0, 1, 0], [], []>} : vector<16x32xbf16>, vector<8x32xbf16>, vector<16x8xf32> -> vector<16x8xf32>
    %cst_91 = arith.constant 0.176776692 : f32
    %219 = vector.broadcast %cst_91 : f32 to vector<16x8xf32>
    %220 = arith.mulf %218, %219 : vector<16x8xf32>
    %221 = vector.broadcast %159 : vector<1x8xf32> to vector<16x8xf32>
    %222 = arith.addf %220, %221 : vector<16x8xf32>
    %cst_92 = arith.constant dense<0xFF800000> : vector<16xf32>
    %223 = vector.multi_reduction <maximumf>, %222, %cst_92 [1] : vector<16x8xf32> to vector<16xf32>
    %224 = vector.shape_cast %223 : vector<16xf32> to vector<16x1xf32>
    %225 = vector.broadcast %224 : vector<16x1xf32> to vector<16x8xf32>
    %226 = arith.subf %222, %225 : vector<16x8xf32>
    %227 = math.exp %226 : vector<16x8xf32>
    %cst_93 = arith.constant dense<0.000000e+00> : vector<16xf32>
    %228 = vector.multi_reduction <add>, %227, %cst_93 [1] : vector<16x8xf32> to vector<16xf32>
    %229 = vector.shape_cast %228 : vector<16xf32> to vector<16x1xf32>
    %230 = vector.broadcast %229 : vector<16x1xf32> to vector<16x8xf32>
    %231 = arith.divf %227, %230 : vector<16x8xf32>
    %232 = arith.truncf %231 : vector<16x8xf32> to vector<16x8xbf16>
    %233 = arith.truncf %215 : vector<8x32xf32> to vector<8x32xbf16>
    %cst_94 = arith.constant dense<0.000000e+00> : vector<16x32xf32>
    %234 = tpu.matmul %232, %233, %cst_94 {dimension_numbers = #tpu.dot_dimension_numbers<[1], [0], [0], [1], [0, 0, 1, 1], [], []>} : vector<16x8xbf16>, vector<8x32xbf16>, vector<16x32xf32> -> vector<16x32xf32>
    %235 = arith.addf %212, %231 : vector<16x8xf32>
    %236 = vector.extract_strided_slice %163 {offsets = [0, 96], sizes = [16, 32], strides = [1, 1]} : vector<16x128xf32> to vector<16x32xf32>
    %237 = vector.extract_strided_slice %167 {offsets = [0, 96], sizes = [8, 32], strides = [1, 1]} : vector<8x256xf32> to vector<8x32xf32>
    %238 = vector.extract_strided_slice %167 {offsets = [0, 224], sizes = [8, 32], strides = [1, 1]} : vector<8x256xf32> to vector<8x32xf32>
    %239 = arith.truncf %236 : vector<16x32xf32> to vector<16x32xbf16>
    %240 = arith.truncf %237 : vector<8x32xf32> to vector<8x32xbf16>
    %cst_95 = arith.constant dense<0.000000e+00> : vector<16x8xf32>
    %241 = tpu.matmul %239, %240, %cst_95 {dimension_numbers = #tpu.dot_dimension_numbers<[1], [1], [0], [0], [0, 0, 1, 0], [], []>} : vector<16x32xbf16>, vector<8x32xbf16>, vector<16x8xf32> -> vector<16x8xf32>
    %cst_96 = arith.constant 0.176776692 : f32
    %242 = vector.broadcast %cst_96 : f32 to vector<16x8xf32>
    %243 = arith.mulf %241, %242 : vector<16x8xf32>
    %244 = vector.broadcast %159 : vector<1x8xf32> to vector<16x8xf32>
    %245 = arith.addf %243, %244 : vector<16x8xf32>
    %cst_97 = arith.constant dense<0xFF800000> : vector<16xf32>
    %246 = vector.multi_reduction <maximumf>, %245, %cst_97 [1] : vector<16x8xf32> to vector<16xf32>
    %247 = vector.shape_cast %246 : vector<16xf32> to vector<16x1xf32>
    %248 = vector.broadcast %247 : vector<16x1xf32> to vector<16x8xf32>
    %249 = arith.subf %245, %248 : vector<16x8xf32>
    %250 = math.exp %249 : vector<16x8xf32>
    %cst_98 = arith.constant dense<0.000000e+00> : vector<16xf32>
    %251 = vector.multi_reduction <add>, %250, %cst_98 [1] : vector<16x8xf32> to vector<16xf32>
    %252 = vector.shape_cast %251 : vector<16xf32> to vector<16x1xf32>
    %253 = vector.broadcast %252 : vector<16x1xf32> to vector<16x8xf32>
    %254 = arith.divf %250, %253 : vector<16x8xf32>
    %255 = arith.truncf %254 : vector<16x8xf32> to vector<16x8xbf16>
    %256 = arith.truncf %238 : vector<8x32xf32> to vector<8x32xbf16>
    %cst_99 = arith.constant dense<0.000000e+00> : vector<16x32xf32>
    %257 = tpu.matmul %255, %256, %cst_99 {dimension_numbers = #tpu.dot_dimension_numbers<[1], [0], [0], [1], [0, 0, 1, 1], [], []>} : vector<16x8xbf16>, vector<8x32xbf16>, vector<16x32xf32> -> vector<16x32xf32>
    %258 = arith.addf %235, %254 : vector<16x8xf32>
    %259 = tpu.concatenate %189, %211, %234, %257 in 1 : vector<16x32xf32>, vector<16x32xf32>, vector<16x32xf32>, vector<16x32xf32> -> vector<16x128xf32>
    %260 = arith.truncf %259 : vector<16x128xf32> to vector<16x128xbf16>
    %cst_100 = arith.constant dense<0.000000e+00> : vector<16x128xf32>
    %261 = tpu.matmul %260, %151, %cst_100 {dimension_numbers = #tpu.dot_dimension_numbers<[1], [0], [0], [1], [0, 0, 1, 1], [], []>} : vector<16x128xbf16>, vector<128x128xbf16>, vector<16x128xf32> -> vector<16x128xf32>
    %262 = vector.broadcast %153 : vector<1x128xf32> to vector<16x128xf32>
    %263 = arith.addf %261, %262 : vector<16x128xf32>
    %264 = arith.addf %263, %139 : vector<16x128xf32>
    %cst_101 = arith.constant dense<0.000000e+00> : vector<16xf32>
    %265 = vector.multi_reduction <add>, %264, %cst_101 [1] : vector<16x128xf32> to vector<16xf32>
    %266 = vector.shape_cast %265 : vector<16xf32> to vector<16x1xf32>
    %cst_102 = arith.constant 1.280000e+02 : f32
    %267 = vector.broadcast %cst_102 : f32 to vector<16x1xf32>
    %268 = arith.divf %266, %267 : vector<16x1xf32>
    %269 = vector.broadcast %268 : vector<16x1xf32> to vector<16x128xf32>
    %270 = arith.subf %264, %269 : vector<16x128xf32>
    %271 = arith.mulf %270, %270 : vector<16x128xf32>
    %cst_103 = arith.constant dense<0.000000e+00> : vector<16xf32>
    %272 = vector.multi_reduction <add>, %271, %cst_103 [1] : vector<16x128xf32> to vector<16xf32>
    %273 = vector.shape_cast %272 : vector<16xf32> to vector<16x1xf32>
    %cst_104 = arith.constant 1.280000e+02 : f32
    %274 = vector.broadcast %cst_104 : f32 to vector<16x1xf32>
    %275 = arith.divf %273, %274 : vector<16x1xf32>
    %cst_105 = arith.constant 9.99999974E-6 : f32
    %276 = vector.broadcast %cst_105 : f32 to vector<16x1xf32>
    %277 = arith.addf %275, %276 : vector<16x1xf32>
    %278 = math.rsqrt %277 : vector<16x1xf32>
    %279 = vector.broadcast %278 : vector<16x1xf32> to vector<16x128xf32>
    %280 = arith.mulf %270, %279 : vector<16x128xf32>
    %281 = vector.broadcast %155 : vector<1x128xf32> to vector<16x128xf32>
    %282 = arith.mulf %280, %281 : vector<16x128xf32>
    %283 = vector.broadcast %157 : vector<1x128xf32> to vector<16x128xf32>
    %284 = arith.addf %282, %283 : vector<16x128xf32>
    %cst_106 = arith.constant 2.500000e-01 : f32
    %285 = vector.broadcast %cst_106 : f32 to vector<16x8xf32>
    %286 = arith.mulf %258, %285 : vector<16x8xf32>
    %c0_107 = arith.constant 0 : index
    %c0_108 = arith.constant 0 : index
    %c0_109 = arith.constant 0 : index
    %287 = vector.load %arg22[%c0_107, %c0_108, %c0_109] : memref<1x128x512xbf16, #tpu.memory_space<vmem>>, vector<1x128x512xbf16>
    %288 = vector.shape_cast %287 : vector<1x128x512xbf16> to vector<128x512xbf16>
    %c0_110 = arith.constant 0 : index
    %c0_111 = arith.constant 0 : index
    %c0_112 = arith.constant 0 : index
    %289 = vector.load %arg23[%c0_110, %c0_111, %c0_112] : memref<1x1x512xf32, #tpu.memory_space<vmem>>, vector<1x1x512xf32>
    %290 = vector.shape_cast %289 : vector<1x1x512xf32> to vector<1x512xf32>
    %c0_113 = arith.constant 0 : index
    %c0_114 = arith.constant 0 : index
    %c0_115 = arith.constant 0 : index
    %291 = vector.load %arg24[%c0_113, %c0_114, %c0_115] : memref<1x512x128xbf16, #tpu.memory_space<vmem>>, vector<1x512x128xbf16>
    %292 = vector.shape_cast %291 : vector<1x512x128xbf16> to vector<512x128xbf16>
    %c0_116 = arith.constant 0 : index
    %c0_117 = arith.constant 0 : index
    %c0_118 = arith.constant 0 : index
    %293 = vector.load %arg25[%c0_116, %c0_117, %c0_118] : memref<1x1x128xf32, #tpu.memory_space<vmem>>, vector<1x1x128xf32>
    %294 = vector.shape_cast %293 : vector<1x1x128xf32> to vector<1x128xf32>
    %c0_119 = arith.constant 0 : index
    %c0_120 = arith.constant 0 : index
    %c0_121 = arith.constant 0 : index
    %295 = vector.load %arg26[%c0_119, %c0_120, %c0_121] : memref<1x1x128xf32, #tpu.memory_space<vmem>>, vector<1x1x128xf32>
    %296 = vector.shape_cast %295 : vector<1x1x128xf32> to vector<1x128xf32>
    %c0_122 = arith.constant 0 : index
    %c0_123 = arith.constant 0 : index
    %c0_124 = arith.constant 0 : index
    %297 = vector.load %arg27[%c0_122, %c0_123, %c0_124] : memref<1x1x128xf32, #tpu.memory_space<vmem>>, vector<1x1x128xf32>
    %298 = vector.shape_cast %297 : vector<1x1x128xf32> to vector<1x128xf32>
    %299 = arith.truncf %284 : vector<16x128xf32> to vector<16x128xbf16>
    %cst_125 = arith.constant dense<0.000000e+00> : vector<16x512xf32>
    %300 = tpu.matmul %299, %288, %cst_125 {dimension_numbers = #tpu.dot_dimension_numbers<[1], [0], [0], [1], [0, 0, 1, 1], [], []>} : vector<16x128xbf16>, vector<128x512xbf16>, vector<16x512xf32> -> vector<16x512xf32>
    %301 = vector.broadcast %290 : vector<1x512xf32> to vector<16x512xf32>
    %302 = arith.addf %300, %301 : vector<16x512xf32>
    %cst_126 = arith.constant 0.000000e+00 : f32
    %303 = vector.broadcast %cst_126 : f32 to vector<16x512xf32>
    %304 = arith.maximumf %302, %303 : vector<16x512xf32>
    %305 = arith.truncf %304 : vector<16x512xf32> to vector<16x512xbf16>
    %cst_127 = arith.constant dense<0.000000e+00> : vector<16x128xf32>
    %306 = tpu.matmul %305, %292, %cst_127 {dimension_numbers = #tpu.dot_dimension_numbers<[1], [0], [0], [1], [0, 0, 1, 1], [], []>} : vector<16x512xbf16>, vector<512x128xbf16>, vector<16x128xf32> -> vector<16x128xf32>
    %307 = vector.broadcast %294 : vector<1x128xf32> to vector<16x128xf32>
    %308 = arith.addf %306, %307 : vector<16x128xf32>
    %309 = arith.addf %308, %284 : vector<16x128xf32>
    %cst_128 = arith.constant dense<0.000000e+00> : vector<16xf32>
    %310 = vector.multi_reduction <add>, %309, %cst_128 [1] : vector<16x128xf32> to vector<16xf32>
    %311 = vector.shape_cast %310 : vector<16xf32> to vector<16x1xf32>
    %cst_129 = arith.constant 1.280000e+02 : f32
    %312 = vector.broadcast %cst_129 : f32 to vector<16x1xf32>
    %313 = arith.divf %311, %312 : vector<16x1xf32>
    %314 = vector.broadcast %313 : vector<16x1xf32> to vector<16x128xf32>
    %315 = arith.subf %309, %314 : vector<16x128xf32>
    %316 = arith.mulf %315, %315 : vector<16x128xf32>
    %cst_130 = arith.constant dense<0.000000e+00> : vector<16xf32>
    %317 = vector.multi_reduction <add>, %316, %cst_130 [1] : vector<16x128xf32> to vector<16xf32>
    %318 = vector.shape_cast %317 : vector<16xf32> to vector<16x1xf32>
    %cst_131 = arith.constant 1.280000e+02 : f32
    %319 = vector.broadcast %cst_131 : f32 to vector<16x1xf32>
    %320 = arith.divf %318, %319 : vector<16x1xf32>
    %cst_132 = arith.constant 9.99999974E-6 : f32
    %321 = vector.broadcast %cst_132 : f32 to vector<16x1xf32>
    %322 = arith.addf %320, %321 : vector<16x1xf32>
    %323 = math.rsqrt %322 : vector<16x1xf32>
    %324 = vector.broadcast %323 : vector<16x1xf32> to vector<16x128xf32>
    %325 = arith.mulf %315, %324 : vector<16x128xf32>
    %326 = vector.broadcast %296 : vector<1x128xf32> to vector<16x128xf32>
    %327 = arith.mulf %325, %326 : vector<16x128xf32>
    %328 = vector.broadcast %298 : vector<1x128xf32> to vector<16x128xf32>
    %329 = arith.addf %327, %328 : vector<16x128xf32>
    %c0_133 = arith.constant 0 : index
    %c0_134 = arith.constant 0 : index
    %330 = vector.load %arg30[%c0_133, %c0_134] : memref<16x128xf32, #tpu.memory_space<vmem>>, vector<16x128xf32>
    tpu.vector_store %arg30[%c0_133, %c0_134], %329 {strides = array<i32>} : memref<16x128xf32, #tpu.memory_space<vmem>>, vector<16x128xf32>,
    %c3_i32 = arith.constant 3 : i32
    %331 = arith.cmpi eq, %arg1, %c3_i32 : i32
    %332 = arith.extui %331 : i1 to i32
    %c0_i32_135 = arith.constant 0 : i32
    %333 = arith.cmpi ne, %332, %c0_i32_135 : i32
    scf.if %333 {
      %cst_136 = arith.constant dense<0xFF800000> : vector<16xf32>
      %334 = vector.multi_reduction <maximumf>, %286, %cst_136 [1] : vector<16x8xf32> to vector<16xf32>
      %335 = vector.shape_cast %334 : vector<16xf32> to vector<16x1xf32>
      %336 = vector.broadcast %335 : vector<16x1xf32> to vector<16x8xf32>
      %337 = arith.subf %286, %336 : vector<16x8xf32>
      %338 = math.exp %337 : vector<16x8xf32>
      %cst_137 = arith.constant dense<0.000000e+00> : vector<16xf32>
      %339 = vector.multi_reduction <add>, %338, %cst_137 [1] : vector<16x8xf32> to vector<16xf32>
      %340 = vector.shape_cast %339 : vector<16xf32> to vector<16x1xf32>
      %341 = vector.broadcast %340 : vector<16x1xf32> to vector<16x8xf32>
      %342 = arith.divf %338, %341 : vector<16x8xf32>
      %c0_138 = arith.constant 0 : index
      %c0_139 = arith.constant 0 : index
      %c0_140 = arith.constant 0 : index
      %343 = vector.load %arg5[%c0_138, %c0_139, %c0_140] : memref<1x8x32xf32, #tpu.memory_space<vmem>>, vector<1x8x32xf32>
      %344 = vector.shape_cast %343 : vector<1x8x32xf32> to vector<8x32xf32>
      %cst_141 = arith.constant dense<0.000000e+00> : vector<16x32xf32>
      %345 = tpu.matmul %342, %344, %cst_141 {dimension_numbers = #tpu.dot_dimension_numbers<[1], [0], [0], [1], [0, 0, 1, 1], [], []>} : vector<16x8xf32>, vector<8x32xf32>, vector<16x32xf32> -> vector<16x32xf32>
      %c0_142 = arith.constant 0 : index
      %c0_143 = arith.constant 0 : index
      %c0_144 = arith.constant 0 : index
      %346 = vector.load %arg29[%c0_142, %c0_143, %c0_144] : memref<1x16x32xf32, #tpu.memory_space<vmem>>, vector<1x16x32xf32>
      %347 = vector.shape_cast %346 : vector<1x16x32xf32> to vector<16x32xf32>
      %348 = vector.shape_cast %345 : vector<16x32xf32> to vector<1x16x32xf32>
      tpu.vector_store %arg29[%c0_142, %c0_143, %c0_144], %348 {strides = array<i32>} : memref<1x16x32xf32, #tpu.memory_space<vmem>>, vector<1x16x32xf32>,
      %349 = arith.truncf %329 : vector<16x128xf32> to vector<16x128xbf16>
      %c0_145 = arith.constant 0 : index
      %c0_146 = arith.constant 0 : index
      %350 = vector.load %arg6[%c0_145, %c0_146] : memref<128x33xbf16, #tpu.memory_space<vmem>>, vector<128x33xbf16>
      %cst_147 = arith.constant dense<0.000000e+00> : vector<16x33xf32>
      %351 = tpu.matmul %349, %350, %cst_147 {dimension_numbers = #tpu.dot_dimension_numbers<[1], [0], [0], [1], [0, 0, 1, 1], [], []>} : vector<16x128xbf16>, vector<128x33xbf16>, vector<16x33xf32> -> vector<16x33xf32>
      %c0_148 = arith.constant 0 : index
      %c0_149 = arith.constant 0 : index
      %352 = vector.load %arg7[%c0_148, %c0_149] : memref<1x33xf32, #tpu.memory_space<vmem>>, vector<1x33xf32>
      %353 = vector.broadcast %352 : vector<1x33xf32> to vector<16x33xf32>
      %354 = arith.addf %351, %353 : vector<16x33xf32>
      %c0_150 = arith.constant 0 : index
      %c0_151 = arith.constant 0 : index
      %c0_152 = arith.constant 0 : index
      %355 = vector.load %arg28[%c0_150, %c0_151, %c0_152] : memref<1x16x33xf32, #tpu.memory_space<vmem>>, vector<1x16x33xf32>
      %356 = vector.shape_cast %355 : vector<1x16x33xf32> to vector<16x33xf32>
      %357 = vector.shape_cast %354 : vector<16x33xf32> to vector<1x16x33xf32>
      tpu.vector_store %arg28[%c0_150, %c0_151, %c0_152], %357 {strides = array<i32>} : memref<1x16x33xf32, #tpu.memory_space<vmem>>, vector<1x16x33xf32>,
    } else {
    }
    return
  }
  func.func @transform_0(%arg0: i32, %arg1: i32) -> (i32, i32, i32) {
    %c0_i32 = arith.constant 0 : i32
    %c0_i32_0 = arith.constant 0 : i32
    %c0_i32_1 = arith.constant 0 : i32
    return %arg0, %c0_i32, %c0_i32_0 : i32, i32, i32
  }
  func.func @transform_1(%arg0: i32, %arg1: i32) -> (i32, i32, i32) {
    %c0_i32 = arith.constant 0 : i32
    %c0_i32_0 = arith.constant 0 : i32
    %c0_i32_1 = arith.constant 0 : i32
    return %arg0, %c0_i32, %c0_i32_0 : i32, i32, i32
  }
  func.func @transform_2(%arg0: i32, %arg1: i32) -> (i32, i32, i32) {
    %c0_i32 = arith.constant 0 : i32
    %c0_i32_0 = arith.constant 0 : i32
    %c0_i32_1 = arith.constant 0 : i32
    return %arg0, %c0_i32, %c0_i32_0 : i32, i32, i32
  }
  func.func @transform_3(%arg0: i32, %arg1: i32) -> (i32, i32, i32) {
    %c0_i32 = arith.constant 0 : i32
    %c0_i32_0 = arith.constant 0 : i32
    %c0_i32_1 = arith.constant 0 : i32
    return %arg0, %c0_i32, %c0_i32_0 : i32, i32, i32
  }
  func.func @transform_4(%arg0: i32, %arg1: i32) -> (i32, i32) {
    %c0_i32 = arith.constant 0 : i32
    %c0_i32_0 = arith.constant 0 : i32
    %c0_i32_1 = arith.constant 0 : i32
    return %c0_i32, %c0_i32_0 : i32, i32
  }
  func.func @transform_5(%arg0: i32, %arg1: i32) -> (i32, i32) {
    %c0_i32 = arith.constant 0 : i32
    %c0_i32_0 = arith.constant 0 : i32
    %c0_i32_1 = arith.constant 0 : i32
    return %c0_i32, %c0_i32_0 : i32, i32
  }
  func.func @transform_6(%arg0: i32, %arg1: i32) -> (i32, i32, i32) {
    %c0_i32 = arith.constant 0 : i32
    %c0_i32_0 = arith.constant 0 : i32
    %c0_i32_1 = arith.constant 0 : i32
    return %arg1, %c0_i32, %c0_i32_0 : i32, i32, i32
  }
  func.func @transform_7(%arg0: i32, %arg1: i32) -> (i32, i32, i32) {
    %c0_i32 = arith.constant 0 : i32
    %c0_i32_0 = arith.constant 0 : i32
    %c0_i32_1 = arith.constant 0 : i32
    return %arg1, %c0_i32, %c0_i32_0 : i32, i32, i32
  }
  func.func @transform_8(%arg0: i32, %arg1: i32) -> (i32, i32, i32) {
    %c0_i32 = arith.constant 0 : i32
    %c0_i32_0 = arith.constant 0 : i32
    %c0_i32_1 = arith.constant 0 : i32
    return %arg1, %c0_i32, %c0_i32_0 : i32, i32, i32
  }
  func.func @transform_9(%arg0: i32, %arg1: i32) -> (i32, i32, i32) {
    %c0_i32 = arith.constant 0 : i32
    %c0_i32_0 = arith.constant 0 : i32
    %c0_i32_1 = arith.constant 0 : i32
    return %arg1, %c0_i32, %c0_i32_0 : i32, i32, i32
  }
  func.func @transform_10(%arg0: i32, %arg1: i32) -> (i32, i32, i32) {
    %c0_i32 = arith.constant 0 : i32
    %c0_i32_0 = arith.constant 0 : i32
    %c0_i32_1 = arith.constant 0 : i32
    return %arg1, %c0_i32, %c0_i32_0 : i32, i32, i32
  }
  func.func @transform_11(%arg0: i32, %arg1: i32) -> (i32, i32, i32) {
    %c0_i32 = arith.constant 0 : i32
    %c0_i32_0 = arith.constant 0 : i32
    %c0_i32_1 = arith.constant 0 : i32
    return %arg1, %c0_i32, %c0_i32_0 : i32, i32, i32
  }
  func.func @transform_12(%arg0: i32, %arg1: i32) -> (i32, i32, i32) {
    %c0_i32 = arith.constant 0 : i32
    %c0_i32_0 = arith.constant 0 : i32
    %c0_i32_1 = arith.constant 0 : i32
    return %arg1, %c0_i32, %c0_i32_0 : i32, i32, i32
  }
  func.func @transform_13(%arg0: i32, %arg1: i32) -> (i32, i32, i32) {
    %c0_i32 = arith.constant 0 : i32
    %c0_i32_0 = arith.constant 0 : i32
    %c0_i32_1 = arith.constant 0 : i32
    return %arg1, %c0_i32, %c0_i32_0 : i32, i32, i32
  }
  func.func @transform_14(%arg0: i32, %arg1: i32) -> (i32, i32, i32) {
    %c0_i32 = arith.constant 0 : i32
    %c0_i32_0 = arith.constant 0 : i32
    %c0_i32_1 = arith.constant 0 : i32
    return %arg1, %c0_i32, %c0_i32_0 : i32, i32, i32
  }
  func.func @transform_15(%arg0: i32, %arg1: i32) -> (i32, i32, i32) {
    %c0_i32 = arith.constant 0 : i32
    %c0_i32_0 = arith.constant 0 : i32
    %c0_i32_1 = arith.constant 0 : i32
    return %arg1, %c0_i32, %c0_i32_0 : i32, i32, i32
  }
  func.func @transform_16(%arg0: i32, %arg1: i32) -> (i32, i32, i32) {
    %c0_i32 = arith.constant 0 : i32
    %c0_i32_0 = arith.constant 0 : i32
    %c0_i32_1 = arith.constant 0 : i32
    return %arg1, %c0_i32, %c0_i32_0 : i32, i32, i32
  }
  func.func @transform_17(%arg0: i32, %arg1: i32) -> (i32, i32, i32) {
    %c0_i32 = arith.constant 0 : i32
    %c0_i32_0 = arith.constant 0 : i32
    %c0_i32_1 = arith.constant 0 : i32
    return %arg1, %c0_i32, %c0_i32_0 : i32, i32, i32
  }
  func.func @transform_18(%arg0: i32, %arg1: i32) -> (i32, i32, i32) {
    %c0_i32 = arith.constant 0 : i32
    %c0_i32_0 = arith.constant 0 : i32
    %c0_i32_1 = arith.constant 0 : i32
    return %arg1, %c0_i32, %c0_i32_0 : i32, i32, i32
  }
  func.func @transform_19(%arg0: i32, %arg1: i32) -> (i32, i32, i32) {
    %c0_i32 = arith.constant 0 : i32
    %c0_i32_0 = arith.constant 0 : i32
    %c0_i32_1 = arith.constant 0 : i32
    return %arg1, %c0_i32, %c0_i32_0 : i32, i32, i32
  }
  func.func @transform_20(%arg0: i32, %arg1: i32) -> (i32, i32, i32) {
    %c0_i32 = arith.constant 0 : i32
    %c0_i32_0 = arith.constant 0 : i32
    %c0_i32_1 = arith.constant 0 : i32
    return %arg1, %c0_i32, %c0_i32_0 : i32, i32, i32
  }
  func.func @transform_21(%arg0: i32, %arg1: i32) -> (i32, i32, i32) {
    %c0_i32 = arith.constant 0 : i32
    %c0_i32_0 = arith.constant 0 : i32
    %c0_i32_1 = arith.constant 0 : i32
    return %arg1, %c0_i32, %c0_i32_0 : i32, i32, i32
  }
  func.func @transform_22(%arg0: i32, %arg1: i32) -> (i32, i32, i32) {
    %c0_i32 = arith.constant 0 : i32
    %c0_i32_0 = arith.constant 0 : i32
    %c0_i32_1 = arith.constant 0 : i32
    return %arg1, %c0_i32, %c0_i32_0 : i32, i32, i32
  }
  func.func @transform_23(%arg0: i32, %arg1: i32) -> (i32, i32, i32) {
    %c0_i32 = arith.constant 0 : i32
    %c0_i32_0 = arith.constant 0 : i32
    %c0_i32_1 = arith.constant 0 : i32
    return %arg1, %c0_i32, %c0_i32_0 : i32, i32, i32
  }
  func.func @transform_24(%arg0: i32, %arg1: i32) -> (i32, i32, i32) {
    %c0_i32 = arith.constant 0 : i32
    %c0_i32_0 = arith.constant 0 : i32
    %c0_i32_1 = arith.constant 0 : i32
    return %arg1, %c0_i32, %c0_i32_0 : i32, i32, i32
  }
  func.func @transform_25(%arg0: i32, %arg1: i32) -> (i32, i32, i32) {
    %c0_i32 = arith.constant 0 : i32
    %c0_i32_0 = arith.constant 0 : i32
    %c0_i32_1 = arith.constant 0 : i32
    return %arg1, %c0_i32, %c0_i32_0 : i32, i32, i32
  }
  func.func @transform_26(%arg0: i32, %arg1: i32) -> (i32, i32, i32) {
    %c0_i32 = arith.constant 0 : i32
    %c0_i32_0 = arith.constant 0 : i32
    %c0_i32_1 = arith.constant 0 : i32
    return %arg0, %c0_i32, %c0_i32_0 : i32, i32, i32
  }
  func.func @transform_27(%arg0: i32, %arg1: i32) -> (i32, i32, i32) {
    %c0_i32 = arith.constant 0 : i32
    %c0_i32_0 = arith.constant 0 : i32
    %c0_i32_1 = arith.constant 0 : i32
    return %arg0, %c0_i32, %c0_i32_0 : i32, i32, i32
  }
}

</mosaic_0001>

<bundles_post_ra>
// kernel: cvqvae_forward.5
= control target key start
LH: loop header
LB: loop body
LE: loop exit
PB: predicated region body
PF: predicated region fallthrough
CT: control target
= control target key end

     0   :  { %vm70_vm0 = vcmask 392192   ;;  %vm208_vm1 = vcmask 261120   ;;  %s435_s1 = inlined_call_operand.vmem [shape: bf16[48,32], index: 1, kind: input, shape index: {}]   ;;  %s436_s0 = inlined_call_operand.vmem [shape: f32[128,48], index: 0, kind: input, shape index: {}]   ;;  %s437_s2 = inlined_call_operand.vmem [shape: f32[1,32], index: 2, kind: input, shape index: {}]   ;;  %s438_s3 = inlined_call_operand.vmem [shape: f32[128,32], index: 3, kind: output, shape index: {}]  }
   0x1   :  { %v280_v0 = vld [vmem:[%s435_s1 + $0x10] sm:$0xff]   ;;  %v281_v1 = vld [vmem:[%s435_s1 + $0x8] sm:$0xff]   ;;  %v15_v2 = vld [vmem:[%s436_s0] sm:$0xff] }
   0x2   :  { %252 = vmatprep.subr.bf16.mxu0 %v280_v0  ;;  %274 = vmatprep.subr.bf16.mxu1 %v280_v0  ;;  %v16_v3 = vld [vmem:[%s436_s0 + $0x8] sm:$0xff]  ;;  %v23_v4 = vld [vmem:[%s436_s0 + $0x40] sm:$0xff]  ;;  %v17_v9 = vld [vmem:[%s436_s0 + $0x10] sm:$0xff] }
   0x3   :  { %253 = vmatpush3.bf16.msra.mxu0 %v280_v0  ;;  %277 = vmatpush3.bf16.msra.mxu1 %v280_v0  ;;  %v282_v5 = vld [vmem:[%s435_s1] sm:$0xff]   ;;  %v31_v6 = vpack.c.bf16 %v16_v3, %v15_v2  ;;  %v24_v7 = vld [vmem:[%s436_s0 + $0x48] sm:$0xff]  ;;  %v18_v10 = vld [vmem:[%s436_s0 + $0x18] sm:$0xff] }
   0x4   :  { %254 = vmatprep.subr.bf16.mxu0 %v281_v1  ;;  %275 = vmatprep.subr.bf16.mxu1 %v281_v1  ;;  %v35_v8 = vpack.c.bf16 %v24_v7, %v23_v4  ;;  %v25_v11 = vld [vmem:[%s436_s0 + $0x50] sm:$0xff]  ;;  %v26_v12 = vld [vmem:[%s436_s0 + $0x58] sm:$0xff]  ;;  %v19_v13 = vld [vmem:[%s436_s0 + $0x20] sm:$0xff]  ;;  %v32_v17 = vpack.c.bf16 %v18_v10, %v17_v9 }
   0x5   :  { %258 = vmatprep.mubr.msk.bf16.mxu0 %vm70_vm0, %v31_v6  ;;  %v20_v14 = vld [vmem:[%s436_s0 + $0x28] sm:$0xff]  ;;  %v27_v15 = vld [vmem:[%s436_s0 + $0x60] sm:$0xff]  ;;  %v36_v18 = vpack.c.bf16 %v26_v12, %v25_v11  ;;  %v21_v21 = vld [vmem:[%s436_s0 + $0x30] sm:$0xff] }
   0x6   :  { %v28_v16 = vld [vmem:[%s436_s0 + $0x68] sm:$0xff]  ;;  %266 = vmatprep.mubr.msk.bf16.mxu1 %vm70_vm0, %v35_v8  ;;  %v33_v19 = vpack.c.bf16 %v20_v14, %v19_v13  ;;  %v22_v22 = vld [vmem:[%s436_s0 + $0x38] sm:$0xff]  ;;  %v29_v23 = vld [vmem:[%s436_s0 + $0x70] sm:$0xff] }
   0x7   :  { %255 = vmatpush3.bf16.msra.mxu0 %v281_v1  ;;  %278 = vmatpush3.bf16.msra.mxu1 %v281_v1  ;;  %v37_v20 = vpack.c.bf16 %v28_v16, %v27_v15  ;;  %v30_v24 = vld [vmem:[%s436_s0 + $0x78] sm:$0xff]  ;;  %v34_v25 = vpack.c.bf16 %v22_v22, %v21_v21  ;;  %v229_v27 = vld [vmem:[%s437_s2] ss:$0 sm:$0xff] }
   0x8   :  { %256 = vmatprep.subr.bf16.mxu0 %v282_v5  ;;  %276 = vmatprep.subr.bf16.mxu1 %v282_v5  ;;  %v38_v26 = vpack.c.bf16 %v30_v24, %v29_v23 }
   0xb   :  { %257 = vmatpush3.bf16.msra.mxu0 %v282_v5  ;;  %279 = vmatpush3.bf16.msra.mxu1 %v282_v5 }
   0xe   :  { %259 = vmatmul.mubr.msk.bf16.vlgmr.msra.gmra.mxu0 %vm70_vm0, %v32_v17  ;;  %267 = vmatmul.mubr.msk.bf16.vlgmr.msra.gmra.mxu1 %vm70_vm0, %v36_v18 }
   0xf   :  { %262 = vmatprep.mubr.msk.bf16.mxu0 %vm70_vm0, %v33_v19  ;;  %270 = vmatprep.mubr.msk.bf16.mxu1 %vm70_vm0, %v37_v20 }
  0x16   :  { %263 = vmatmul.mubr.msk.bf16.gmra.mxu0 %vm70_vm0, %v34_v25  ;;  %271 = vmatmul.mubr.msk.bf16.gmra.mxu1 %vm70_vm0, %v38_v26 }
  0xce   :  { %v260_v28 = vpop.f32.mrf.mxu0  ;;  %v268_v29 = vpop.f32.mrf.mxu1 }
  0xcf   :  { %v138_v30 = vadd.f32 %v260_v28, %v229_v27  ;;  %v170_v31 = vadd.f32 %v268_v29, %v229_v27 }
  0xd0   :  { %v129_v32 = vpop.f32.mrf.mxu0  ;;  %v161_v33 = vpop.f32.mrf.mxu1 }
  0xd1   :  { %v194_v34 = vmax.f32 %v138_v30, 0.0  ;;  %v202_v35 = vmax.f32 %v170_v31, 0.0  ;;  %v130_v36 = vadd.f32 %v229_v27, %v129_v32  ;;  %v162_v37 = vadd.f32 %v229_v27, %v161_v33 }
  0xd2   :  { %v261_v38 = vpop.f32.mrf.mxu0  ;;  %v269_v39 = vpop.f32.mrf.mxu1 }
  0xd3   :  { %211 = vst.msk [vmem:[%s438_s3 + $0x10] sm:$0xff] %vm208_vm1, %v194_v34  ;;  %219 = vst.msk [vmem:[%s438_s3 + $0x50] sm:$0xff] %vm208_vm1, %v202_v35  ;;  %v192_v40 = vmax.f32 %v130_v36, 0.0  ;;  %v200_v41 = vmax.f32 %v162_v37, 0.0  ;;  %v141_v42 = vadd.f32 %v261_v38, %v229_v27  ;;  %v173_v43 = vadd.f32 %v269_v39, %v229_v27 }
  0xd4   :  { %v132_v44 = vpop.f32.mrf.mxu0  ;;  %v164_v45 = vpop.f32.mrf.mxu1 }
  0xd5   :  { %209 = vst.msk [vmem:[%s438_s3] sm:$0xff] %vm208_vm1, %v192_v40  ;;  %217 = vst.msk [vmem:[%s438_s3 + $0x40] sm:$0xff] %vm208_vm1, %v200_v41  ;;  %v195_v46 = vmax.f32 %v141_v42, 0.0  ;;  %v203_v47 = vmax.f32 %v173_v43, 0.0  ;;  %v133_v48 = vadd.f32 %v229_v27, %v132_v44  ;;  %v165_v49 = vadd.f32 %v229_v27, %v164_v45 }
  0xd6   :  { %v264_v50 = vpop.f32.mrf.mxu0  ;;  %v272_v51 = vpop.f32.mrf.mxu1 }
  0xd7   :  { %212 = vst.msk [vmem:[%s438_s3 + $0x18] sm:$0xff] %vm208_vm1, %v195_v46  ;;  %220 = vst.msk [vmem:[%s438_s3 + $0x58] sm:$0xff] %vm208_vm1, %v203_v47  ;;  %v193_v52 = vmax.f32 %v133_v48, 0.0  ;;  %v201_v53 = vmax.f32 %v165_v49, 0.0  ;;  %v154_v54 = vadd.f32 %v264_v50, %v229_v27  ;;  %v186_v55 = vadd.f32 %v272_v51, %v229_v27 }
  0xd8   :  { %v145_v56 = vpop.f32.mrf.mxu0  ;;  %v177_v57 = vpop.f32.mrf.mxu1 }
  0xd9   :  { %210 = vst.msk [vmem:[%s438_s3 + $0x8] sm:$0xff] %vm208_vm1, %v193_v52  ;;  %218 = vst.msk [vmem:[%s438_s3 + $0x48] sm:$0xff] %vm208_vm1, %v201_v53  ;;  %v198_v58 = vmax.f32 %v154_v54, 0.0  ;;  %v206_v59 = vmax.f32 %v186_v55, 0.0  ;;  %v146_v60 = vadd.f32 %v229_v27, %v145_v56  ;;  %v178_v61 = vadd.f32 %v229_v27, %v177_v57 }
  0xda   :  { %v265_v62 = vpop.f32.mrf.mxu0  ;;  %v273_v63 = vpop.f32.mrf.mxu1 }
  0xdb   :  { %215 = vst.msk [vmem:[%s438_s3 + $0x30] sm:$0xff] %vm208_vm1, %v198_v58  ;;  %223 = vst.msk [vmem:[%s438_s3 + $0x70] sm:$0xff] %vm208_vm1, %v206_v59  ;;  %v196_v0 = vmax.f32 %v146_v60, 0.0  ;;  %v204_v1 = vmax.f32 %v178_v61, 0.0  ;;  %v157_v2 = vadd.f32 %v265_v62, %v229_v27  ;;  %v189_v3 = vadd.f32 %v273_v63, %v229_v27 }
  0xdc   :  { %v148_v4 = vpop.f32.mrf.mxu0  ;;  %v180_v5 = vpop.f32.mrf.mxu1 }
  0xdd   :  { %213 = vst.msk [vmem:[%s438_s3 + $0x20] sm:$0xff] %vm208_vm1, %v196_v0  ;;  %221 = vst.msk [vmem:[%s438_s3 + $0x60] sm:$0xff] %vm208_vm1, %v204_v1  ;;  %v199_v6 = vmax.f32 %v157_v2, 0.0  ;;  %v207_v7 = vmax.f32 %v189_v3, 0.0  ;;  %v149_v8 = vadd.f32 %v229_v27, %v148_v4  ;;  %v181_v9 = vadd.f32 %v229_v27, %v180_v5 }
  0xdf   :  { %216 = vst.msk [vmem:[%s438_s3 + $0x38] sm:$0xff] %vm208_vm1, %v199_v6  ;;  %224 = vst.msk [vmem:[%s438_s3 + $0x78] sm:$0xff] %vm208_vm1, %v207_v7  ;;  %v197_v10 = vmax.f32 %v149_v8, 0.0  ;;  %v205_v11 = vmax.f32 %v181_v9, 0.0 }
  0xe1   :  { %214 = vst.msk [vmem:[%s438_s3 + $0x28] sm:$0xff] %vm208_vm1, %v197_v10  ;;  %222 = vst.msk [vmem:[%s438_s3 + $0x68] sm:$0xff] %vm208_vm1, %v205_v11 }

// kernel: cvqvae_forward.6
= control target key start
LH: loop header
LB: loop body
LE: loop exit
PB: predicated region body
PF: predicated region fallthrough
CT: control target
= control target key end

     0   :  { %vm505_vm0 = vcmask 261120   ;;  %vm405_vm1 = vcmask 130048   ;;  %vm605_vm10 = vcmask 7168   ;;  %s967_s1 = inlined_call_operand.vmem [shape: bf16[512,16], index: 1, kind: input, shape index: {}]   ;;  %s968_s0 = inlined_call_operand.vmem [shape: f32[32,512], index: 0, kind: input, shape index: {}]   ;;  %s969_s3 = inlined_call_operand.vmem [shape: f32[16,32], index: 3, kind: input, shape index: {}]   ;;  %s970_s2 = inlined_call_operand.vmem [shape: f32[1,16], index: 2, kind: input, shape index: {}]   ;;  %s971_s4 = inlined_call_operand.vmem [shape: s32[32,1], index: 4, kind: output, shape index: {}]  }
   0x1   :  { %v727_v0 = vld [vmem:[%s967_s1 + $0x78] sm:$0xff]   ;;  %v731_v4 = vld [vmem:[%s967_s1 + $0x70] sm:$0xff]   ;;  %v735_v8 = vld [vmem:[%s967_s1 + $0x68] sm:$0xff]  }
   0x2   :  { %v728_v1 = vld [vmem:[%s967_s1 + $0xf8] sm:$0xff]   ;;  %651 = vmatprep.subr.bf16.mxu0 %v727_v0  ;;  %v732_v5 = vld [vmem:[%s967_s1 + $0xf0] sm:$0xff]   ;;  %v736_v9 = vld [vmem:[%s967_s1 + $0xe8] sm:$0xff]  }
   0x3   :  { %v729_v2 = vld [vmem:[%s967_s1 + $0x38] sm:$0xff]   ;;  %679 = vmatprep.subr.bf16.mxu1 %v728_v1  ;;  %v733_v6 = vld [vmem:[%s967_s1 + $0x30] sm:$0xff]   ;;  %v737_v10 = vld [vmem:[%s967_s1 + $0x28] sm:$0xff]  }
   0x4   :  { %v730_v3 = vld [vmem:[%s967_s1 + $0xb8] sm:$0xff]   ;;  %652 = vmatpush3.bf16.msra.mxu0 %v729_v2  ;;  %v734_v7 = vld [vmem:[%s967_s1 + $0xb0] sm:$0xff]   ;;  %v738_v11 = vld [vmem:[%s967_s1 + $0xa8] sm:$0xff]  }
   0x5   :  { %680 = vmatpush3.bf16.msra.mxu1 %v730_v3  ;;  %653 = vmatprep.subr.bf16.mxu0 %v731_v4  ;;  %v739_v12 = vld [vmem:[%s967_s1 + $0x60] sm:$0xff]   ;;  %v743_v16 = vld [vmem:[%s967_s1 + $0x58] sm:$0xff]   ;;  %v747_v20 = vld [vmem:[%s967_s1 + $0x50] sm:$0xff]  }
   0x6   :  { %681 = vmatprep.subr.bf16.mxu1 %v732_v5  ;;  %v740_v13 = vld [vmem:[%s967_s1 + $0xe0] sm:$0xff]   ;;  %v744_v17 = vld [vmem:[%s967_s1 + $0xd8] sm:$0xff]   ;;  %v748_v21 = vld [vmem:[%s967_s1 + $0xd0] sm:$0xff]  }
   0x7   :  { %v741_v14 = vld [vmem:[%s967_s1 + $0x20] sm:$0xff]   ;;  %v745_v18 = vld [vmem:[%s967_s1 + $0x18] sm:$0xff]   ;;  %v749_v22 = vld [vmem:[%s967_s1 + $0x10] sm:$0xff]  }
   0x8   :  { %654 = vmatpush3.bf16.msra.mxu0 %v733_v6  ;;  %v742_v15 = vld [vmem:[%s967_s1 + $0xa0] sm:$0xff]   ;;  %v746_v19 = vld [vmem:[%s967_s1 + $0x98] sm:$0xff]   ;;  %v750_v23 = vld [vmem:[%s967_s1 + $0x90] sm:$0xff]  }
   0x9   :  { %682 = vmatpush3.bf16.msra.mxu1 %v734_v7  ;;  %655 = vmatprep.subr.bf16.mxu0 %v735_v8  ;;  %v751_v24 = vld [vmem:[%s967_s1 + $0x48] sm:$0xff]   ;;  %v755_v28 = vld [vmem:[%s967_s1 + $0x40] sm:$0xff]   ;;  %v21_v34 = vld [vmem:[%s968_s0 + $0x18] sm:$0xff] }
   0xa   :  { %683 = vmatprep.subr.bf16.mxu1 %v736_v9  ;;  %v752_v25 = vld [vmem:[%s967_s1 + $0xc8] sm:$0xff]   ;;  %v756_v29 = vld [vmem:[%s967_s1 + $0xc0] sm:$0xff]   ;;  %v25_v36 = vld [vmem:[%s968_s0 + $0x38] sm:$0xff] }
   0xb   :  { %v753_v26 = vld [vmem:[%s967_s1 + $0x8] sm:$0xff]   ;;  %v757_v30 = vld [vmem:[%s967_s1] sm:$0xff]   ;;  %v37_v39 = vpack.c.bf16 %v25_v36, %v21_v34  ;;  %v20_v41 = vld [vmem:[%s968_s0 + $0x10] sm:$0xff] }
   0xc   :  { %656 = vmatpush3.bf16.msra.mxu0 %v737_v10  ;;  %v754_v27 = vld [vmem:[%s967_s1 + $0x88] sm:$0xff]   ;;  %v758_v31 = vld [vmem:[%s967_s1 + $0x80] sm:$0xff]   ;;  %v24_v42 = vld [vmem:[%s968_s0 + $0x30] sm:$0xff] }
   0xd   :  { %684 = vmatpush3.bf16.msra.mxu1 %v738_v11  ;;  %657 = vmatprep.subr.bf16.mxu0 %v739_v12  ;;  %v19_v32 = vld [vmem:[%s968_s0 + $0x8] sm:$0xff]  ;;  %v18_v37 = vld [vmem:[%s968_s0] sm:$0xff]  ;;  %v36_v44 = vpack.c.bf16 %v24_v42, %v20_v41  ;;  %v29_v46 = vld [vmem:[%s968_s0 + $0x58] sm:$0xff] }
   0xe   :  { %685 = vmatprep.subr.bf16.mxu1 %v740_v13  ;;  %v23_v33 = vld [vmem:[%s968_s0 + $0x28] sm:$0xff]  ;;  %v22_v38 = vld [vmem:[%s968_s0 + $0x20] sm:$0xff]  ;;  %v33_v47 = vld [vmem:[%s968_s0 + $0x78] sm:$0xff]  ;;  %386 = vmatprep.mubr.bf16.mxu1 %v37_v39 }
   0xf   :  { %v35_v35 = vpack.c.bf16 %v23_v33, %v19_v32  ;;  %v34_v40 = vpack.c.bf16 %v22_v38, %v18_v37  ;;  %v27_v43 = vld [vmem:[%s968_s0 + $0x48] sm:$0xff]  ;;  %v41_v49 = vpack.c.bf16 %v33_v47, %v29_v46  ;;  %v26_v50 = vld [vmem:[%s968_s0 + $0x40] sm:$0xff]  ;;  %v28_v52 = vld [vmem:[%s968_s0 + $0x50] sm:$0xff] }
  0x10   :  { %658 = vmatpush3.bf16.msra.mxu0 %v741_v14  ;;  %v31_v45 = vld [vmem:[%s968_s0 + $0x68] sm:$0xff]  ;;  %v30_v51 = vld [vmem:[%s968_s0 + $0x60] sm:$0xff]  ;;  %v32_v53 = vld [vmem:[%s968_s0 + $0x70] sm:$0xff] }
  0x11   :  { %686 = vmatpush3.bf16.msra.mxu1 %v742_v15  ;;  %659 = vmatprep.subr.bf16.mxu0 %v743_v16  ;;  %v39_v48 = vpack.c.bf16 %v31_v45, %v27_v43  ;;  %v38_v54 = vpack.c.bf16 %v30_v51, %v26_v50  ;;  %v40_v55 = vpack.c.bf16 %v32_v53, %v28_v52  ;;  %v404_v56 = vld [vmem:[%s969_s3 + $0x8] sm:$0xff]  ;;  %v403_v58 = vld [vmem:[%s969_s3] sm:$0xff] }
  0x12   :  { %687 = vmatprep.subr.bf16.mxu1 %v744_v17  ;;  %337 = vmatprep.mubr.bf16.mxu0 %v35_v35  ;;  %v504_v57 = vmul.f32 %v404_v56, %v404_v56  ;;  %v503_v60 = vmul.f32 %v403_v58, %v403_v58  ;;  %v614_v1 = vld [vmem:[%s970_s2] ss:$0 sm:$0xff] }
  0x14   :  { %660 = vmatpush3.bf16.msra.mxu0 %v745_v18  ;;  %v507_v59 = vsel %vm505_vm0, %v504_v57, 0.0  ;;  %v506_v61 = vsel %vm505_vm0, %v503_v60, 0.0 }
  0x15   :  { %688 = vmatpush3.bf16.msra.mxu1 %v746_v19  ;;  %661 = vmatprep.subr.bf16.mxu0 %v747_v20  ;;  %v508_v62 = vadd.f32 %v507_v59, %v506_v61 }
  0x16   :  { %689 = vmatprep.subr.bf16.mxu1 %v748_v21 }
  0x17   :  { %v509_v32 = vrot.slane %v508_v62, 4 }
  0x18   :  { %662 = vmatpush3.bf16.msra.mxu0 %v749_v22 }
  0x19   :  { %690 = vmatpush3.bf16.msra.mxu1 %v750_v23  ;;  %663 = vmatprep.subr.bf16.mxu0 %v751_v24  ;;  %v510_v33 = vadd.f32 %v509_v32, %v508_v62 }
  0x1a   :  { %691 = vmatprep.subr.bf16.mxu1 %v752_v25 }
  0x1b   :  { %v511_v34 = vrot.slane %v510_v33, 2 }
  0x1c   :  { %664 = vmatpush3.bf16.msra.mxu0 %v753_v26 }
  0x1d   :  { %692 = vmatpush3.bf16.msra.mxu1 %v754_v27  ;;  %665 = vmatprep.subr.bf16.mxu0 %v755_v28  ;;  %v512_v35 = vadd.f32 %v511_v34, %v510_v33 }
  0x1e   :  { %693 = vmatprep.subr.bf16.mxu1 %v756_v29 }
  0x1f   :  { %v513_v36 = vrot.slane %v512_v35, 1 }
  0x20   :  { %666 = vmatpush3.bf16.msra.mxu0 %v757_v30 }
  0x21   :  { %694 = vmatpush3.bf16.msra.mxu1 %v758_v31  ;;  %713 = vmatprep.subr.mxu0 %v404_v56  ;;  %v514_v41 = vadd.f32 %v513_v36, %v512_v35 }
  0x22   :  { %723 = vmatprep.subr.mxu1 %v404_v56 }
  0x23   :  { %338 = vmatmul.mubr.bf16.vlgmr.msra.gmra.mxu0 %v34_v40 }
  0x24   :  { %387 = vmatmul.mubr.bf16.vlgmr.msra.gmra.mxu1 %v36_v44  ;;  %345 = vmatprep.mubr.bf16.mxu0 %v39_v48 }
  0x25   :  { %394 = vmatprep.mubr.bf16.mxu1 %v41_v49  ;;  %714 = vmatpush3.msra.mxu0 %v404_v56 }
  0x26   :  { %725 = vmatpush3.msra.mxu1 %v404_v56  ;;  %715 = vmatprep.subr.mxu0 %v403_v58 }
  0x27   :  { %724 = vmatprep.subr.mxu1 %v403_v58  ;;  %716 = vmatpush3.msra.mxu0 %v403_v58 }
  0x28   :  { %726 = vmatpush3.msra.mxu1 %v403_v58 }
  0x2b   :  { %346 = vmatmul.mubr.bf16.gmra.mxu0 %v38_v54  ;;  %v523_v54 = vlaneseq }
  0x2c   :  { %395 = vmatmul.mubr.bf16.gmra.mxu1 %v40_v55 }
  0x2d   :  { %v524_v55 = vand.u32 127, %v523_v54 }
  0xe3   :  { %v667_v63 = vpop.f32.mrf.mxu0 }
  0xe4   :  { %v695_v0 = vpop.f32.mrf.mxu1 }
  0xe5   :  { %v668_v2 = vpop.f32.mrf.mxu0 }
  0xe6   :  { %v669_v3 = vadd.f32 %v668_v2, %v667_v63  ;;  %v696_v4 = vpop.f32.mrf.mxu1 }
  0xe7   :  { %v670_v5 = vpop.f32.mrf.mxu0  ;;  %v697_v7 = vadd.f32 %v696_v4, %v695_v0 }
  0xe8   :  { %v340_v6 = vadd.f32 %v669_v3, %v614_v1  ;;  %v698_v8 = vpop.f32.mrf.mxu1 }
  0xe9   :  { %v671_v9 = vpop.f32.mrf.mxu0 }
  0xea   :  { %v389_v10 = vadd.f32 %v697_v7, %v340_v6  ;;  %v672_v11 = vadd.f32 %v671_v9, %v670_v5  ;;  %v699_v12 = vpop.f32.mrf.mxu1 }
  0xeb   :  { %v673_v13 = vpop.f32.mrf.mxu0  ;;  %v700_v15 = vadd.f32 %v699_v12, %v698_v8 }
  0xec   :  { %v343_v14 = vadd.f32 %v672_v11, %v614_v1  ;;  %v701_v16 = vpop.f32.mrf.mxu1  ;;  %717 = vmatprep.mubr.msk.f32.mxu0 %vm405_vm1, %v389_v10 }
  0xed   :  { %v674_v17 = vpop.f32.mrf.mxu0 }
  0xee   :  { %v392_v18 = vadd.f32 %v700_v15, %v343_v14  ;;  %v675_v19 = vadd.f32 %v674_v17, %v673_v13  ;;  %v702_v20 = vpop.f32.mrf.mxu1 }
  0xef   :  { %v676_v21 = vpop.f32.mrf.mxu0  ;;  %v703_v23 = vadd.f32 %v702_v20, %v701_v16 }
  0xf0   :  { %v348_v22 = vadd.f32 %v675_v19, %v614_v1  ;;  %v704_v24 = vpop.f32.mrf.mxu1  ;;  %718 = vmatmul.mubr.msk.f32.vlgmr.msra.gmra.mxu0 %vm405_vm1, %v392_v18 }
  0xf1   :  { %v677_v25 = vpop.f32.mrf.mxu0 }
  0xf2   :  { %v397_v26 = vadd.f32 %v703_v23, %v348_v22  ;;  %v678_v27 = vadd.f32 %v677_v25, %v676_v21  ;;  %v705_v28 = vpop.f32.mrf.mxu1 }
  0xf3   :  { %v706_v30 = vadd.f32 %v705_v28, %v704_v24 }
  0xf4   :  { %v351_v29 = vadd.f32 %v678_v27, %v614_v1  ;;  %720 = vmatprep.mubr.msk.f32.mxu1 %vm405_vm1, %v397_v26 }
  0xf6   :  { %v400_v31 = vadd.f32 %v706_v30, %v351_v29 }
  0xf8   :  { %721 = vmatmul.mubr.msk.f32.vlgmr.msra.gmra.mxu1 %vm405_vm1, %v400_v31 }
 0x1b0   :  { %v719_v37 = vpop.f32.mrf.mxu0 }
 0x1b1   :  { %v516_v39 = vmul.f32 2.0, %v719_v37 }
 0x1b2   :  { %v484_v38 = vpop.f32.mrf.mxu0 }
 0x1b3   :  { %v515_v40 = vmul.f32 2.0, %v484_v38  ;;  %v520_v44 = vsub.f32 %v514_v41, %v516_v39 }
 0x1b5   :  { %v519_v42 = vsub.f32 %v514_v41, %v515_v40  ;;  %v528_v49 = vsel %vm505_vm0, %v520_v44, inf }
 0x1b7   :  { %v525_v43 = vsel %vm505_vm0, %v519_v42, inf }
 0x1b8   :  { %v722_v45 = vpop.f32.mrf.mxu1  ;;  %526 = vmin.xlane.f32.xlu0 %v525_v43 }
 0x1b9   :  { %v518_v47 = vmul.f32 2.0, %v722_v45 }
 0x1ba   :  { %v494_v46 = vpop.f32.mrf.mxu1 }
 0x1bb   :  { %v517_v48 = vmul.f32 2.0, %v494_v46  ;;  %v522_v52 = vsub.f32 %v514_v41, %v518_v47 }
 0x1bc   :  { %529 = vmin.xlane.f32.xlu0 %v528_v49 }
 0x1bd   :  { %v521_v50 = vsub.f32 %v514_v41, %v517_v48  ;;  %v534_v53 = vsel %vm505_vm0, %v522_v52, inf }
 0x1bf   :  { %v531_v51 = vsel %vm505_vm0, %v521_v50, inf }
 0x1c0   :  { %532 = vmin.xlane.f32.xlu1 %v531_v51 }
 0x1c4   :  { %535 = vmin.xlane.f32.xlu1 %v534_v53 }
 0x241   :  { %v527_v56 = vpop.xlane.xlu0 %526 }
 0x242   :  { %vm537_vm2 = vcmp.le.f32.partialorder %v519_v42, %v527_v56 }
 0x243   :  { %v541_v57 = vsel %vm537_vm2, %v524_v55, 32 }
 0x244   :  { %v545_v58 = vsel %vm505_vm0, %v541_v57, 2147483647 }
 0x245   :  { %v530_v59 = vpop.xlane.xlu0 %529  ;;  %v547_v60 = vshra.s32 %v545_v58, 16  ;;  %v546_v12 = vand.u32 65535, %v545_v58 }
 0x246   :  { %vm538_vm3 = vcmp.le.f32.partialorder %v520_v44, %v530_v59 }
 0x247   :  { %v542_v61 = vsel %vm538_vm3, %v524_v55, 32  ;;  %v549_v62 = vcvt.s32.f32 %v547_v60  ;;  %v548_v14 = vcvt.s32.f32 %v546_v12 }
 0x248   :  { %v560_v63 = vsel %vm505_vm0, %v542_v61, 2147483647 }
 0x249   :  { %v533_v0 = vpop.xlane.xlu1 %532  ;;  %550 = vmin.xlane.f32.xlu0 %v549_v62  ;;  %v562_v1 = vshra.s32 %v560_v63, 16  ;;  %v561_v15 = vand.u32 65535, %v560_v63 }
 0x24a   :  { %vm539_vm4 = vcmp.le.f32.partialorder %v521_v50, %v533_v0 }
 0x24b   :  { %v543_v2 = vsel %vm539_vm4, %v524_v55, 32  ;;  %v564_v3 = vcvt.s32.f32 %v562_v1  ;;  %v563_v18 = vcvt.s32.f32 %v561_v15 }
 0x24c   :  { %v575_v4 = vsel %vm505_vm0, %v543_v2, 2147483647 }
 0x24d   :  { %v536_v5 = vpop.xlane.xlu1 %535  ;;  %565 = vmin.xlane.f32.xlu1 %v564_v3  ;;  %v577_v6 = vshra.s32 %v575_v4, 16  ;;  %v576_v19 = vand.u32 65535, %v575_v4 }
 0x24e   :  { %vm540_vm5 = vcmp.le.f32.partialorder %v522_v52, %v536_v5 }
 0x24f   :  { %v544_v7 = vsel %vm540_vm5, %v524_v55, 32  ;;  %v579_v8 = vcvt.s32.f32 %v577_v6  ;;  %v578_v22 = vcvt.s32.f32 %v576_v19 }
 0x250   :  { %v590_v9 = vsel %vm505_vm0, %v544_v7, 2147483647 }
 0x251   :  { %580 = vmin.xlane.f32.xlu0 %v579_v8  ;;  %v592_v10 = vshra.s32 %v590_v9, 16  ;;  %v591_v23 = vand.u32 65535, %v590_v9 }
 0x253   :  { %v594_v11 = vcvt.s32.f32 %v592_v10  ;;  %v593_v26 = vcvt.s32.f32 %v591_v23 }
 0x255   :  { %595 = vmin.xlane.f32.xlu1 %v594_v11 }
 0x2d2   :  { %v551_v13 = vpop.xlane.xlu0 %550 }
 0x2d3   :  { %vm552_vm6 = vcmp.eq.f32.partialorder %v549_v62, %v551_v13  ;;  %v557_v28 = vcvt.f32.s32 %v551_v13 }
 0x2d4   :  { %v553_v16 = vsel %vm552_vm6, %v548_v14, inf }
 0x2d5   :  { %554 = vmin.xlane.f32.xlu0 %v553_v16  ;;  %v558_v30 = vshll.u32 %v557_v28, 16 }
 0x2d6   :  { %v566_v17 = vpop.xlane.xlu1 %565 }
 0x2d7   :  { %vm567_vm7 = vcmp.eq.f32.partialorder %v564_v3, %v566_v17  ;;  %v572_v31 = vcvt.f32.s32 %v566_v17 }
 0x2d8   :  { %v568_v20 = vsel %vm567_vm7, %v563_v18, inf }
 0x2d9   :  { %569 = vmin.xlane.f32.xlu1 %v568_v20  ;;  %v573_v35 = vshll.u32 %v572_v31, 16 }
 0x2da   :  { %v581_v21 = vpop.xlane.xlu0 %580 }
 0x2db   :  { %vm582_vm8 = vcmp.eq.f32.partialorder %v579_v8, %v581_v21  ;;  %v587_v36 = vcvt.f32.s32 %v581_v21 }
 0x2dc   :  { %v583_v24 = vsel %vm582_vm8, %v578_v22, inf }
 0x2dd   :  { %584 = vmin.xlane.f32.xlu0 %v583_v24  ;;  %v588_v40 = vshll.u32 %v587_v36, 16 }
 0x2de   :  { %v596_v25 = vpop.xlane.xlu1 %595 }
 0x2df   :  { %vm597_vm9 = vcmp.eq.f32.partialorder %v594_v11, %v596_v25  ;;  %v602_v41 = vcvt.f32.s32 %v596_v25 }
 0x2e0   :  { %v598_v27 = vsel %vm597_vm9, %v593_v26, inf }
 0x2e1   :  { %599 = vmin.xlane.f32.xlu1 %v598_v27  ;;  %v603_v45 = vshll.u32 %v602_v41, 16 }
 0x35e   :  { %v555_v29 = vpop.xlane.xlu0 %554 }
 0x35f   :  { %v556_v32 = vcvt.f32.s32 %v555_v29 }
 0x361   :  { %v559_v33 = vadd.s32 %v558_v30, %v556_v32 }
 0x362   :  { %v570_v34 = vpop.xlane.xlu1 %569 }
 0x363   :  { %606 = vst.msk [vmem:[%s971_s4] sm:$0xff] %vm605_vm10, %v559_v33  ;;  %v571_v37 = vcvt.f32.s32 %v570_v34 }
 0x365   :  { %v574_v38 = vadd.s32 %v573_v35, %v571_v37 }
 0x366   :  { %v585_v39 = vpop.xlane.xlu0 %584 }
 0x367   :  { %607 = vst.msk [vmem:[%s971_s4 + $0x8] sm:$0xff] %vm605_vm10, %v574_v38  ;;  %v586_v42 = vcvt.f32.s32 %v585_v39 }
 0x369   :  { %v589_v43 = vadd.s32 %v588_v40, %v586_v42 }
 0x36a   :  { %v600_v44 = vpop.xlane.xlu1 %599 }
 0x36b   :  { %608 = vst.msk [vmem:[%s971_s4 + $0x10] sm:$0xff] %vm605_vm10, %v589_v43  ;;  %v601_v46 = vcvt.f32.s32 %v600_v44 }
 0x36d   :  { %v604_v47 = vadd.s32 %v603_v45, %v601_v46 }
 0x36f   :  { %609 = vst.msk [vmem:[%s971_s4 + $0x18] sm:$0xff] %vm605_vm10, %v604_v47 }

// kernel: cvqvae_forward.4
= control target key start
LH: loop header
LB: loop body
LE: loop exit
PB: predicated region body
PF: predicated region fallthrough
CT: control target
= control target key end

     0   :  { %s3059_s29 = smov 0   ;;  %s3061_s30 = smov 0   ;;  %s3447_s0 = inlined_call_operand.vmem [shape: f32[2,8,128], index: 0, kind: input, shape index: {}]   ;;  %s3448_s1 = inlined_call_operand.vmem [shape: f32[2,1,8], index: 1, kind: input, shape index: {}]   ;;  %s3449_s2 = inlined_call_operand.vmem [shape: bf16[4,128,384], index: 2, kind: input, shape index: {}]   ;;  %s3450_s3 = inlined_call_operand.vmem [shape: f32[4,1,384], index: 3, kind: input, shape index: {}]   ;;  %s3451_s4 = inlined_call_operand.vmem [shape: bf16[4,128,128], index: 4, kind: input, shape index: {}]   ;;  %s3452_s5 = inlined_call_operand.vmem [shape: f32[4,1,128], index: 5, kind: input, shape index: {}]   ;;  %s3453_s6 = inlined_call_operand.vmem [shape: f32[4,1,128], index: 6, kind: input, shape index: {}]   ;;  %s3454_s7 = inlined_call_operand.vmem [shape: f32[4,1,128], index: 7, kind: input, shape index: {}]   ;;  %s3455_s8 = inlined_call_operand.vmem [shape: bf16[4,128,512], index: 8, kind: input, shape index: {}]   ;;  %s3456_s9 = inlined_call_operand.vmem [shape: f32[4,1,512], index: 9, kind: input, shape index: {}]   ;;  %s3457_s10 = inlined_call_operand.vmem [shape: bf16[4,512,128], index: 10, kind: input, shape index: {}]   ;;  %s3458_s11 = inlined_call_operand.vmem [shape: f32[4,1,128], index: 11, kind: input, shape index: {}]   ;;  %s3459_s12 = inlined_call_operand.vmem [shape: f32[4,1,128], index: 12, kind: input, shape index: {}]   ;;  %s3460_s13 = inlined_call_operand.vmem [shape: f32[4,1,128], index: 13, kind: input, shape index: {}]   ;;  %s3461_s14 = inlined_call_operand.vmem [shape: f32[2,8,128], index: 14, kind: output, shape index: {}]  }
   0x1   :  { %3467 = sst [smem:[#allocation10_spill]] %s3447_s0  ;;  %s3063_s15 = smov 0  }
   0x2   :  { %3468 = sst [smem:[#allocation11_spill]] %s3448_s1  ;;  %s3065_s16 = smov 0  }
   0x3   :  { %3469 = sst [smem:[#allocation12_spill]] %s3449_s2  ;;  %s3067_s17 = smov 0  }
   0x4   :  { %3470 = sst [smem:[#allocation13_spill]] %s3450_s3 }
   0x5   :  { %3471 = sst [smem:[#allocation14_spill]] %s3451_s4 }
   0x6   :  { %3472 = sst [smem:[#allocation15_spill]] %s3454_s7 }
   0x7   :  { %3473 = sst [smem:[#allocation16_spill]] %s3455_s8 }
   0x8   :  { %3474 = sst [smem:[#allocation17_spill]] %s3456_s9 }
   0x9   :  { %3475 = sst [smem:[#allocation18_spill]] %s3460_s13 }
   0xa   :  { %3476 = sst [smem:[#allocation19_spill]] %s3461_s14 }
   0xb LB: > { %3477 = sst [smem:[#allocation3_spill]] %s2960_s29  ;;  %s33_s18 = sadd.s32 1, %s2968_s15  ;;  %s2976_s17 = sphi %s3067_s17, %s24_s17   ;;  %s2972_s16 = sphi %s3065_s16, %s3508_s16   ;;  %s2968_s15 = sphi %s3063_s15, %s3507_s15   ;;  %s2964_s30 = sphi %s3061_s30, %s3506_s30   ;;  %s2960_s29 = sphi %s3059_s29, %s3505_s29  }
   0xc   : > { %3478 = sst [smem:[#allocation4_spill]] %s2968_s15  ;;  %s36_s19 = sadd.s32 1, %s2972_s16 }
   0xd   : > { %3479 = sst [smem:[#allocation5_spill]] %s2972_s16  ;;  %p34_p0 = scmp.ge.s32.totalorder %s33_s18, 4 }
   0xe   : > { %3480 = sst [smem:[#allocation6_spill]] %s2976_s17  ;;  %p2455_p1 = scmp.ge.s32.totalorder %s2976_s17, 1 }
   0xf   : > { %p537_p2 = scmp.lt.s32.totalorder %s2976_s17, 9  ;;  %s3510_s18 = smov (%p34_p0, %s33_s18), 0 }
  0x10   : > { %3481 = sst [smem:[#allocation7_spill]] %s3510_s18  ;;  %s3512_s19 = smov (!%p34_p0, %s36_s19), %s2972_s16 }
  0x11   : > { %p538_p3 = pnand %p2455_p1, %p537_p2  ;;  %p38_p4 = scmp.ge.s32.totalorder %s3512_s19, 2 }
  0x13   : > { %s3514_s19 = smov (%p38_p4, %s3512_s19), 0  ;;  %541 = sbr.rel (%p538_p3) target bundleno = 2877 (0xb3d), region = 76 }
  0x14   : > { %3482 = sst [smem:[#allocation8_spill]] %s3514_s19 }
  0x18   : > { %p630_p5 = scmp.lt.s32.totalorder %s2964_s30, 1  ;;  %p637_p6 = scmp.lt.s32.totalorder %s2960_s29, 3 }
  0x19   : > { %s3485_s0 = sld [smem:[#allocation10_spill]] }
  0x1a   : > { %s3516_s30 = smov (!%p630_p5, %s2964_s30), 1  ;;  %s3486_s2 = sld [smem:[#allocation12_spill]] }
  0x1b   : > { %3483 = sst [smem:[#allocation9_spill]] %s3516_s30  ;;  %s2456_s21 = sshll.u32 %s3516_s30, 3 }
  0x1c   : > { %s3095_s20 = scalar_select %p637_p6, %s2960_s29, 3 }
  0x1d   : > { %s3487_s4 = sld [smem:[#allocation14_spill]] }
  0x1e   : > { %s2750_s28 = smul.u32 192, %s3095_s20  ;;  %s2581_s18 = sshll.u32 %s3095_s20, 6 }
  0x1f   : > { %s633_s27 = scalar_lea.vmem %s3485_s0, %s2456_s21  ;;  %s2751_s19 = smul.u32 3, %s3095_s20 }
  0x20   : > { %s3111_s17 = scalar_lea.vmem %s3486_s2, %s2750_s28  ;;  %s3488_s3 = sld [smem:[#allocation13_spill]] }
  0x21   : > { %s2582_s14 = sshll.u32 %s3095_s20, 8  ;;  %s2462_s29 = sshll.u32 %s3095_s20, 2 }
  0x22   : > { %s3490_s8 = sld [smem:[#allocation16_spill]]  ;;  %s3150_s13 = scalar_lea.vmem %s3457_s10, %s2582_s14 }
  0x23   : > { %s3116_s22 = scalar_lea.vmem %s3487_s4, %s2581_s18  ;;  %s3491_s9 = sld [smem:[#allocation17_spill]] }
  0x24   : > { %s676_s28 = scalar_lea.vmem %s3458_s11, %s3095_s20  ;;  %s679_s4 = scalar_lea.vmem %s3459_s12, %s3095_s20 }
  0x25   : > { %s3493_s23 = sld [smem:[#allocation19_spill]] }
  0x26   : > { %s3121_s25 = scalar_lea.vmem %s3488_s3, %s2751_s19  ;;  %s3494_s1 = sld [smem:[#allocation3_spill]] }
  0x28   : > { %s3140_s24 = scalar_lea.vmem %s3490_s8, %s2582_s14  ;;  %s3492_s8 = sld [smem:[#allocation18_spill]] }
  0x29   : > { %s3145_s0 = scalar_lea.vmem %s3491_s9, %s2462_s29 }
  0x2b   : > { %s3167_s9 = scalar_lea.vmem %s3493_s23, %s2456_s21 }
  0x2c   : > { %p2466_p7 = scmp.ne.s32.totalorder %s3494_s1, 0 }
  0x2e   : > { %s682_s7 = scalar_lea.vmem %s3492_s8, %s3095_s20  ;;  %691 = sbr.rel (%p2466_p7) target bundleno = 53 (0x35), region = 80 }
  0x33   : > { %v692_v0 = vld [vmem:[%s633_s27] sm:$0xff] }
  0x34   : > { %693 = vst [vmem:[#allocation2] sm:$0xff] %v692_v0 }
  0x35 PF: > { %v2798_v1 = vld [vmem:[%s3111_s17 + $0xac] ss:$12 sps:$4 sm:$0xff]   ;;  %v2800_v2 = vld [vmem:[%s3111_s17 + $0xa8] ss:$12 sps:$4 sm:$0xff]   ;;  %v2978_v3 = vmov 0   ;;  %v2979_v4 = vmov 0.0   ;;  %v750_v29 = vlaneseq  ;;  %s3498_s26 = scalar_lea.vmem %s3452_s5, %s3095_s20  ;;  %s3499_s16 = scalar_lea.vmem %s3453_s6, %s3095_s20 }
  0x36   : > { %925 = vmatprep.mubr.bf16.mxu0 %v2978_v3  ;;  %2662 = vmatprep.subr.bf16.mxu1 %v2979_v4  ;;  %v2801_v5 = vld [vmem:[%s3111_s17 + $0x94] ss:$12 sps:$4 sm:$0xff]   ;;  %v2803_v6 = vld [vmem:[%s3111_s17 + $0x90] ss:$12 sps:$4 sm:$0xff]   ;;  %v2806_v8 = vld [vmem:[%s3111_s17 + $0x78] ss:$12 sps:$4 sm:$0xff]  }
  0x37   : > { %893 = vmatprep.subr.bf16.mxu0 %v2798_v1  ;;  %v2804_v7 = vld [vmem:[%s3111_s17 + $0x7c] ss:$12 sps:$4 sm:$0xff]   ;;  %v2807_v9 = vld [vmem:[%s3111_s17 + $0x64] ss:$12 sps:$4 sm:$0xff]   ;;  %v2809_v10 = vld [vmem:[%s3111_s17 + $0x60] ss:$12 sps:$4 sm:$0xff]  }
  0x38   : > { %894 = vmatpush1.bf16.msra.mxu0 %v2800_v2  ;;  %v2822_v11 = vld [vmem:[%s3111_s17 + $0xb0] ss:$12 sps:$4 sm:$0xff]   ;;  %v2810_v12 = vld [vmem:[%s3111_s17 + $0x4c] ss:$12 sps:$4 sm:$0xff]   ;;  %v2812_v14 = vld [vmem:[%s3111_s17 + $0x48] ss:$12 sps:$4 sm:$0xff]  }
  0x39   : > { %895 = vmatprep.subr.bf16.mxu0 %v2801_v5  ;;  %2663 = vmatpush3.bf16.msra.mxu1 %v2822_v11  ;;  %v2823_v13 = vld [vmem:[%s3111_s17 + $0x98] ss:$12 sps:$4 sm:$0xff]   ;;  %v2813_v15 = vld [vmem:[%s3111_s17 + $0x34] ss:$12 sps:$4 sm:$0xff]   ;;  %v2815_v16 = vld [vmem:[%s3111_s17 + $0x30] ss:$12 sps:$4 sm:$0xff]  }
  0x3a   : > { %2664 = vmatprep.subr.bf16.mxu1 %v2979_v4  ;;  %v2824_v17 = vld [vmem:[%s3111_s17 + $0x80] ss:$12 sps:$4 sm:$0xff]   ;;  %v2816_v18 = vld [vmem:[%s3111_s17 + $0x1c] ss:$12 sps:$4 sm:$0xff]   ;;  %v2818_v20 = vld [vmem:[%s3111_s17 + $0x18] ss:$12 sps:$4 sm:$0xff]  }
  0x3b   : > { %v2825_v19 = vld [vmem:[%s3111_s17 + $0x68] ss:$12 sps:$4 sm:$0xff]   ;;  %v2819_v21 = vld [vmem:[%s3111_s17 + $0x4] ss:$12 sps:$4 sm:$0xff]   ;;  %v2821_v23 = vld [vmem:[%s3111_s17] ss:$12 sps:$4 sm:$0xff]  }
  0x3c   : > { %896 = vmatpush1.bf16.msra.mxu0 %v2803_v6  ;;  %v2826_v22 = vld [vmem:[%s3111_s17 + $0x50] ss:$12 sps:$4 sm:$0xff]   ;;  %v3196_v24 = vld [vmem:[#allocation2] sm:$0xff]  ;;  %v2829_v28 = vld [vmem:[%s3111_s17 + $0x8] ss:$12 sps:$4 sm:$0xff]   ;;  %vm2980_vm0 = vmmov 0  }
  0x3d   : > { %897 = vmatprep.subr.bf16.mxu0 %v2804_v7  ;;  %2665 = vmatpush3.bf16.msra.mxu1 %v2823_v13  ;;  %v2827_v25 = vld [vmem:[%s3111_s17 + $0x38] ss:$12 sps:$4 sm:$0xff]   ;;  %v748_v26 = vpack.c.bf16 %v3196_v24, %v3196_v24  ;;  %v2828_v27 = vld [vmem:[%s3111_s17 + $0x20] ss:$12 sps:$4 sm:$0xff]   ;;  %v3215_v30 = vshrl.u32 %v750_v29, 7  ;;  %vm976_vm1 = vcmask 261120  }
  0x3e   : > { %2666 = vmatprep.subr.bf16.mxu1 %v2979_v4  ;;  %2678 = vmatprep.mubr.msk.bf16.mxu1 %vm2980_vm0, %v2979_v4  ;;  %v727_v33 = vld [vmem:[%s3121_s25] sm:$0x7]  ;;  %s2981_s2 = smov 96   ;;  %s2982_s3 = smov 64   ;;  %vm1048_vm2 = vcmask 1043456   ;;  %vm1031_vm3 = vcmask 64512  }
  0x3f   : > { %v756_v31 = vsub.s32 1, %v3215_v30  ;;  %v752_v32 = vsub.s32 0, %v3215_v30  ;;  %s2983_s8 = smov 32   ;;  %s3495_s17 = sld [smem:[#allocation9_spill]]  ;;  %v760_v45 = vsub.s32 2, %v3215_v30  ;;  %vm1444_vm4 = vcmask 523264  }
  0x40   : > { %898 = vmatpush1.bf16.msra.mxu0 %v2806_v8  ;;  %s3496_s25 = sld [smem:[#allocation11_spill]]  ;;  %vm1446_vm5 = vcmask 785408  }
  0x41   : > { %899 = vmatprep.subr.bf16.mxu0 %v2807_v9  ;;  %2667 = vmatpush3.bf16.msra.mxu1 %v2824_v17  ;;  %v757_v34 = vrot.slane %v727_v33, %v756_v31  ;;  %v753_v36 = vrot.slane %v727_v33, %v752_v32  ;;  %v761_v46 = vrot.slane %v727_v33, %v760_v45  ;;  %s3500_s29 = sld [smem:[#allocation15_spill]] }
  0x42   : > { %2668 = vmatprep.subr.bf16.mxu1 %v2979_v4 }
  0x44   : > { %900 = vmatpush1.bf16.msra.mxu0 %v2809_v10 }
  0x45   : > { %901 = vmatprep.subr.bf16.mxu0 %v2810_v12  ;;  %2669 = vmatpush3.bf16.msra.mxu1 %v2825_v19 }
  0x46   : > { %2670 = vmatprep.subr.bf16.mxu1 %v2979_v4  ;;  %s3497_s15 = scalar_lea.vmem %s3496_s25, %s3495_s17  ;;  %s3503_s17 = sld [smem:[#allocation3_spill]] }
  0x47   : > { %v3247_v55 = vld [vmem:[%s3497_s15] ss:$0 sm:$0xff]  ;;  %s3501_s23 = scalar_lea.vmem %s3500_s29, %s3095_s20 }
  0x48   : > { %902 = vmatpush1.bf16.msra.mxu0 %v2812_v14 }
  0x49   : > { %903 = vmatprep.subr.bf16.mxu0 %v2813_v15  ;;  %2671 = vmatpush3.bf16.msra.mxu1 %v2826_v22 }
  0x4a   : > { %2672 = vmatprep.subr.bf16.mxu1 %v2979_v4 }
  0x4c   : > { %904 = vmatpush1.bf16.msra.mxu0 %v2815_v16  ;;  %p2578_p8 = scmp.ne.s32.totalorder %s3503_s17, 3 }
  0x4d   : > { %905 = vmatprep.subr.bf16.mxu0 %v2816_v18  ;;  %2673 = vmatpush3.bf16.msra.mxu1 %v2827_v25 }
  0x4e   : > { %2674 = vmatprep.subr.bf16.mxu1 %v2979_v4 }
  0x50   : > { %906 = vmatpush1.bf16.msra.mxu0 %v2818_v20 }
  0x51   : > { %907 = vmatprep.subr.bf16.mxu0 %v2819_v21  ;;  %2675 = vmatpush3.bf16.msra.mxu1 %v2828_v27 }
  0x52   : > { %2676 = vmatprep.subr.bf16.mxu1 %v2979_v4 }
  0x54   : > { %908 = vmatpush1.bf16.msra.mxu0 %v2821_v23 }
  0x55   : > { %2706 = vmatprep.subr.bf16.mxu0 %v2979_v4  ;;  %2677 = vmatpush3.bf16.msra.mxu1 %v2829_v28 }
  0x56   : > { %2682 = vmatprep.subr.bf16.mxu1 %v2979_v4 }
  0x57   : > { %926 = vmatmul.mubr.bf16.vlgmr.msra.gmra.mxu0 %v748_v26 }
  0x58   : > { %2708 = vmatprep.mubr.msk.bf16.mxu0 %vm2980_vm0, %v2979_v4  ;;  %2679 = vmatmul.mubr.bf16.vlgmr.msra.gmra.mxu1 %v748_v26 }
  0x59   : > { %2684 = vmatprep.mubr.msk.bf16.mxu1 %vm2980_vm0, %v2979_v4 }
 0x117   : > { %v927_v35 = vpop.f32.mrf.mxu0 }
 0x118   : > { %v928_v40 = vadd.f32 %v927_v35, %v753_v36  ;;  %v968_v47 = vpop.f32.mrf.mxu1 }
 0x119   : > { %v929_v37 = vpop.f32.mrf.mxu0  ;;  %v969_v48 = vadd.f32 %v968_v47, %v761_v46 }
 0x11a   : > { %v930_v38 = vadd.f32 %v929_v37, %v757_v34  ;;  %v974_v44 = vpack.c.bf16 %v928_v40, %v928_v40  ;;  %v2680_v49 = vpop.f32.mrf.mxu1 }
 0x11b   : > { %v931_v39 = vpop.f32.mrf.mxu0  ;;  %v3237_v50 = vpack.c.bf16 %v969_v48, %v969_v48 }
 0x11c   : > { %v975_v41 = vpack.c.bf16 %v930_v38, %v930_v38  ;;  %v971_v51 = vpop.f32.mrf.mxu1 }
 0x11d   : > { %v932_v42 = vpop.f32.mrf.mxu0  ;;  %v1050_v52 = vsel %vm1048_vm2, %v3237_v50, 0 }
 0x11e   : > { %1096 = vrot.lane.b32.xlu1 %v975_v41, %s2981_s2  ;;  %v981_v43 = vsel %vm976_vm1, %v975_v41, 0  ;;  %v2681_v53 = vpop.f32.mrf.mxu1 }
 0x11f   : > { %2683 = vmatpush3.bf16.xpose.msra.mxu1 %v981_v43 }
 0x120   : > { %2688 = vmatprep.subr.bf16.mxu1 %v2979_v4 }
 0x122   : > { %1093 = vrot.lane.b32.xlu1 %v974_v44, %s2981_s2 }
 0x126   : > { %1207 = vrot.lane.b32.xlu1 %v974_v44, %s2982_s3  ;;  %2685 = vmatmul.mubr.msk.bf16.vlgmr.msra.gmra.mxu1 %vm976_vm1, %v974_v44 }
 0x127   : > { %2690 = vmatprep.mubr.msk.bf16.mxu1 %vm2980_vm0, %v2979_v4  ;;  %2689 = vmatpush3.bf16.msra.mxu1 %v1050_v52 }
 0x128   : > { %2694 = vmatprep.subr.bf16.mxu1 %v2979_v4 }
 0x12a   : > { %1321 = vrot.lane.b32.xlu1 %v975_v41, %s2983_s8 }
 0x12e   : > { %1319 = vrot.lane.b32.xlu1 %v974_v44, %s2983_s8 }
 0x190   : > { %v1097_v5 = vpop.permute.xlu1 %1096 }
 0x191   : > { %v1102_v16 = vsel %vm976_vm1, %v1097_v5, 0 }
 0x194   : > { %v1094_v6 = vpop.permute.xlu1 %1093 }
 0x198   : > { %v1208_v8 = vpop.permute.xlu1 %1207 }
 0x19c   : > { %v1322_v11 = vpop.permute.xlu1 %1321 }
 0x19d   : > { %v1327_v12 = vsel %vm976_vm1, %v1322_v11, 0 }
 0x1a0   : > { %v1320_v17 = vpop.permute.xlu1 %1319 }
 0x1e6   : > { %v1017_v54 = vpop.f32.mrf.mxu1 }
 0x1e7   : > { %v1023_v56 = vmul.f32 0.17677669, %v1017_v54 }
 0x1e8   : > { %v2686_v57 = vpop.f32.mrf.mxu1 }
 0x1e9   : > { %v1030_v58 = vadd.f32 %v3247_v55, %v1023_v56 }
 0x1ea   : > { %v1020_v59 = vpop.f32.mrf.mxu1 }
 0x1eb   : > { %v1032_v60 = vsel %vm1031_vm3, %v1030_v58, -inf }
 0x1ec   : > { %1033 = vmax.xlane.f32.xlu0 %v1032_v60  ;;  %v2687_v61 = vpop.f32.mrf.mxu1 }
 0x275   : > { %v1034_v62 = vpop.xlane.xlu0 %1033 }
 0x276   : > { %v1035_v63 = vsub.f32 %v1030_v58, %v1034_v62 }
 0x278   : > { %v1036_v0 = vmul.f32 1.442695, %v1035_v63 }
 0x27a   : > { %2918 = vpow2.f32 %v1036_v0 }
 0x287   : > { %v2919_v1 = vpop.eup %2918 }
 0x288   : > { %v1038_v2 = vsel %vm1031_vm3, %v2919_v1, 0.0 }
 0x289   : > { %1039 = vadd.xlane.f32.xlu0 %v1038_v2 }
 0x29f   : > { %1209 = vrot.lane.b32.xlu0 %v975_v41, %s2982_s3 }
 0x312   : > { %v1040_v7 = vpop.xlane.xlu0 %1039 }
 0x313   : > { %2920 = vrcp.f32 %v1040_v7 }
 0x316   : > { %v1210_v9 = vpop.permute.xlu0 %1209 }
 0x317   : > { %v1215_v10 = vsel %vm976_vm1, %v1210_v9, 0 }
 0x318   : > { %2707 = vmatpush3.bf16.xpose.msra.mxu0 %v1215_v10 }
 0x319   : > { %2718 = vmatprep.subr.bf16.mxu0 %v2979_v4 }
 0x31f   : > { %2709 = vmatmul.mubr.msk.bf16.vlgmr.msra.gmra.mxu0 %vm976_vm1, %v1208_v8 }
 0x320   : > { %v2921_v13 = vpop.eup %2920  ;;  %2719 = vmatpush3.bf16.xpose.msra.mxu0 %v1327_v12  ;;  %2720 = vmatprep.mubr.msk.bf16.mxu0 %vm2980_vm0, %v2979_v4 }
 0x321   : > { %v1042_v14 = vmul.f32 %v2921_v13, %v2919_v1  ;;  %2730 = vmatprep.subr.bf16.mxu0 %v2979_v4 }
 0x323   : > { %v1043_v15 = vpack.c.bf16 %v1042_v14, %v1042_v14 }
 0x325   : > { %2691 = vmatmul.mubr.msk.bf16.vlgmr.msra.gmra.mxu1 %vm1031_vm3, %v1043_v15 }
 0x326   : > { %2695 = vmatpush3.bf16.xpose.msra.mxu1 %v1102_v16  ;;  %2696 = vmatprep.mubr.msk.bf16.mxu1 %vm2980_vm0, %v2979_v4 }
 0x327   : > { %2721 = vmatmul.mubr.msk.bf16.vlgmr.msra.gmra.mxu0 %vm976_vm1, %v1320_v17  ;;  %2700 = vmatprep.subr.bf16.mxu1 %v2979_v4 }
 0x328   : > { %2746 = vmatprep.mubr.msk.bf16.mxu0 %vm2980_vm0, %v2979_v4 }
 0x32d   : > { %2697 = vmatmul.mubr.msk.bf16.vlgmr.msra.gmra.mxu1 %vm976_vm1, %v1094_v6 }
 0x32e   : > { %2702 = vmatprep.mubr.msk.bf16.mxu1 %vm2980_vm0, %v2979_v4 }
 0x3df   : > { %v1251_v18 = vpop.f32.mrf.mxu0 }
 0x3e0   : > { %v1257_v19 = vmul.f32 0.17677669, %v1251_v18 }
 0x3e1   : > { %v2710_v20 = vpop.f32.mrf.mxu0 }
 0x3e2   : > { %v1258_v21 = vadd.f32 %v3247_v55, %v1257_v19  ;;  %v2830_v19 = vld [vmem:[%s3116_s22 + $0x38] sm:$0xff]   ;;  %v2831_v20 = vld [vmem:[%s3116_s22 + $0x30] sm:$0xff]  }
 0x3e3   : > { %v1254_v22 = vpop.f32.mrf.mxu0  ;;  %2731 = vmatpush3.bf16.msra.mxu0 %v2830_v19  ;;  %v2868_v19 = vld [vmem:[%s3140_s24 + $0x40] ss:$16 sps:$4 sm:$0xff]  }
 0x3e4   : > { %v1259_v23 = vsel %vm1031_vm3, %v1258_v21, -inf  ;;  %2732 = vmatprep.subr.bf16.mxu0 %v2979_v4  ;;  %v2833_v22 = vld [vmem:[%s3116_s22 + $0x20] sm:$0xff]  }
 0x3e5   : > { %1260 = vmax.xlane.f32.xlu0 %v1259_v23  ;;  %v3273_v25 = vpop.f32.mrf.mxu1  ;;  %v2711_v26 = vpop.f32.mrf.mxu0  ;;  %v2834_v23 = vld [vmem:[%s3116_s22 + $0x18] sm:$0xff]  }
 0x3e6   : > { %v2835_v26 = vld [vmem:[%s3116_s22 + $0x10] sm:$0xff]  }
 0x3e7   : > { %v2692_v27 = vpop.f32.mrf.mxu1  ;;  %v1363_v28 = vpop.f32.mrf.mxu0  ;;  %2733 = vmatpush3.bf16.msra.mxu0 %v2831_v20  ;;  %v2871_v20 = vld [vmem:[%s3140_s24 + $0x48] ss:$16 sps:$4 sm:$0xff]  }
 0x3e8   : > { %v1369_v38 = vmul.f32 0.17677669, %v1363_v28  ;;  %2734 = vmatprep.subr.bf16.mxu0 %v2979_v4  ;;  %v2836_v27 = vld [vmem:[%s3116_s22 + $0x8] sm:$0xff]  }
 0x3e9   : > { %v1089_v29 = vpop.f32.mrf.mxu1  ;;  %v2722_v33 = vpop.f32.mrf.mxu0 }
 0x3ea   : > { %v1370_v44 = vadd.f32 %v3247_v55, %v1369_v38  ;;  %v2837_v33 = vld [vmem:[%s3116_s22] sm:$0xff]  }
 0x3eb   : > { %v2693_v34 = vpop.f32.mrf.mxu1  ;;  %v1366_v35 = vpop.f32.mrf.mxu0 }
 0x3ec   : > { %v1371_v47 = vsel %vm1031_vm3, %v1370_v44, -inf }
 0x3ed   : > { %v1138_v36 = vpop.f32.mrf.mxu1  ;;  %v2723_v37 = vpop.f32.mrf.mxu0 }
 0x3ee   : > { %v1144_v39 = vmul.f32 0.17677669, %v1138_v36 }
 0x3ef   : > { %v2698_v40 = vpop.f32.mrf.mxu1 }
 0x3f0   : > { %v1145_v41 = vadd.f32 %v3247_v55, %v1144_v39 }
 0x3f1   : > { %v1141_v42 = vpop.f32.mrf.mxu1 }
 0x3f2   : > { %v1146_v43 = vsel %vm1031_vm3, %v1145_v41, -inf }
 0x3f3   : > { %1147 = vmax.xlane.f32.xlu1 %v1146_v43  ;;  %v2699_v46 = vpop.f32.mrf.mxu1 }
 0x3f7   : > { %1372 = vmax.xlane.f32.xlu1 %v1371_v47 }
 0x46e   : > { %v1261_v48 = vpop.xlane.xlu0 %1260 }
 0x46f   : > { %v1262_v49 = vsub.f32 %v1258_v21, %v1261_v48  ;;  %v2832_v21 = vld [vmem:[%s3116_s22 + $0x28] sm:$0xff]  }
 0x470   : > { %2735 = vmatpush3.bf16.msra.mxu0 %v2832_v21  ;;  %v2876_v21 = vld [vmem:[%s3140_s24 + $0x24] ss:$16 sps:$4 sm:$0xff]  }
 0x471   : > { %v1263_v51 = vmul.f32 1.442695, %v1262_v49  ;;  %2736 = vmatprep.subr.bf16.mxu0 %v2979_v4 }
 0x473   : > { %2922 = vpow2.f32 %v1263_v51 }
 0x474   : > { %2737 = vmatpush3.bf16.msra.mxu0 %v2833_v22  ;;  %v2879_v22 = vld [vmem:[%s3140_s24 + $0x2c] ss:$16 sps:$4 sm:$0xff]  }
 0x475   : > { %2738 = vmatprep.subr.bf16.mxu0 %v2979_v4 }
 0x478   : > { %2739 = vmatpush3.bf16.msra.mxu0 %v2834_v23  ;;  %v2874_v23 = vld [vmem:[%s3140_s24 + $0x20] ss:$16 sps:$4 sm:$0xff]  }
 0x479   : > { %2740 = vmatprep.subr.bf16.mxu0 %v2979_v4 }
 0x47c   : > { %v1148_v52 = vpop.xlane.xlu1 %1147  ;;  %2741 = vmatpush3.bf16.msra.mxu0 %v2835_v26  ;;  %v2877_v26 = vld [vmem:[%s3140_s24 + $0x28] ss:$16 sps:$4 sm:$0xff]  }
 0x47d   : > { %v1149_v53 = vsub.f32 %v1145_v41, %v1148_v52  ;;  %2742 = vmatprep.subr.bf16.mxu0 %v2979_v4  ;;  %v2500_v52 = vld [vmem:[%s3498_s26] ss:$0 sm:$0xff] }
 0x47f   : > { %v1150_v59 = vmul.f32 1.442695, %v1149_v53 }
 0x480   : > { %v2923_v54 = vpop.eup %2922  ;;  %v1373_v56 = vpop.xlane.xlu1 %1372  ;;  %2743 = vmatpush3.bf16.msra.mxu0 %v2836_v27  ;;  %v2882_v27 = vld [vmem:[%s3140_s24 + $0x4] ss:$16 sps:$4 sm:$0xff]  }
 0x481   : > { %v1374_v57 = vsub.f32 %v1370_v44, %v1373_v56  ;;  %v1265_v58 = vsel %vm1031_vm3, %v2923_v54, 0.0  ;;  %2744 = vmatprep.subr.bf16.mxu0 %v2979_v4 }
 0x482   : > { %1266 = vadd.xlane.f32.xlu0 %v1265_v58 }
 0x483   : > { %v1375_v60 = vmul.f32 1.442695, %v1374_v57 }
 0x484   : > { %2745 = vmatpush3.bf16.msra.mxu0 %v2837_v33  ;;  %v2883_v33 = vld [vmem:[%s3140_s24 + $0x8] ss:$16 sps:$4 sm:$0xff]  }
 0x485   : > { %2924 = vpow2.f32 %v1375_v60  ;;  %v2840_v60 = vld [vmem:[%s3140_s24 + $0xe4] ss:$16 sps:$4 sm:$0xff]  }
 0x486   : > { %2926 = vpow2.f32 %v1150_v59  ;;  %v2838_v59 = vld [vmem:[%s3140_s24 + $0xe0] ss:$16 sps:$4 sm:$0xff]  }
 0x492   : > { %v2925_v55 = vpop.eup %2924 }
 0x493   : > { %v1377_v61 = vsel %vm1031_vm3, %v2925_v55, 0.0  ;;  %v2927_v62 = vpop.eup %2926 }
 0x494   : > { %1378 = vadd.xlane.f32.xlu1 %v1377_v61  ;;  %v1152_v63 = vsel %vm1031_vm3, %v2927_v62, 0.0  ;;  %v2843_v61 = vld [vmem:[%s3140_s24 + $0xec] ss:$16 sps:$4 sm:$0xff]  }
 0x495   : > { %1893 = vmatprep.subr.bf16.mxu0 %v2843_v61  ;;  %v2903_v61 = vld [vmem:[%s3150_s13 + $0xd8] sm:$0xff]  }
 0x498   : > { %1159 = vrot.lane.b32.xlu0 %v3237_v50, %s2981_s2  ;;  %1153 = vadd.xlane.f32.xlu1 %v1152_v63  ;;  %v2844_v63 = vld [vmem:[%s3140_s24 + $0xc0] ss:$16 sps:$4 sm:$0xff]  }
 0x4a9   : > { %1271 = vrot.lane.b32.xlu1 %v3237_v50, %s2982_s3 }
 0x4ad   : > { %1383 = vrot.lane.b32.xlu1 %v3237_v50, %s2983_s8 }
 0x50b   : > { %v1267_v0 = vpop.xlane.xlu0 %1266 }
 0x50f   : > { %v1160_v1 = vpop.permute.xlu0 %1159 }
 0x510   : > { %v1165_v2 = vsel %vm1048_vm2, %v1160_v1, 0 }
 0x511   : > { %2701 = vmatpush3.bf16.msra.mxu1 %v1165_v2 }
 0x512   : > { %2712 = vmatprep.subr.bf16.mxu1 %v2979_v4 }
 0x51d   : > { %v1379_v5 = vpop.xlane.xlu1 %1378 }
 0x521   : > { %v1154_v6 = vpop.xlane.xlu1 %1153 }
 0x522   : > { %2928 = vrcp.f32 %v1154_v6  ;;  %v2852_v6 = vld [vmem:[%s3140_s24 + $0xa4] ss:$16 sps:$4 sm:$0xff]  }
 0x523   : > { %2930 = vrcp.f32 %v1267_v0 }
 0x524   : > { %2932 = vrcp.f32 %v1379_v5 }
 0x525   : > { %v1272_v9 = vpop.permute.xlu1 %1271 }
 0x526   : > { %v1277_v12 = vsel %vm1048_vm2, %v1272_v9, 0  ;;  %v2853_v9 = vld [vmem:[%s3140_s24 + $0xa8] ss:$16 sps:$4 sm:$0xff]  }
 0x529   : > { %v1384_v13 = vpop.permute.xlu1 %1383 }
 0x52a   : > { %v1389_v16 = vsel %vm1048_vm2, %v1384_v13, 0  ;;  %v2864_v13 = vld [vmem:[%s3140_s24 + $0x64] ss:$16 sps:$4 sm:$0xff]  }
 0x52f   : > { %v2929_v7 = vpop.eup %2928 }
 0x530   : > { %v1156_v8 = vmul.f32 %v2929_v7, %v2927_v62  ;;  %v2931_v11 = vpop.eup %2930  ;;  %v2849_v62 = vld [vmem:[%s3140_s24 + $0xcc] ss:$16 sps:$4 sm:$0xff]  }
 0x531   : > { %v1269_v50 = vmul.f32 %v2931_v11, %v2923_v54  ;;  %v2933_v15 = vpop.eup %2932  ;;  %v2855_v7 = vld [vmem:[%s3140_s24 + $0xac] ss:$16 sps:$4 sm:$0xff]   ;;  %v2858_v11 = vld [vmem:[%s3140_s24 + $0x84] ss:$16 sps:$4 sm:$0xff]  }
 0x532   : > { %v1157_v10 = vpack.c.bf16 %v1156_v8, %v1156_v8  ;;  %v1381_v17 = vmul.f32 %v2933_v15, %v2925_v55  ;;  %v2841_v55 = vld [vmem:[%s3140_s24 + $0xe8] ss:$16 sps:$4 sm:$0xff]   ;;  %v2850_v8 = vld [vmem:[%s3140_s24 + $0xa0] ss:$16 sps:$4 sm:$0xff]  }
 0x533   : > { %v1270_v14 = vpack.c.bf16 %v1269_v50, %v1269_v50  ;;  %v2861_v50 = vld [vmem:[%s3140_s24 + $0x8c] ss:$16 sps:$4 sm:$0xff]   ;;  %v2862_v15 = vld [vmem:[%s3140_s24 + $0x60] ss:$16 sps:$4 sm:$0xff]  }
 0x534   : > { %2703 = vmatmul.mubr.msk.bf16.vlgmr.msra.gmra.mxu1 %vm1031_vm3, %v1157_v10  ;;  %v1382_v18 = vpack.c.bf16 %v1381_v17, %v1381_v17  ;;  %v2856_v10 = vld [vmem:[%s3140_s24 + $0x80] ss:$16 sps:$4 sm:$0xff]   ;;  %v2870_v17 = vld [vmem:[%s3140_s24 + $0x44] ss:$16 sps:$4 sm:$0xff]  }
 0x535   : > { %2713 = vmatpush3.bf16.msra.mxu1 %v1277_v12  ;;  %2714 = vmatprep.mubr.msk.bf16.mxu1 %vm2980_vm0, %v2979_v4  ;;  %v2859_v12 = vld [vmem:[%s3140_s24 + $0x88] ss:$16 sps:$4 sm:$0xff]  }
 0x536   : > { %2724 = vmatprep.subr.bf16.mxu1 %v2979_v4 }
 0x53c   : > { %2715 = vmatmul.mubr.msk.bf16.vlgmr.msra.gmra.mxu1 %vm1031_vm3, %v1270_v14  ;;  %v2867_v14 = vld [vmem:[%s3140_s24 + $0x6c] ss:$16 sps:$4 sm:$0xff]  }
 0x53d   : > { %2725 = vmatpush3.bf16.msra.mxu1 %v1389_v16  ;;  %2726 = vmatprep.mubr.msk.bf16.mxu1 %vm2980_vm0, %v2979_v4  ;;  %v2865_v16 = vld [vmem:[%s3140_s24 + $0x68] ss:$16 sps:$4 sm:$0xff]  }
 0x53e   : > { %1852 = vmatprep.subr.bf16.mxu1 %v2840_v60  ;;  %v2901_v60 = vld [vmem:[%s3150_s13 + $0xa0] sm:$0xff]  }
 0x544   : > { %2727 = vmatmul.mubr.msk.bf16.vlgmr.msra.gmra.mxu1 %vm1031_vm3, %v1382_v18  ;;  %v2873_v18 = vld [vmem:[%s3140_s24 + $0x4c] ss:$16 sps:$4 sm:$0xff]  }
 0x545   : > { %1884 = vmatprep.mubr.bf16.mxu1 %v2978_v3  ;;  %1853 = vmatpush1.bf16.msra.mxu1 %v2838_v59  ;;  %v2900_v59 = vld [vmem:[%s3150_s13 + $0x20] sm:$0xff]  }
 0x5f4   : > { %v1201_v28 = vpop.f32.mrf.mxu1 }
 0x5f5   : > { %1432 = vrot.lane.b32.xlu0 %v1201_v28, %s2983_s8  ;;  %v2885_v28 = vld [vmem:[%s3140_s24 + $0xc] ss:$16 sps:$4 sm:$0xff]  }
 0x5f6   : > { %v2704_v29 = vpop.f32.mrf.mxu1 }
 0x5f7   : > { %v2880_v29 = vld [vmem:[%s3140_s24] ss:$16 sps:$4 sm:$0xff]  }
 0x5f8   : > { %v1204_v34 = vpop.f32.mrf.mxu1 }
 0x5f9   : > { %v2886_v34 = vld [vmem:[%s3150_s13 + $0x78] sm:$0xff]  }
 0x5fa   : > { %v2705_v35 = vpop.f32.mrf.mxu1 }
 0x5fb   : > { %v2887_v35 = vld [vmem:[%s3150_s13 + $0xf8] sm:$0xff]  }
 0x5fc   : > { %v1313_v36 = vpop.f32.mrf.mxu1 }
 0x5fd   : > { %1436 = vrot.lane.b32.xlu1 %v1313_v36, %s2982_s3 }
 0x5fe   : > { %v2716_v37 = vpop.f32.mrf.mxu1 }
 0x600   : > { %v1316_v38 = vpop.f32.mrf.mxu1 }
 0x602   : > { %v2717_v39 = vpop.f32.mrf.mxu1 }
 0x604   : > { %v1425_v40 = vpop.f32.mrf.mxu1 }
 0x605   : > { %1440 = vrot.lane.b32.xlu0 %v1425_v40, %s2981_s2  ;;  %v2509_v40 = vld [vmem:[%s3499_s16] ss:$0 sm:$0xff] }
 0x606   : > { %v2728_v41 = vpop.f32.mrf.mxu1 }
 0x608   : > { %v1428_v42 = vpop.f32.mrf.mxu1 }
 0x609   : > { %v2510_v42 = vld [vmem:[%s3501_s23] ss:$0 sm:$0xff] }
 0x60a   : > { %v2729_v43 = vpop.f32.mrf.mxu1 }
 0x667   : > { %v1433_v44 = vpop.permute.xlu0 %1432 }
 0x668   : > { %v1443_v46 = vsel %vm976_vm1, %v3273_v25, %v1433_v44 }
 0x66f   : > { %v1437_v4 = vpop.permute.xlu1 %1436 }
 0x670   : > { %v1445_v47 = vsel %vm1444_vm4, %v1443_v46, %v1437_v4  ;;  %v2888_v4 = vld [vmem:[%s3150_s13 + $0x38] sm:$0xff]  }
 0x671   : > { %v2889_v46 = vld [vmem:[%s3150_s13 + $0xb8] sm:$0xff]  }
 0x677   : > { %v1441_v48 = vpop.permute.xlu0 %1440 }
 0x678   : > { %v1447_v49 = vsel %vm1446_vm5, %v1445_v47, %v1441_v48  ;;  %v2890_v48 = vld [vmem:[%s3150_s13 + $0x70] sm:$0xff]  }
 0x679   : > { %v1448_v51 = vpack.c.bf16 %v1447_v49, %v1447_v49  ;;  %v2891_v49 = vld [vmem:[%s3150_s13 + $0xf0] sm:$0xff]  }
 0x67b   : > { %2747 = vmatmul.mubr.bf16.vlgmr.msra.gmra.mxu0 %v1448_v51  ;;  %v2892_v51 = vld [vmem:[%s3150_s13 + $0x30] sm:$0xff]  }
 0x67c   : > { %1925 = vmatprep.mubr.bf16.mxu0 %v2978_v3  ;;  %v2846_v3 = vld [vmem:[%s3140_s24 + $0xc4] ss:$16 sps:$4 sm:$0xff]   ;;  %1894 = vmatpush1.bf16.msra.mxu0 %v2841_v55  ;;  %v2902_v55 = vld [vmem:[%s3150_s13 + $0x58] sm:$0xff]  }
 0x67d   : > { %1854 = vmatprep.subr.bf16.mxu1 %v2846_v3  ;;  %1895 = vmatprep.subr.bf16.mxu0 %v2849_v62  ;;  %v2904_v3 = vld [vmem:[%s3150_s13 + $0x18] sm:$0xff]  }
 0x67e   : > { %1855 = vmatpush1.bf16.msra.mxu1 %v2844_v63  ;;  %v2905_v62 = vld [vmem:[%s3150_s13 + $0x98] sm:$0xff]   ;;  %v2906_v63 = vld [vmem:[%s3150_s13 + $0x50] sm:$0xff]  }
 0x67f   : > { %1856 = vmatprep.subr.bf16.mxu1 %v2852_v6  ;;  %v2912_v6 = vld [vmem:[%s3150_s13 + $0x8] sm:$0xff]  }
 0x682   : > { %1857 = vmatpush1.bf16.msra.mxu1 %v2850_v8  ;;  %v2914_v8 = vld [vmem:[%s3150_s13 + $0x40] sm:$0xff]  }
 0x683   : > { %1858 = vmatprep.subr.bf16.mxu1 %v2858_v11  ;;  %v2917_v11 = vld [vmem:[%s3150_s13 + $0x80] sm:$0xff]  }
 0x686   : > { %1859 = vmatpush1.bf16.msra.mxu1 %v2856_v10  ;;  %v2916_v10 = vld [vmem:[%s3150_s13] sm:$0xff]  }
 0x687   : > { %1860 = vmatprep.subr.bf16.mxu1 %v2864_v13 }
 0x68a   : > { %1861 = vmatpush1.bf16.msra.mxu1 %v2862_v15 }
 0x68b   : > { %1862 = vmatprep.subr.bf16.mxu1 %v2870_v17 }
 0x68e   : > { %1863 = vmatpush1.bf16.msra.mxu1 %v2868_v19 }
 0x68f   : > { %1864 = vmatprep.subr.bf16.mxu1 %v2876_v21 }
 0x692   : > { %1865 = vmatpush1.bf16.msra.mxu1 %v2874_v23 }
 0x693   : > { %1866 = vmatprep.subr.bf16.mxu1 %v2882_v27 }
 0x696   : > { %1867 = vmatpush1.bf16.msra.mxu1 %v2880_v29 }
 0x697   : > { %2618 = vmatprep.subr.bf16.mxu1 %v2886_v34 }
 0x73b   : > { %v1537_v53 = vpop.f32.mrf.mxu0 }
 0x73c   : > { %v1538_v25 = vadd.f32 %v2500_v52, %v1537_v53  ;;  %v2893_v52 = vld [vmem:[%s3150_s13 + $0xb0] sm:$0xff]   ;;  %v2894_v53 = vld [vmem:[%s3150_s13 + $0x68] sm:$0xff]  }
 0x73d   : > { %v2748_v54 = vpop.f32.mrf.mxu0 }
 0x73e   : > { %v1543_v56 = vadd.f32 %v1538_v25, %v3196_v24  ;;  %v2847_v24 = vld [vmem:[%s3140_s24 + $0xc8] ss:$16 sps:$4 sm:$0xff]  }
 0x73f   : > { %v1540_v57 = vpop.f32.mrf.mxu0  ;;  %1896 = vmatpush1.bf16.msra.mxu0 %v2847_v24  ;;  %v2895_v25 = vld [vmem:[%s3150_s13 + $0xe8] sm:$0xff]   ;;  %v2907_v24 = vld [vmem:[%s3150_s13 + $0xd0] sm:$0xff]  }
 0x740   : > { %1544 = vadd.xlane.f32.xlu1 %v1543_v56  ;;  %1897 = vmatprep.subr.bf16.mxu0 %v2855_v7  ;;  %v2896_v54 = vld [vmem:[%s3150_s13 + $0x28] sm:$0xff]   ;;  %v2898_v57 = vld [vmem:[%s3150_s13 + $0x60] sm:$0xff]  }
 0x741   : > { %v2749_v58 = vpop.f32.mrf.mxu0  ;;  %v2913_v7 = vld [vmem:[%s3150_s13 + $0x88] sm:$0xff]  }
 0x742   : > { %v2899_v58 = vld [vmem:[%s3150_s13 + $0xe0] sm:$0xff]  }
 0x743   : > { %1898 = vmatpush1.bf16.msra.mxu0 %v2853_v9  ;;  %v2915_v9 = vld [vmem:[%s3150_s13 + $0xc0] sm:$0xff]  }
 0x744   : > { %1899 = vmatprep.subr.bf16.mxu0 %v2861_v50  ;;  %v1686_v50 = vsub.s32 3, %v3215_v30 }
 0x747   : > { %1900 = vmatpush1.bf16.msra.mxu0 %v2859_v12  ;;  %v1602_v12 = vld [vmem:[%s3145_s0] sm:$0xf] }
 0x748   : > { %1901 = vmatprep.subr.bf16.mxu0 %v2867_v14  ;;  %v1675_v13 = vrot.slane %v1602_v12, %v752_v32  ;;  %v1683_v14 = vrot.slane %v1602_v12, %v760_v45  ;;  %v1679_v15 = vrot.slane %v1602_v12, %v756_v31 }
 0x74b   : > { %1902 = vmatpush1.bf16.msra.mxu0 %v2865_v16  ;;  %v1687_v16 = vrot.slane %v1602_v12, %v1686_v50 }
 0x74c   : > { %1903 = vmatprep.subr.bf16.mxu0 %v2873_v18 }
 0x74f   : > { %1904 = vmatpush1.bf16.msra.mxu0 %v2871_v20 }
 0x750   : > { %1905 = vmatprep.subr.bf16.mxu0 %v2879_v22 }
 0x753   : > { %1906 = vmatpush1.bf16.msra.mxu0 %v2877_v26 }
 0x754   : > { %1907 = vmatprep.subr.bf16.mxu0 %v2885_v28 }
 0x757   : > { %1908 = vmatpush1.bf16.msra.mxu0 %v2883_v33 }
 0x758   : > { %2640 = vmatprep.subr.bf16.mxu0 %v2887_v35 }
 0x7c9   : > { %v1545_v0 = vpop.xlane.xlu1 %1544 }
 0x7ca   : > { %v1547_v1 = vmul.f32 0.0078125, %v1545_v0  ;;  %v2908_v0 = vld [vmem:[%s3150_s13 + $0x10] sm:$0xff]  }
 0x7cc   : > { %v1548_v2 = vsub.f32 %v1543_v56, %v1547_v1  ;;  %v2897_v56 = vld [vmem:[%s3150_s13 + $0xa8] sm:$0xff]   ;;  %v2909_v1 = vld [vmem:[%s3150_s13 + $0x90] sm:$0xff]  }
 0x7ce   : > { %v1549_v5 = vmul.f32 %v1548_v2, %v1548_v2 }
 0x7d0   : > { %1550 = vadd.xlane.f32.xlu0 %v1549_v5  ;;  %v2911_v5 = vld [vmem:[%s3150_s13 + $0xc8] sm:$0xff]  }
 0x859   : > { %v1551_v36 = vpop.xlane.xlu0 %1550 }
 0x85a   : > { %v1552_v37 = vmul.f32 0.0078125, %v1551_v36 }
 0x85c   : > { %v1553_v38 = vadd.f32 1e-05, %v1552_v37 }
 0x85e   : > { %2934 = vrsqrt.f32 %v1553_v38 }
 0x86b   : > { %v2935_v39 = vpop.eup %2934 }
 0x86c   : > { %v1555_v41 = vmul.f32 %v2935_v39, %v1548_v2  ;;  %v2910_v2 = vld [vmem:[%s3150_s13 + $0x48] sm:$0xff]  }
 0x86e   : > { %v1562_v43 = vmul.f32 %v2509_v40, %v1555_v41  ;;  %v2543_v40 = vld [vmem:[%s676_s28] ss:$0 sm:$0xff] }
 0x870   : > { %v3372_v44 = vadd.f32 %v2510_v42, %v1562_v43 }
 0x872   : > { %v1670_v47 = vpack.c.bf16 %v3372_v44, %v3372_v44 }
 0x874   : > { %1885 = vmatmul.mubr.bf16.vlgmr.msra.gmra.mxu1 %v1670_v47  ;;  %1926 = vmatmul.mubr.bf16.vlgmr.msra.gmra.mxu0 %v1670_v47 }
 0x875   : > { %2619 = vmatpush3.bf16.msra.mxu1 %v2888_v4  ;;  %2641 = vmatpush3.bf16.msra.mxu0 %v2889_v46 }
 0x876   : > { %2620 = vmatprep.subr.bf16.mxu1 %v2890_v48  ;;  %2642 = vmatprep.subr.bf16.mxu0 %v2891_v49 }
 0x879   : > { %2621 = vmatpush3.bf16.msra.mxu1 %v2892_v51  ;;  %2643 = vmatpush3.bf16.msra.mxu0 %v2893_v52 }
 0x87a   : > { %2622 = vmatprep.subr.bf16.mxu1 %v2894_v53  ;;  %2644 = vmatprep.subr.bf16.mxu0 %v2895_v25 }
 0x87d   : > { %2623 = vmatpush3.bf16.msra.mxu1 %v2896_v54  ;;  %2645 = vmatpush3.bf16.msra.mxu0 %v2897_v56 }
 0x87e   : > { %2624 = vmatprep.subr.bf16.mxu1 %v2898_v57  ;;  %2646 = vmatprep.subr.bf16.mxu0 %v2899_v58 }
 0x881   : > { %2625 = vmatpush3.bf16.msra.mxu1 %v2900_v59  ;;  %2647 = vmatpush3.bf16.msra.mxu0 %v2901_v60 }
 0x882   : > { %2626 = vmatprep.subr.bf16.mxu1 %v2902_v55  ;;  %2648 = vmatprep.subr.bf16.mxu0 %v2903_v61  ;;  %v2576_v61 = vld [vmem:[%s679_s4] ss:$0 sm:$0xff] }
 0x885   : > { %2627 = vmatpush3.bf16.msra.mxu1 %v2904_v3  ;;  %2649 = vmatpush3.bf16.msra.mxu0 %v2905_v62 }
 0x886   : > { %2628 = vmatprep.subr.bf16.mxu1 %v2906_v63  ;;  %2650 = vmatprep.subr.bf16.mxu0 %v2907_v24 }
 0x889   : > { %2629 = vmatpush3.bf16.msra.mxu1 %v2908_v0  ;;  %2651 = vmatpush3.bf16.msra.mxu0 %v2909_v1 }
 0x88a   : > { %2630 = vmatprep.subr.bf16.mxu1 %v2910_v2  ;;  %2652 = vmatprep.subr.bf16.mxu0 %v2911_v5 }
 0x88d   : > { %2631 = vmatpush3.bf16.msra.mxu1 %v2912_v6  ;;  %2653 = vmatpush3.bf16.msra.mxu0 %v2913_v7 }
 0x88e   : > { %2632 = vmatprep.subr.bf16.mxu1 %v2914_v8  ;;  %2654 = vmatprep.subr.bf16.mxu0 %v2915_v9 }
 0x891   : > { %2633 = vmatpush3.bf16.msra.mxu1 %v2916_v10  ;;  %2655 = vmatpush3.bf16.msra.mxu0 %v2917_v11 }
 0x934   : > { %v1886_v17 = vpop.f32.mrf.mxu1  ;;  %v1927_v18 = vpop.f32.mrf.mxu0 }
 0x935   : > { %v1887_v19 = vadd.f32 %v1886_v17, %v1675_v13  ;;  %v1928_v20 = vadd.f32 %v1927_v18, %v1683_v14 }
 0x936   : > { %v1888_v21 = vpop.f32.mrf.mxu1  ;;  %v1929_v22 = vpop.f32.mrf.mxu0 }
 0x937   : > { %v1889_v23 = vadd.f32 %v1888_v21, %v1679_v15  ;;  %v1930_v26 = vadd.f32 %v1929_v22, %v1687_v16  ;;  %v1934_v27 = vmax.f32 %v1887_v19, 0.0  ;;  %v1936_v28 = vmax.f32 %v1928_v20, 0.0 }
 0x938   : > { %v1890_v29 = vpop.f32.mrf.mxu1  ;;  %v1931_v32 = vpop.f32.mrf.mxu0 }
 0x939   : > { %v1935_v33 = vmax.f32 %v1889_v23, 0.0  ;;  %v1937_v34 = vmax.f32 %v1930_v26, 0.0  ;;  %v1938_v36 = vpack.c.bf16 %v1934_v27, %v1934_v27  ;;  %v1940_v37 = vpack.c.bf16 %v1936_v28, %v1936_v28 }
 0x93a   : > { %v1891_v45 = vpop.f32.mrf.mxu1  ;;  %v1932_v35 = vpop.f32.mrf.mxu0 }
 0x93b   : > { %v1939_v30 = vpack.c.bf16 %v1935_v33, %v1935_v33  ;;  %v1941_v31 = vpack.c.bf16 %v1937_v34, %v1937_v34 }
 0x93d   : > { %2172 = vmatprep.mubr.bf16.mxu1 %v1939_v30  ;;  %2212 = vmatprep.mubr.bf16.mxu0 %v1941_v31 }
 0x93e   : > { %2173 = vmatmul.mubr.bf16.vlgmr.msra.gmra.mxu1 %v1938_v36  ;;  %2213 = vmatmul.mubr.bf16.vlgmr.msra.gmra.mxu0 %v1940_v37 }
 0x9fe   : > { %v2634_v38 = vpop.f32.mrf.mxu1  ;;  %v2656_v39 = vpop.f32.mrf.mxu0 }
 0xa00   : > { %v2635_v41 = vpop.f32.mrf.mxu1  ;;  %v2657_v42 = vpop.f32.mrf.mxu0 }
 0xa01   : > { %v2636_v43 = vadd.f32 %v2635_v41, %v2634_v38  ;;  %v2658_v48 = vadd.f32 %v2657_v42, %v2656_v39 }
 0xa02   : > { %v2637_v4 = vpop.f32.mrf.mxu1  ;;  %v2659_v46 = vpop.f32.mrf.mxu0 }
 0xa03   : > { %v2175_v47 = vadd.f32 %v2636_v43, %v2543_v40 }
 0xa04   : > { %v2638_v49 = vpop.f32.mrf.mxu1  ;;  %v2660_v51 = vpop.f32.mrf.mxu0 }
 0xa05   : > { %v2215_v52 = vadd.f32 %v2658_v48, %v2175_v47 }
 0xa07   : > { %v2220_v53 = vadd.f32 %v2215_v52, %v3372_v44  ;;  %v2577_v44 = vld [vmem:[%s682_s7] ss:$0 sm:$0xff] }
 0xa09   : > { %2221 = vadd.xlane.f32.xlu0 %v2220_v53 }
 0xa92   : > { %v2222_v25 = vpop.xlane.xlu0 %2221 }
 0xa93   : > { %v2223_v54 = vmul.f32 0.0078125, %v2222_v25 }
 0xa95   : > { %v2224_v56 = vsub.f32 %v2220_v53, %v2223_v54 }
 0xa97   : > { %v2225_v57 = vmul.f32 %v2224_v56, %v2224_v56 }
 0xa99   : > { %2226 = vadd.xlane.f32.xlu1 %v2225_v57 }
 0xb22   : > { %v2227_v58 = vpop.xlane.xlu1 %2226 }
 0xb23   : > { %v2228_v59 = vmul.f32 0.0078125, %v2227_v58 }
 0xb25   : > { %v2229_v60 = vadd.f32 1e-05, %v2228_v59 }
 0xb27   : > { %2936 = vrsqrt.f32 %v2229_v60 }
 0xb34   : > { %v2937_v55 = vpop.eup %2936 }
 0xb35   : > { %v2231_v3 = vmul.f32 %v2937_v55, %v2224_v56 }
 0xb37   : > { %v2238_v62 = vmul.f32 %v2576_v61, %v2231_v3  ;;  %2250 = sbr.rel (%p2578_p8) target bundleno = 2877 (0xb3d), region = 84 }
 0xb39   : > { %v2245_v63 = vadd.f32 %v2577_v44, %v2238_v62 }
 0xb3b   : > { %2246 = vst [vmem:[#allocation2] sm:$0xff] %v2245_v63 }
 0xb3c   : > { %2251 = vst [vmem:[%s3167_s9] sm:$0xff] %v2245_v63 }
 0xb3d PF: > { %s3504_s21 = sld [smem:[#allocation6_spill]] }
 0xb3e   : > { %s3505_s29 = sld [smem:[#allocation4_spill]] }
 0xb3f   : > { %s3506_s30 = sld [smem:[#allocation5_spill]] }
 0xb40   : > { %s3507_s15 = sld [smem:[#allocation7_spill]] }
 0xb41   : > { %s3508_s16 = sld [smem:[#allocation8_spill]] }
 0xb43   : > { %s24_s17 = sadd.s32 1, %s3504_s21  }
 0xb44   : > { %p21_p9 = scmp.ge.s32.totalorder %s24_s17, 10  }
 0xb46   :  { %23 = sbr.rel (!%p21_p9) target bundleno = 11 (0xb), region = 153 }

// kernel: cvqvae_forward.7
= control target key start
LH: loop header
LB: loop body
LE: loop exit
PB: predicated region body
PF: predicated region fallthrough
CT: control target
= control target key end

     0   :  { %s5496_s30 = smov 0   ;;  %s6220_s0 = inlined_call_operand.vmem [shape: f32[2,16,128], index: 0, kind: input, shape index: {}]   ;;  %s6221_s1 = inlined_call_operand.vmem [shape: f32[2,8,128], index: 1, kind: input, shape index: {}]   ;;  %s6222_s2 = inlined_call_operand.vmem [shape: f32[2,1,8], index: 2, kind: input, shape index: {}]   ;;  %s6223_s3 = inlined_call_operand.vmem [shape: f32[2,8,32], index: 3, kind: input, shape index: {}]   ;;  %s6224_s4 = inlined_call_operand.vmem [shape: bf16[128,33], index: 4, kind: input, shape index: {}]   ;;  %s6225_s5 = inlined_call_operand.vmem [shape: f32[1,33], index: 5, kind: input, shape index: {}]   ;;  %s6226_s6 = inlined_call_operand.vmem [shape: bf16[4,128,384], index: 6, kind: input, shape index: {}]   ;;  %s6227_s7 = inlined_call_operand.vmem [shape: f32[4,1,384], index: 7, kind: input, shape index: {}]   ;;  %s6228_s8 = inlined_call_operand.vmem [shape: bf16[4,128,128], index: 8, kind: input, shape index: {}]   ;;  %s6229_s9 = inlined_call_operand.vmem [shape: f32[4,1,128], index: 9, kind: input, shape index: {}]   ;;  %s6230_s10 = inlined_call_operand.vmem [shape: f32[4,1,128], index: 10, kind: input, shape index: {}]   ;;  %s6231_s11 = inlined_call_operand.vmem [shape: f32[4,1,128], index: 11, kind: input, shape index: {}]   ;;  %s6232_s12 = inlined_call_operand.vmem [shape: bf16[4,128,128], index: 12, kind: input, shape index: {}]   ;;  %s6233_s13 = inlined_call_operand.vmem [shape: f32[4,1,128], index: 13, kind: input, shape index: {}]   ;;  %s6234_s14 = inlined_call_operand.vmem [shape: bf16[4,128,256], index: 14, kind: input, shape index: {}]   ;;  %s6235_s15 = inlined_call_operand.vmem [shape: f32[4,1,256], index: 15, kind: input, shape index: {}]   ;;  %s6236_s16 = inlined_call_operand.vmem [shape: bf16[4,128,128], index: 16, kind: input, shape index: {}]   ;;  %s6237_s17 = inlined_call_operand.vmem [shape: f32[4,1,128], index: 17, kind: input, shape index: {}]   ;;  %s6238_s18 = inlined_call_operand.vmem [shape: f32[4,1,128], index: 18, kind: input, shape index: {}]   ;;  %s6239_s19 = inlined_call_operand.vmem [shape: f32[4,1,128], index: 19, kind: input, shape index: {}]   ;;  %s6240_s20 = inlined_call_operand.vmem [shape: bf16[4,128,512], index: 20, kind: input, shape index: {}]   ;;  %s6241_s21 = inlined_call_operand.vmem [shape: f32[4,1,512], index: 21, kind: input, shape index: {}]   ;;  %s6242_s22 = inlined_call_operand.vmem [shape: bf16[4,512,128], index: 22, kind: input, shape index: {}]   ;;  %s6243_s23 = inlined_call_operand.vmem [shape: f32[4,1,128], index: 23, kind: input, shape index: {}]   ;;  %s6244_s24 = inlined_call_operand.vmem [shape: f32[4,1,128], index: 24, kind: input, shape index: {}]   ;;  %s6245_s25 = inlined_call_operand.vmem [shape: f32[4,1,128], index: 25, kind: input, shape index: {}]   ;;  %s6246_s26 = inlined_call_operand.vmem [shape: f32[2,16,33], index: 26, kind: output, shape index: {0}]   ;;  %s6247_s27 = inlined_call_operand.vmem [shape: f32[2,16,32], index: 27, kind: output, shape index: {1}]  }
   0x1   :  { %6257 = sst [smem:[#allocation15_spill]] %s6220_s0 }
   0x2   :  { %6258 = sst [smem:[#allocation16_spill]] %s6221_s1 }
   0x3   :  { %6259 = sst [smem:[#allocation17_spill]] %s6222_s2 }
   0x4   :  { %6260 = sst [smem:[#allocation18_spill]] %s6223_s3 }
   0x5   :  { %6261 = sst [smem:[#allocation19_spill]] %s6224_s4  ;;  %s5492_s4 = smov 0  }
   0x6   :  { %6262 = sst [smem:[#allocation20_spill]] %s6225_s5 }
   0x7   :  { %6263 = sst [smem:[#allocation21_spill]] %s6226_s6 }
   0x8   :  { %6264 = sst [smem:[#allocation22_spill]] %s6227_s7  ;;  %s5490_s7 = smov 0  }
   0x9   :  { %6265 = sst [smem:[#allocation23_spill]] %s6228_s8  ;;  %s5494_s8 = smov 0  }
   0xa   :  { %6266 = sst [smem:[#allocation24_spill]] %s6229_s9  ;;  %s5498_s9 = smov 0  }
   0xb   :  { %6267 = sst [smem:[#allocation25_spill]] %s6230_s10 }
   0xc   :  { %6268 = sst [smem:[#allocation26_spill]] %s6231_s11 }
   0xd   :  { %6269 = sst [smem:[#allocation27_spill]] %s6232_s12 }
   0xe   :  { %6270 = sst [smem:[#allocation28_spill]] %s6234_s14 }
   0xf   :  { %6271 = sst [smem:[#allocation29_spill]] %s6235_s15 }
  0x10   :  { %6272 = sst [smem:[#allocation30_spill]] %s6236_s16 }
  0x11   :  { %6273 = sst [smem:[#allocation31_spill]] %s6237_s17 }
  0x12   :  { %6274 = sst [smem:[#allocation32_spill]] %s6238_s18 }
  0x13   :  { %6275 = sst [smem:[#allocation33_spill]] %s6239_s19 }
  0x14   :  { %6276 = sst [smem:[#allocation34_spill]] %s6240_s20 }
  0x15   :  { %6277 = sst [smem:[#allocation35_spill]] %s6241_s21 }
  0x16   :  { %6278 = sst [smem:[#allocation36_spill]] %s6242_s22 }
  0x17   :  { %6279 = sst [smem:[#allocation37_spill]] %s6243_s23 }
  0x18   :  { %6280 = sst [smem:[#allocation38_spill]] %s6244_s24 }
  0x19   :  { %6281 = sst [smem:[#allocation39_spill]] %s6245_s25 }
  0x1a   :  { %6282 = sst [smem:[#allocation40_spill]] %s6246_s26 }
  0x1b   :  { %6283 = sst [smem:[#allocation41_spill]] %s6247_s27 }
  0x1c LB: > { %6284 = sst [smem:[#allocation3_spill]] %s5324_s7  ;;  %s47_s5 = sadd.s32 1, %s5332_s8  ;;  %s5340_s9 = sphi %s5498_s9, %s38_s9   ;;  %s5336_s30 = sphi %s5496_s30, %s6353_s30   ;;  %s5332_s8 = sphi %s5494_s8, %s6352_s8   ;;  %s5328_s4 = sphi %s5492_s4, %s6351_s4   ;;  %s5324_s7 = sphi %s5490_s7, %s6350_s7  }
  0x1d   : > { %6285 = sst [smem:[#allocation4_spill]] %s5332_s8  ;;  %s50_s28 = sadd.s32 1, %s5336_s30 }
  0x1e   : > { %6286 = sst [smem:[#allocation5_spill]] %s5336_s30  ;;  %p48_p0 = scmp.ge.s32.totalorder %s47_s5, 4 }
  0x1f   : > { %6287 = sst [smem:[#allocation6_spill]] %s5340_s9  ;;  %p4442_p1 = scmp.ge.s32.totalorder %s5340_s9, 1 }
  0x20   : > { %p955_p2 = scmp.lt.s32.totalorder %s5340_s9, 9  ;;  %s6355_s5 = smov (%p48_p0, %s47_s5), 0 }
  0x21   : > { %6288 = sst [smem:[#allocation7_spill]] %s6355_s5  ;;  %s6357_s28 = smov (!%p48_p0, %s50_s28), %s5336_s30 }
  0x22   : > { %p956_p3 = pnand %p4442_p1, %p955_p2  ;;  %p52_p4 = scmp.ge.s32.totalorder %s6357_s28, 2 }
  0x24   : > { %s6359_s28 = smov (%p52_p4, %s6357_s28), 0  ;;  %959 = sbr.rel (%p956_p3) target bundleno = 5553 (0x15b1), region = 124 }
  0x25   : > { %6289 = sst [smem:[#allocation8_spill]] %s6359_s28 }
  0x29   : > { %p1120_p5 = scmp.lt.s32.totalorder %s5328_s4, 1  ;;  %p1136_p6 = scmp.lt.s32.totalorder %s5324_s7, 3 }
  0x2a   : > { %s6291_s11 = sld [smem:[#allocation15_spill]] }
  0x2b   : > { %s6361_s4 = smov (!%p1120_p5, %s5328_s4), 1  ;;  %s6293_s5 = sld [smem:[#allocation16_spill]] }
  0x2c   : > { %6290 = sst [smem:[#allocation9_spill]] %s6361_s4  ;;  %s5529_s10 = sshll.u32 %s6361_s4, 4 }
  0x2d   : > { %s5526_s0 = scalar_select %p1136_p6, %s5324_s7, 3 }
  0x2e   : > { %s4445_s29 = sshll.u32 %s6361_s4, 3  ;;  %s6296_s24 = sld [smem:[#allocation18_spill]] }
  0x2f   : > { %s4970_s22 = smul.u32 192, %s5526_s0  ;;  %s4637_s1 = sshll.u32 %s5526_s0, 6 }
  0x30   : > { %s5536_s2 = scalar_lea.vmem %s6291_s11, %s5529_s10  ;;  %s4971_s6 = smul.u32 3, %s5526_s0 }
  0x31   : > { %6292 = sst [smem:[#allocation10_spill]] %s5536_s2  ;;  %s5541_s30 = scalar_lea.vmem %s6293_s5, %s4445_s29 }
  0x32   : > { %6294 = sst [smem:[#allocation11_spill]] %s5541_s30  ;;  %s4639_s27 = sshll.u32 %s5526_s0, 7 }
  0x33   : > { %s6298_s28 = sld [smem:[#allocation23_spill]]  ;;  %s4454_s20 = sshll.u32 %s5526_s0, 1 }
  0x34   : > { %s5550_s23 = scalar_lea.vmem %s6296_s24, %s4445_s29  ;;  %s6300_s9 = sld [smem:[#allocation21_spill]] }
  0x35   : > { %6297 = sst [smem:[#allocation12_spill]] %s5550_s23  ;;  %s4641_s21 = sshll.u32 %s5526_s0, 8 }
  0x36   : > { %s6302_s4 = sld [smem:[#allocation22_spill]] }
  0x37   : > { %s6305_s12 = sld [smem:[#allocation27_spill]] }
  0x38   : > { %s6306_s14 = sld [smem:[#allocation28_spill]] }
  0x39   : > { %s5558_s5 = scalar_lea.vmem %s6298_s28, %s4637_s1  ;;  %s6307_s15 = sld [smem:[#allocation29_spill]] }
  0x3a   : > { %6299 = sst [smem:[#allocation13_spill]] %s5558_s5  ;;  %s5563_s7 = scalar_lea.vmem %s6300_s9, %s4970_s22 }
  0x3b   : > { %s6308_s16 = sld [smem:[#allocation30_spill]] }
  0x3c   : > { %s5572_s30 = scalar_lea.vmem %s6302_s4, %s4971_s6  ;;  %s6315_s4 = sld [smem:[#allocation36_spill]] }
  0x3d   : > { %s5585_s25 = scalar_lea.vmem %s6305_s12, %s4637_s1  ;;  %s6312_s12 = sld [smem:[#allocation34_spill]] }
  0x3e   : > { %s5595_s2 = scalar_lea.vmem %s6306_s14, %s4639_s27  ;;  %s6316_s8 = sld [smem:[#allocation37_spill]] }
  0x3f   : > { %s5601_s28 = scalar_lea.vmem %s6307_s15, %s4454_s20  ;;  %s6314_s15 = sld [smem:[#allocation35_spill]] }
  0x40   : > { %s6317_s20 = sld [smem:[#allocation38_spill]] }
  0x41   : > { %s5606_s9 = scalar_lea.vmem %s6308_s16, %s4637_s1  ;;  %s4459_s1 = sshll.u32 %s5526_s0, 2 }
  0x42   : > { %s5635_s6 = scalar_lea.vmem %s6315_s4, %s4641_s21  ;;  %s6318_s17 = sld [smem:[#allocation39_spill]] }
  0x43   : > { %s5624_s14 = scalar_lea.vmem %s6312_s12, %s4641_s21  ;;  %s6320_s26 = sld [smem:[#allocation41_spill]] }
  0x44   : > { %6313 = sst [smem:[#allocation14_spill]] %s5624_s14  ;;  %s1206_s29 = scalar_lea.vmem %s6316_s8, %s5526_s0 }
  0x45   : > { %s5630_s24 = scalar_lea.vmem %s6314_s15, %s4459_s1  ;;  %s6319_s1 = sld [smem:[#allocation40_spill]] }
  0x46   : > { %s1209_s12 = scalar_lea.vmem %s6317_s20, %s5526_s0  ;;  %s6321_s27 = sld [smem:[#allocation3_spill]] }
  0x48   : > { %s1212_s14 = scalar_lea.vmem %s6318_s17, %s5526_s0 }
  0x49   : > { %s5659_s4 = scalar_lea.vmem %s6320_s26, %s5529_s10 }
  0x4b   : > { %s5653_s22 = scalar_lea.vmem %s6319_s1, %s5529_s10 }
  0x4c   : > { %p4466_p7 = scmp.ne.s32.totalorder %s6321_s27, 0 }
  0x4d   : > { %s6322_s5 = sld [smem:[#allocation10_spill]] (!%p4466_p7) }
  0x4e   : > { %1227 = sbr.rel (%p4466_p7) target bundleno = 85 (0x55), region = 128 }
  0x53   : > { %v1228_v0 = vld [vmem:[%s6322_s5] sm:$0xff]  ;;  %v1229_v1 = vld [vmem:[%s6322_s5 + $0x8] sm:$0xff] }
  0x54   : > { %1230 = vst [vmem:[#allocation2] sm:$0xff] %v1228_v0  ;;  %1231 = vst [vmem:[#allocation2 + $0x8] sm:$0xff] %v1229_v1 }
  0x55 PF: > { %v5050_v2 = vld [vmem:[%s5563_s7 + $0xac] ss:$12 sps:$4 sm:$0xff]   ;;  %v5052_v3 = vld [vmem:[%s5563_s7 + $0xa8] ss:$12 sps:$4 sm:$0xff]   ;;  %v5342_v4 = vmov 0   ;;  %v5343_v5 = vmov 0.0   ;;  %v1234_v31 = vlaneseq }
  0x56   : > { %1472 = vmatprep.mubr.bf16.mxu0 %v5342_v4  ;;  %4769 = vmatprep.subr.bf16.mxu1 %v5343_v5  ;;  %v5053_v6 = vld [vmem:[%s5563_s7 + $0x94] ss:$12 sps:$4 sm:$0xff]   ;;  %v5055_v7 = vld [vmem:[%s5563_s7 + $0x90] ss:$12 sps:$4 sm:$0xff]   ;;  %v5058_v9 = vld [vmem:[%s5563_s7 + $0x78] ss:$12 sps:$4 sm:$0xff]  }
  0x57   : > { %1440 = vmatprep.subr.bf16.mxu0 %v5050_v2  ;;  %v5056_v8 = vld [vmem:[%s5563_s7 + $0x7c] ss:$12 sps:$4 sm:$0xff]   ;;  %v5059_v10 = vld [vmem:[%s5563_s7 + $0x64] ss:$12 sps:$4 sm:$0xff]   ;;  %v5061_v11 = vld [vmem:[%s5563_s7 + $0x60] ss:$12 sps:$4 sm:$0xff]  }
  0x58   : > { %1441 = vmatpush1.bf16.msra.mxu0 %v5052_v3  ;;  %v5062_v12 = vld [vmem:[%s5563_s7 + $0x4c] ss:$12 sps:$4 sm:$0xff]   ;;  %v5074_v13 = vld [vmem:[%s5563_s7 + $0xb0] ss:$12 sps:$4 sm:$0xff]   ;;  %v5064_v15 = vld [vmem:[%s5563_s7 + $0x48] ss:$12 sps:$4 sm:$0xff]  }
  0x59   : > { %1442 = vmatprep.subr.bf16.mxu0 %v5053_v6  ;;  %4770 = vmatpush3.bf16.msra.mxu1 %v5074_v13  ;;  %v5075_v14 = vld [vmem:[%s5563_s7 + $0x98] ss:$12 sps:$4 sm:$0xff]   ;;  %v5065_v16 = vld [vmem:[%s5563_s7 + $0x34] ss:$12 sps:$4 sm:$0xff]   ;;  %v5067_v17 = vld [vmem:[%s5563_s7 + $0x30] ss:$12 sps:$4 sm:$0xff]  }
  0x5a   : > { %4771 = vmatprep.subr.bf16.mxu1 %v5343_v5  ;;  %v5068_v18 = vld [vmem:[%s5563_s7 + $0x1c] ss:$12 sps:$4 sm:$0xff]   ;;  %v5076_v19 = vld [vmem:[%s5563_s7 + $0x80] ss:$12 sps:$4 sm:$0xff]   ;;  %v5070_v21 = vld [vmem:[%s5563_s7 + $0x18] ss:$12 sps:$4 sm:$0xff]  }
  0x5b   : > { %v5077_v20 = vld [vmem:[%s5563_s7 + $0x68] ss:$12 sps:$4 sm:$0xff]   ;;  %v5071_v22 = vld [vmem:[%s5563_s7 + $0x4] ss:$12 sps:$4 sm:$0xff]   ;;  %v5073_v24 = vld [vmem:[%s5563_s7] ss:$12 sps:$4 sm:$0xff]  }
  0x5c   : > { %1443 = vmatpush1.bf16.msra.mxu0 %v5055_v7  ;;  %v5078_v23 = vld [vmem:[%s5563_s7 + $0x50] ss:$12 sps:$4 sm:$0xff]   ;;  %v5690_v25 = vld [vmem:[#allocation2] sm:$0xff]  ;;  %v5692_v26 = vld [vmem:[#allocation2 + $0x8] sm:$0xff]  ;;  %vm5344_vm0 = vmmov 0   ;;  %v5711_v32 = vshrl.u32 %v1234_v31, 7 }
  0x5d   : > { %1444 = vmatprep.subr.bf16.mxu0 %v5056_v8  ;;  %4772 = vmatpush3.bf16.msra.mxu1 %v5075_v14  ;;  %v5079_v27 = vld [vmem:[%s5563_s7 + $0x38] ss:$12 sps:$4 sm:$0xff]   ;;  %v1295_v28 = vpack.c.bf16 %v5692_v26, %v5690_v25  ;;  %v5080_v29 = vld [vmem:[%s5563_s7 + $0x20] ss:$12 sps:$4 sm:$0xff]   ;;  %v5081_v30 = vld [vmem:[%s5563_s7 + $0x8] ss:$12 sps:$4 sm:$0xff]  }
  0x5e   : > { %4773 = vmatprep.subr.bf16.mxu1 %v5343_v5  ;;  %4785 = vmatprep.mubr.msk.bf16.mxu1 %vm5344_vm0, %v5343_v5  ;;  %v5714_v33 = vsub.s32 1, %v5711_v32  ;;  %v1275_v35 = vld [vmem:[%s5572_s30] sm:$0x7]  ;;  %v5719_v40 = vsub.s32 0, %v5711_v32  ;;  %vm1526_vm1 = vcmask 261120   ;;  %v1307_v49 = vsub.s32 2, %v5711_v32 }
  0x5f   : > { %v1238_v58 = vand.u32 127, %v1234_v31  ;;  %v1236_v59 = vadd.s32 8, %v5711_v32  ;;  %vm1578_vm4 = vcmask 130048   ;;  %s5345_s16 = smov 96   ;;  %s5346_s17 = smov 32   ;;  %vm2051_vm5 = vcmask 523264  }
  0x60   : > { %1445 = vmatpush1.bf16.msra.mxu0 %v5058_v9  ;;  %v1304_v37 = vrot.slane %v1275_v35, %v5714_v33  ;;  %v1300_v44 = vrot.slane %v1275_v35, %v5719_v40  ;;  %v1308_v50 = vrot.slane %v1275_v35, %v1307_v49  ;;  %s5347_s18 = smov 64   ;;  %s6323_s19 = sld [smem:[#allocation13_spill]]  ;;  %vm2054_vm6 = vcmask 785408  }
  0x61   : > { %1446 = vmatprep.subr.bf16.mxu0 %v5059_v10  ;;  %4774 = vmatpush3.bf16.msra.mxu1 %v5076_v19  ;;  %vm1239_vm2 = vcmp.gt.s32.totalorder %v1238_v58, %v5711_v32  ;;  %vm1240_vm3 = vcmp.gt.s32.totalorder %v1238_v58, %v1236_v59  ;;  %s6324_s7 = sld [smem:[#allocation24_spill]]  ;;  %vm2565_vm7 = vcmask 1043456   ;;  %vm2537_vm8 = vcmask 64512  }
  0x62   : > { %4775 = vmatprep.subr.bf16.mxu1 %v5343_v5  ;;  %v5737_v61 = vsel %vm1239_vm2, -1e+09, %v5343_v5  ;;  %v5741_v2 = vsel %vm1240_vm3, -1e+09, %v5343_v5  ;;  %s6326_s20 = sld [smem:[#allocation11_spill]] }
  0x63   : > { %s6327_s11 = sld [smem:[#allocation25_spill]] }
  0x64   : > { %1447 = vmatpush1.bf16.msra.mxu0 %v5061_v11  ;;  %s6329_s23 = sld [smem:[#allocation26_spill]] }
  0x65   : > { %1448 = vmatprep.subr.bf16.mxu0 %v5062_v12  ;;  %4776 = vmatpush3.bf16.msra.mxu1 %v5077_v20  ;;  %s6332_s5 = sld [smem:[#allocation9_spill]] }
  0x66   : > { %4777 = vmatprep.subr.bf16.mxu1 %v5343_v5  ;;  %s6333_s10 = sld [smem:[#allocation17_spill]] }
  0x67   : > { %s6325_s8 = scalar_lea.vmem %s6324_s7, %s5526_s0  ;;  %s6340_s1 = sld [smem:[#allocation33_spill]] }
  0x68   : > { %1449 = vmatpush1.bf16.msra.mxu0 %v5064_v15  ;;  %s6345_s30 = sld [smem:[#allocation3_spill]] }
  0x69   : > { %1450 = vmatprep.subr.bf16.mxu0 %v5065_v16  ;;  %4778 = vmatpush3.bf16.msra.mxu1 %v5078_v23  ;;  %s6328_s3 = scalar_lea.vmem %s6327_s11, %s5526_s0 }
  0x6a   : > { %4779 = vmatprep.subr.bf16.mxu1 %v5343_v5  ;;  %s6330_s21 = scalar_lea.vmem %s6329_s23, %s5526_s0 }
  0x6c   : > { %1451 = vmatpush1.bf16.msra.mxu0 %v5067_v17  ;;  %s6334_s7 = scalar_lea.vmem %s6333_s10, %s6332_s5 }
  0x6d   : > { %1452 = vmatprep.subr.bf16.mxu0 %v5068_v18  ;;  %4780 = vmatpush3.bf16.msra.mxu1 %v5079_v27  ;;  %s6341_s23 = scalar_lea.vmem %s6340_s1, %s5526_s0 }
  0x6e   : > { %4781 = vmatprep.subr.bf16.mxu1 %v5343_v5  ;;  %p4622_p8 = scmp.ne.s32.totalorder %s6345_s30, 3 }
  0x70   : > { %1453 = vmatpush1.bf16.msra.mxu0 %v5070_v21 }
  0x71   : > { %1454 = vmatprep.subr.bf16.mxu0 %v5071_v22  ;;  %4782 = vmatpush3.bf16.msra.mxu1 %v5080_v29 }
  0x72   : > { %4783 = vmatprep.subr.bf16.mxu1 %v5343_v5 }
  0x74   : > { %1455 = vmatpush1.bf16.msra.mxu0 %v5073_v24 }
  0x75   : > { %4813 = vmatprep.subr.bf16.mxu0 %v5343_v5  ;;  %4784 = vmatpush3.bf16.msra.mxu1 %v5081_v30 }
  0x76   : > { %4789 = vmatprep.subr.bf16.mxu1 %v5343_v5 }
  0x77   : > { %1473 = vmatmul.mubr.bf16.vlgmr.msra.gmra.mxu0 %v1295_v28 }
  0x78   : > { %4815 = vmatprep.mubr.msk.bf16.mxu0 %vm5344_vm0, %v5343_v5  ;;  %4786 = vmatmul.mubr.bf16.vlgmr.msra.gmra.mxu1 %v1295_v28 }
  0x79   : > { %4791 = vmatprep.mubr.msk.bf16.mxu1 %vm5344_vm0, %v5343_v5 }
 0x137   : > { %v1474_v34 = vpop.f32.mrf.mxu0 }
 0x138   : > { %v1475_v47 = vadd.f32 %v1474_v34, %v1300_v44  ;;  %v1517_v51 = vpop.f32.mrf.mxu1 }
 0x139   : > { %v1476_v36 = vpop.f32.mrf.mxu0  ;;  %v1518_v53 = vadd.f32 %v1517_v51, %v1308_v50 }
 0x13a   : > { %v1477_v41 = vadd.f32 %v1476_v36, %v1304_v37  ;;  %v4787_v52 = vpop.f32.mrf.mxu1 }
 0x13b   : > { %v1478_v38 = vpop.f32.mrf.mxu0 }
 0x13c   : > { %v1479_v46 = vadd.f32 %v1478_v38, %v1300_v44  ;;  %v1520_v54 = vpop.f32.mrf.mxu1 }
 0x13d   : > { %v1480_v39 = vpop.f32.mrf.mxu0  ;;  %v1521_v55 = vadd.f32 %v1520_v54, %v1308_v50 }
 0x13e   : > { %v1481_v42 = vadd.f32 %v1480_v39, %v1304_v37  ;;  %v1524_v48 = vpack.c.bf16 %v1479_v46, %v1475_v47  ;;  %v4788_v56 = vpop.f32.mrf.mxu1 }
 0x13f   : > { %v5730_v57 = vpack.c.bf16 %v1521_v55, %v1518_v53 }
 0x140   : > { %v1525_v43 = vpack.c.bf16 %v1481_v42, %v1477_v41 }
 0x142   : > { %v1531_v45 = vsel %vm1526_vm1, %v1525_v43, 0 }
 0x143   : > { %4790 = vmatpush3.bf16.xpose.msra.mxu1 %v1531_v45 }
 0x144   : > { %4795 = vmatprep.subr.bf16.mxu1 %v5343_v5 }
 0x14a   : > { %4792 = vmatmul.mubr.msk.bf16.vlgmr.msra.gmra.mxu1 %vm1526_vm1, %v1524_v48 }
 0x14b   : > { %4797 = vmatprep.mubr.msk.bf16.mxu1 %vm5344_vm0, %v5343_v5  ;;  %4796 = vmatpush3.bf16.msra.mxu1 %v5730_v57 }
 0x14c   : > { %4801 = vmatprep.subr.bf16.mxu1 %v5343_v5 }
 0x20a   : > { %v1567_v60 = vpop.f32.mrf.mxu1 }
 0x20b   : > { %v1574_v62 = vmul.f32 0.17677669, %v1567_v60 }
 0x20c   : > { %v4793_v63 = vpop.f32.mrf.mxu1 }
 0x20d   : > { %v1576_v0 = vadd.f32 %v1574_v62, %v5737_v61 }
 0x20e   : > { %v1570_v1 = vpop.f32.mrf.mxu1 }
 0x20f   : > { %v1575_v3 = vmul.f32 0.17677669, %v1570_v1  ;;  %v1579_v6 = vsel %vm1578_vm4, %v1576_v0, -inf }
 0x210   : > { %1580 = vmax.xlane.f32.xlu0 %v1579_v6  ;;  %v4794_v7 = vpop.f32.mrf.mxu1 }
 0x211   : > { %v1577_v8 = vadd.f32 %v1575_v3, %v5741_v2 }
 0x213   : > { %v1582_v9 = vsel %vm1578_vm4, %v1577_v8, -inf }
 0x214   : > { %1583 = vmax.xlane.f32.xlu0 %v1582_v9 }
 0x22a   : > { %1651 = vrot.lane.b32.xlu0 %v1525_v43, %s5345_s16 }
 0x22e   : > { %1902 = vrot.lane.b32.xlu0 %v1525_v43, %s5346_s17 }
 0x299   : > { %v1581_v10 = vpop.xlane.xlu0 %1580 }
 0x29a   : > { %v1585_v11 = vsub.f32 %v1576_v0, %v1581_v10 }
 0x29c   : > { %v1587_v12 = vmul.f32 1.442695, %v1585_v11 }
 0x29d   : > { %v1584_v13 = vpop.xlane.xlu0 %1583 }
 0x29e   : > { %5210 = vpow2.f32 %v1587_v12  ;;  %v1586_v14 = vsub.f32 %v1577_v8, %v1584_v13 }
 0x2a0   : > { %v1589_v15 = vmul.f32 1.442695, %v1586_v14 }
 0x2a1   : > { %v1652_v23 = vpop.permute.xlu0 %1651 }
 0x2a2   : > { %5212 = vpow2.f32 %v1589_v15  ;;  %v1657_v38 = vsel %vm1526_vm1, %v1652_v23, 0 }
 0x2a5   : > { %v1903_v30 = vpop.permute.xlu0 %1902 }
 0x2a6   : > { %v1908_v36 = vsel %vm1526_vm1, %v1903_v30, 0 }
 0x2ab   : > { %v5211_v16 = vpop.eup %5210 }
 0x2ac   : > { %v1591_v17 = vsel %vm1578_vm4, %v5211_v16, 0.0 }
 0x2ad   : > { %1592 = vadd.xlane.f32.xlu1 %v1591_v17 }
 0x2af   : > { %v5213_v18 = vpop.eup %5212 }
 0x2b0   : > { %v1594_v19 = vsel %vm1578_vm4, %v5213_v18, 0.0 }
 0x2b1   : > { %1595 = vadd.xlane.f32.xlu1 %v1594_v19 }
 0x2c2   : > { %1648 = vrot.lane.b32.xlu1 %v1524_v48, %s5345_s16 }
 0x2c6   : > { %1777 = vrot.lane.b32.xlu1 %v1525_v43, %s5347_s18 }
 0x2ca   : > { %1775 = vrot.lane.b32.xlu1 %v1524_v48, %s5347_s18 }
 0x2ce   : > { %1900 = vrot.lane.b32.xlu1 %v1524_v48, %s5346_s17 }
 0x336   : > { %v1593_v20 = vpop.xlane.xlu1 %1592 }
 0x337   : > { %5214 = vrcp.f32 %v1593_v20 }
 0x33a   : > { %v1596_v21 = vpop.xlane.xlu1 %1595 }
 0x33b   : > { %5216 = vrcp.f32 %v1596_v21 }
 0x33e   : > { %v1649_v22 = vpop.permute.xlu1 %1648 }
 0x342   : > { %v1778_v24 = vpop.permute.xlu1 %1777 }
 0x343   : > { %v1783_v27 = vsel %vm1526_vm1, %v1778_v24, 0 }
 0x344   : > { %4814 = vmatpush3.bf16.xpose.msra.mxu0 %v1783_v27  ;;  %v5215_v28 = vpop.eup %5214 }
 0x345   : > { %4825 = vmatprep.subr.bf16.mxu0 %v5343_v5  ;;  %v1599_v31 = vmul.f32 %v5215_v28, %v5211_v16 }
 0x346   : > { %v1776_v35 = vpop.permute.xlu1 %1775 }
 0x348   : > { %v5217_v29 = vpop.eup %5216 }
 0x349   : > { %v1600_v34 = vmul.f32 %v5217_v29, %v5213_v18 }
 0x34a   : > { %v1901_v39 = vpop.permute.xlu1 %1900 }
 0x34b   : > { %4816 = vmatmul.mubr.msk.bf16.vlgmr.msra.gmra.mxu0 %vm1526_vm1, %v1776_v35  ;;  %v1601_v37 = vpack.c.bf16 %v1600_v34, %v1599_v31 }
 0x34c   : > { %4826 = vmatpush3.bf16.xpose.msra.mxu0 %v1908_v36  ;;  %4827 = vmatprep.mubr.msk.bf16.mxu0 %vm5344_vm0, %v5343_v5 }
 0x34d   : > { %4798 = vmatmul.mubr.msk.bf16.vlgmr.msra.gmra.mxu1 %vm1578_vm4, %v1601_v37  ;;  %4837 = vmatprep.subr.bf16.mxu0 %v5343_v5 }
 0x34e   : > { %4802 = vmatpush3.bf16.xpose.msra.mxu1 %v1657_v38  ;;  %4803 = vmatprep.mubr.msk.bf16.mxu1 %vm5344_vm0, %v5343_v5 }
 0x34f   : > { %4807 = vmatprep.subr.bf16.mxu1 %v5343_v5 }
 0x353   : > { %4828 = vmatmul.mubr.msk.bf16.vlgmr.msra.gmra.mxu0 %vm1526_vm1, %v1901_v39 }
 0x354   : > { %4853 = vmatprep.mubr.msk.bf16.mxu0 %vm5344_vm0, %v5343_v5 }
 0x355   : > { %4804 = vmatmul.mubr.msk.bf16.vlgmr.msra.gmra.mxu1 %vm1526_vm1, %v1649_v22 }
 0x356   : > { %4809 = vmatprep.mubr.msk.bf16.mxu1 %vm5344_vm0, %v5343_v5 }
 0x40b   : > { %v1819_v41 = vpop.f32.mrf.mxu0 }
 0x40c   : > { %v1826_v51 = vmul.f32 0.17677669, %v1819_v41 }
 0x40d   : > { %v5772_v42 = vpop.f32.mrf.mxu1  ;;  %v4817_v43 = vpop.f32.mrf.mxu0 }
 0x40e   : > { %v1828_v63 = vadd.f32 %v1826_v51, %v5737_v61 }
 0x40f   : > { %v4799_v44 = vpop.f32.mrf.mxu1  ;;  %v1822_v45 = vpop.f32.mrf.mxu0 }
 0x410   : > { %v1827_v59 = vmul.f32 0.17677669, %v1822_v45  ;;  %v1830_v8 = vsel %vm1578_vm4, %v1828_v63, -inf }
 0x411   : > { %v5774_v46 = vpop.f32.mrf.mxu1  ;;  %v4818_v47 = vpop.f32.mrf.mxu0 }
 0x412   : > { %v1829_v11 = vadd.f32 %v1827_v59, %v5741_v2 }
 0x413   : > { %v4800_v48 = vpop.f32.mrf.mxu1  ;;  %v1944_v50 = vpop.f32.mrf.mxu0 }
 0x414   : > { %v1951_v9 = vmul.f32 0.17677669, %v1944_v50  ;;  %v1833_v13 = vsel %vm1578_vm4, %v1829_v11, -inf }
 0x415   : > { %v1693_v52 = vpop.f32.mrf.mxu1  ;;  %v4829_v53 = vpop.f32.mrf.mxu0 }
 0x416   : > { %v1700_v54 = vmul.f32 0.17677669, %v1693_v52  ;;  %v1953_v15 = vadd.f32 %v1951_v9, %v5737_v61 }
 0x417   : > { %v4805_v55 = vpop.f32.mrf.mxu1  ;;  %v1947_v56 = vpop.f32.mrf.mxu0 }
 0x418   : > { %v1702_v58 = vadd.f32 %v1700_v54, %v5737_v61  ;;  %v1952_v0 = vmul.f32 0.17677669, %v1947_v56  ;;  %v1955_v16 = vsel %vm1578_vm4, %v1953_v15, -inf }
 0x419   : > { %v1696_v60 = vpop.f32.mrf.mxu1  ;;  %v4830_v62 = vpop.f32.mrf.mxu0 }
 0x41a   : > { %v1701_v1 = vmul.f32 0.17677669, %v1696_v60  ;;  %v1704_v3 = vsel %vm1578_vm4, %v1702_v58, -inf  ;;  %v1954_v12 = vadd.f32 %v1952_v0, %v5741_v2 }
 0x41b   : > { %1705 = vmax.xlane.f32.xlu0 %v1704_v3  ;;  %v4806_v6 = vpop.f32.mrf.mxu1 }
 0x41c   : > { %v1703_v7 = vadd.f32 %v1701_v1, %v5741_v2  ;;  %v1958_v14 = vsel %vm1578_vm4, %v1954_v12, -inf }
 0x41e   : > { %v1707_v10 = vsel %vm1578_vm4, %v1703_v7, -inf }
 0x41f   : > { %1831 = vmax.xlane.f32.xlu0 %v1830_v8  ;;  %1708 = vmax.xlane.f32.xlu1 %v1707_v10 }
 0x423   : > { %1834 = vmax.xlane.f32.xlu0 %v1833_v13  ;;  %1959 = vmax.xlane.f32.xlu1 %v1958_v14 }
 0x427   : > { %1956 = vmax.xlane.f32.xlu0 %v1955_v16 }
 0x4a4   : > { %v1706_v17 = vpop.xlane.xlu0 %1705 }
 0x4a5   : > { %v1710_v27 = vsub.f32 %v1702_v58, %v1706_v17  ;;  %v5082_v17 = vld [vmem:[%s6323_s19 + $0x38] sm:$0xff]  }
 0x4a6   : > { %4838 = vmatpush3.bf16.msra.mxu0 %v5082_v17 }
 0x4a7   : > { %v1712_v34 = vmul.f32 1.442695, %v1710_v27  ;;  %4839 = vmatprep.subr.bf16.mxu0 %v5343_v5 }
 0x4a8   : > { %v1832_v18 = vpop.xlane.xlu0 %1831  ;;  %v1709_v19 = vpop.xlane.xlu1 %1708 }
 0x4a9   : > { %v1836_v20 = vsub.f32 %v1828_v63, %v1832_v18  ;;  %v1711_v28 = vsub.f32 %v1703_v7, %v1709_v19  ;;  %v5083_v18 = vld [vmem:[%s6323_s19 + $0x30] sm:$0xff]   ;;  %v5084_v19 = vld [vmem:[%s6323_s19 + $0x28] sm:$0xff]  }
 0x4aa   : > { %4840 = vmatpush3.bf16.msra.mxu0 %v5083_v18 }
 0x4ab   : > { %v1838_v21 = vmul.f32 1.442695, %v1836_v20  ;;  %v1714_v35 = vmul.f32 1.442695, %v1711_v28  ;;  %4841 = vmatprep.subr.bf16.mxu0 %v5343_v5  ;;  %v5085_v20 = vld [vmem:[%s6323_s19 + $0x20] sm:$0xff]   ;;  %v5088_v28 = vld [vmem:[%s6323_s19 + $0x8] sm:$0xff]  }
 0x4ac   : > { %v1835_v22 = vpop.xlane.xlu0 %1834  ;;  %v1960_v2 = vpop.xlane.xlu1 %1959 }
 0x4ad   : > { %5218 = vpow2.f32 %v1838_v21  ;;  %v1837_v23 = vsub.f32 %v1829_v11, %v1835_v22  ;;  %v1962_v24 = vsub.f32 %v1954_v12, %v1960_v2  ;;  %v5086_v21 = vld [vmem:[%s6323_s19 + $0x18] sm:$0xff]  }
 0x4ae   : > { %4842 = vmatpush3.bf16.msra.mxu0 %v5084_v19 }
 0x4af   : > { %v1840_v29 = vmul.f32 1.442695, %v1837_v23  ;;  %v1965_v30 = vmul.f32 1.442695, %v1962_v24  ;;  %4843 = vmatprep.subr.bf16.mxu0 %v5343_v5  ;;  %v5087_v23 = vld [vmem:[%s6323_s19 + $0x10] sm:$0xff]  }
 0x4b0   : > { %v1957_v61 = vpop.xlane.xlu0 %1956 }
 0x4b1   : > { %5220 = vpow2.f32 %v1840_v29  ;;  %v1961_v31 = vsub.f32 %v1953_v15, %v1957_v61 }
 0x4b2   : > { %5222 = vpow2.f32 %v1965_v30  ;;  %4844 = vmatpush3.bf16.msra.mxu0 %v5085_v20 }
 0x4b3   : > { %v1963_v36 = vmul.f32 1.442695, %v1961_v31  ;;  %4845 = vmatprep.subr.bf16.mxu0 %v5343_v5  ;;  %v5089_v31 = vld [vmem:[%s6323_s19] sm:$0xff]  }
 0x4b5   : > { %5224 = vpow2.f32 %v1963_v36 }
 0x4b6   : > { %5226 = vpow2.f32 %v1712_v34  ;;  %4846 = vmatpush3.bf16.msra.mxu0 %v5086_v21 }
 0x4b7   : > { %5228 = vpow2.f32 %v1714_v35  ;;  %4847 = vmatprep.subr.bf16.mxu0 %v5343_v5 }
 0x4ba   : > { %v5219_v37 = vpop.eup %5218  ;;  %4848 = vmatpush3.bf16.msra.mxu0 %v5087_v23  ;;  %v5103_v23 = vld [vmem:[%s5585_s25 + $0x30] sm:$0xff]  }
 0x4bb   : > { %v1842_v38 = vsel %vm1578_vm4, %v5219_v37, 0.0  ;;  %4849 = vmatprep.subr.bf16.mxu0 %v5343_v5 }
 0x4bc   : > { %1843 = vadd.xlane.f32.xlu0 %v1842_v38 }
 0x4be   : > { %v5221_v39 = vpop.eup %5220  ;;  %4850 = vmatpush3.bf16.msra.mxu0 %v5088_v28  ;;  %v5107_v28 = vld [vmem:[%s5585_s25 + $0x28] sm:$0xff]  }
 0x4bf   : > { %v1845_v41 = vsel %vm1578_vm4, %v5221_v39, 0.0  ;;  %v5223_v43 = vpop.eup %5222  ;;  %4851 = vmatprep.subr.bf16.mxu0 %v5343_v5 }
 0x4c0   : > { %1846 = vadd.xlane.f32.xlu1 %v1845_v41  ;;  %v1970_v48 = vsel %vm1578_vm4, %v5223_v43, 0.0 }
 0x4c2   : > { %v5225_v44 = vpop.eup %5224  ;;  %4852 = vmatpush3.bf16.msra.mxu0 %v5089_v31  ;;  %v5114_v31 = vld [vmem:[%s5595_s2 + $0x14] ss:$8 sps:$4 sm:$0xff]  }
 0x4c3   : > { %v5227_v45 = vpop.eup %5226  ;;  %v1967_v47 = vsel %vm1578_vm4, %v5225_v44, 0.0 }
 0x4c4   : > { %v5229_v50 = vpop.eup %5228  ;;  %1968 = vadd.xlane.f32.xlu0 %v1967_v47  ;;  %1971 = vadd.xlane.f32.xlu1 %v1970_v48  ;;  %v1716_v51 = vsel %vm1578_vm4, %v5227_v45, 0.0 }
 0x4c5   : > { %v1719_v52 = vsel %vm1578_vm4, %v5229_v50, 0.0 }
 0x4c8   : > { %1717 = vadd.xlane.f32.xlu0 %v1716_v51  ;;  %1720 = vadd.xlane.f32.xlu1 %v1719_v52 }
 0x4d9   : > { %1853 = vrot.lane.b32.xlu1 %v5730_v57, %s5347_s18 }
 0x4dd   : > { %1978 = vrot.lane.b32.xlu1 %v5730_v57, %s5346_s17 }
 0x4de   : > { %1728 = vrot.lane.b32.xlu0 %v5730_v57, %s5345_s16 }
 0x545   : > { %v1844_v53 = vpop.xlane.xlu0 %1843 }
 0x549   : > { %v1847_v54 = vpop.xlane.xlu1 %1846 }
 0x54d   : > { %v1969_v55 = vpop.xlane.xlu0 %1968  ;;  %v1972_v56 = vpop.xlane.xlu1 %1971 }
 0x551   : > { %v1718_v58 = vpop.xlane.xlu0 %1717  ;;  %v1721_v59 = vpop.xlane.xlu1 %1720 }
 0x552   : > { %5230 = vrcp.f32 %v1718_v58 }
 0x553   : > { %5232 = vrcp.f32 %v1721_v59 }
 0x554   : > { %5234 = vrcp.f32 %v1847_v54 }
 0x555   : > { %v1729_v60 = vpop.permute.xlu0 %1728  ;;  %5236 = vrcp.f32 %v1844_v53  ;;  %v1854_v6 = vpop.permute.xlu1 %1853 }
 0x556   : > { %4808 = vmatpush3.bf16.msra.mxu1 %v1729_v60  ;;  %5238 = vrcp.f32 %v1969_v55 }
 0x557   : > { %4819 = vmatprep.subr.bf16.mxu1 %v5343_v5  ;;  %5240 = vrcp.f32 %v1972_v56 }
 0x559   : > { %v1979_v13 = vpop.permute.xlu1 %1978 }
 0x55f   : > { %v5231_v62 = vpop.eup %5230 }
 0x560   : > { %v5233_v63 = vpop.eup %5232  ;;  %v1724_v0 = vmul.f32 %v5231_v62, %v5227_v45 }
 0x561   : > { %v1725_v57 = vmul.f32 %v5233_v63, %v5229_v50  ;;  %v5235_v3 = vpop.eup %5234 }
 0x562   : > { %v5237_v7 = vpop.eup %5236  ;;  %v1851_v8 = vmul.f32 %v5235_v3, %v5221_v39 }
 0x563   : > { %v1726_v1 = vpack.c.bf16 %v1725_v57, %v1724_v0  ;;  %v1850_v9 = vmul.f32 %v5237_v7, %v5219_v37  ;;  %v5239_v10 = vpop.eup %5238 }
 0x564   : > { %v5241_v12 = vpop.eup %5240  ;;  %v1975_v14 = vmul.f32 %v5239_v10, %v5225_v44  ;;  %v5092_v10 = vld [vmem:[%s5595_s2 + $0x74] ss:$8 sps:$4 sm:$0xff]  }
 0x565   : > { %4810 = vmatmul.mubr.msk.bf16.vlgmr.msra.gmra.mxu1 %vm1578_vm4, %v1726_v1  ;;  %v1852_v11 = vpack.c.bf16 %v1851_v8, %v1850_v9  ;;  %v1976_v15 = vmul.f32 %v5241_v12, %v5223_v43  ;;  %v5090_v9 = vld [vmem:[%s5595_s2 + $0x70] ss:$8 sps:$4 sm:$0xff]   ;;  %2437 = vmatprep.subr.bf16.mxu0 %v5092_v10 }
 0x566   : > { %4820 = vmatpush3.bf16.msra.mxu1 %v1854_v6  ;;  %4821 = vmatprep.mubr.msk.bf16.mxu1 %vm5344_vm0, %v5343_v5  ;;  %v5099_v12 = vld [vmem:[%s5585_s25 + $0x38] sm:$0xff]  }
 0x567   : > { %4831 = vmatprep.subr.bf16.mxu1 %v5343_v5  ;;  %v1977_v16 = vpack.c.bf16 %v1976_v15, %v1975_v14  ;;  %v5098_v14 = vld [vmem:[%s5595_s2 + $0x54] ss:$8 sps:$4 sm:$0xff]  }
 0x56d   : > { %4822 = vmatmul.mubr.msk.bf16.vlgmr.msra.gmra.mxu1 %vm1578_vm4, %v1852_v11  ;;  %v5095_v11 = vld [vmem:[%s5595_s2 + $0x64] ss:$8 sps:$4 sm:$0xff]  }
 0x56e   : > { %4832 = vmatpush3.bf16.msra.mxu1 %v1979_v13  ;;  %4833 = vmatprep.mubr.msk.bf16.mxu1 %vm5344_vm0, %v5343_v5  ;;  %v5093_v13 = vld [vmem:[%s5595_s2 + $0x60] ss:$8 sps:$4 sm:$0xff]  }
 0x56f   : > { %4857 = vmatprep.subr.bf16.mxu1 %v5343_v5 }
 0x575   : > { %4834 = vmatmul.mubr.msk.bf16.vlgmr.msra.gmra.mxu1 %vm1578_vm4, %v1977_v16 }
 0x576   : > { %4873 = vmatprep.mubr.msk.bf16.mxu1 %vm5344_vm0, %v5343_v5  ;;  %4858 = vmatpush3.bf16.msra.mxu1 %v5099_v12 }
 0x577   : > { %4859 = vmatprep.subr.bf16.mxu1 %v5343_v5 }
 0x57a   : > { %4860 = vmatpush3.bf16.msra.mxu1 %v5103_v23 }
 0x57b   : > { %4861 = vmatprep.subr.bf16.mxu1 %v5343_v5 }
 0x57e   : > { %4862 = vmatpush3.bf16.msra.mxu1 %v5107_v28 }
 0x57f   : > { %4863 = vmatprep.subr.bf16.mxu1 %v5343_v5 }
 0x625   : > { %v1768_v22 = vpop.f32.mrf.mxu1 }
 0x627   : > { %v4811_v2 = vpop.f32.mrf.mxu1 }
 0x628   : > { %v5100_v2 = vld [vmem:[%s5595_s2 + $0x40] ss:$8 sps:$4 sm:$0xff]  }
 0x629   : > { %v1771_v24 = vpop.f32.mrf.mxu1 }
 0x62a   : > { %v5020_v27 = vpack.i.bf16 %v1771_v24, %v1768_v22  ;;  %v5102_v22 = vld [vmem:[%s5595_s2 + $0x44] ss:$8 sps:$4 sm:$0xff]   ;;  %v5106_v24 = vld [vmem:[%s5595_s2 + $0x34] ss:$8 sps:$4 sm:$0xff]  }
 0x62b   : > { %v4812_v29 = vpop.f32.mrf.mxu1 }
 0x62c   : > { %5021 = vrot.lane.b32.xlu1 %v5020_v27, %s5346_s17  ;;  %v5104_v27 = vld [vmem:[%s5595_s2 + $0x30] ss:$8 sps:$4 sm:$0xff]   ;;  %v5110_v29 = vld [vmem:[%s5595_s2 + $0x24] ss:$8 sps:$4 sm:$0xff]  }
 0x62d   : > { %v1893_v30 = vpop.f32.mrf.mxu1 }
 0x62f   : > { %v4823_v61 = vpop.f32.mrf.mxu1 }
 0x630   : > { %v5111_v61 = vld [vmem:[%s5585_s25 + $0x20] sm:$0xff]  }
 0x631   : > { %v1896_v34 = vpop.f32.mrf.mxu1  ;;  %4864 = vmatpush3.bf16.msra.mxu1 %v5111_v61 }
 0x632   : > { %v5025_v35 = vpack.i.bf16 %v1896_v34, %v1893_v30  ;;  %v5108_v30 = vld [vmem:[%s5595_s2 + $0x20] ss:$8 sps:$4 sm:$0xff]   ;;  %v5112_v34 = vld [vmem:[%s5595_s2 + $0x10] ss:$8 sps:$4 sm:$0xff]   ;;  %4865 = vmatprep.subr.bf16.mxu1 %v5343_v5 }
 0x633   : > { %v4824_v36 = vpop.f32.mrf.mxu1 }
 0x634   : > { %5026 = vrot.lane.b32.xlu0 %v5025_v35, %s5347_s18  ;;  %v5118_v35 = vld [vmem:[%s5595_s2 + $0x4] ss:$8 sps:$4 sm:$0xff]   ;;  %v5115_v36 = vld [vmem:[%s5585_s25 + $0x18] sm:$0xff]  }
 0x635   : > { %v2018_v37 = vpop.f32.mrf.mxu1  ;;  %4866 = vmatpush3.bf16.msra.mxu1 %v5115_v36 }
 0x636   : > { %4867 = vmatprep.subr.bf16.mxu1 %v5343_v5 }
 0x637   : > { %v4835_v38 = vpop.f32.mrf.mxu1 }
 0x638   : > { %v2194_v38 = vld [vmem:[%s6326_s20] sm:$0xff] }
 0x639   : > { %v2021_v39 = vpop.f32.mrf.mxu1 }
 0x63a   : > { %v5030_v41 = vpack.i.bf16 %v2021_v39, %v2018_v37  ;;  %v5116_v37 = vld [vmem:[%s5595_s2] ss:$8 sps:$4 sm:$0xff]   ;;  %v5119_v39 = vld [vmem:[%s5585_s25 + $0x10] sm:$0xff]  }
 0x63b   : > { %v4836_v43 = vpop.f32.mrf.mxu1  ;;  %4868 = vmatpush3.bf16.msra.mxu1 %v5119_v39 }
 0x63c   : > { %5031 = vrot.lane.b32.xlu1 %v5030_v41, %s5345_s16  ;;  %v2345_v41 = vpack.c.bf16 %v2194_v38, %v2194_v38  ;;  %v5120_v43 = vld [vmem:[%s5585_s25 + $0x8] sm:$0xff]   ;;  %4869 = vmatprep.subr.bf16.mxu1 %v5343_v5 }
 0x63f   : > { %4870 = vmatpush3.bf16.msra.mxu1 %v5120_v43 }
 0x640   : > { %4871 = vmatprep.subr.bf16.mxu1 %v5343_v5 }
 0x69e   : > { %v5022_v44 = vpop.permute.xlu1 %5021 }
 0x69f   : > { %v5024_v47 = vunpack.i.h.bf16 %v5022_v44  ;;  %v5023_v48 = vunpack.i.l.bf16 %v5022_v44  ;;  %v5121_v44 = vld [vmem:[%s5585_s25] sm:$0xff]   ;;  %s6338_s25 = sld [smem:[#allocation32_spill]] }
 0x6a0   : > { %4872 = vmatpush3.bf16.msra.mxu1 %v5121_v44 }
 0x6a1   : > { %v2050_v53 = vsel %vm1526_vm1, %v5774_v46, %v5024_v47  ;;  %v2049_v54 = vsel %vm1526_vm1, %v5772_v42, %v5023_v48  ;;  %v4499_v42 = vld [vmem:[%s6325_s8] ss:$0 sm:$0xff]  ;;  %4877 = vmatprep.subr.bf16.mxu1 %v5343_v5 }
 0x6a5   : > { %s6339_s11 = scalar_lea.vmem %s6338_s25, %s5526_s0 }
 0x6a6   : > { %v5027_v45 = vpop.permute.xlu0 %5026 }
 0x6a7   : > { %v5029_v50 = vunpack.i.h.bf16 %v5027_v45  ;;  %v5028_v51 = vunpack.i.l.bf16 %v5027_v45 }
 0x6a9   : > { %v2053_v58 = vsel %vm2051_vm5, %v2050_v53, %v5029_v50  ;;  %v2052_v59 = vsel %vm2051_vm5, %v2049_v54, %v5028_v51 }
 0x6ae   : > { %v5032_v52 = vpop.permute.xlu1 %5031 }
 0x6af   : > { %v5034_v55 = vunpack.i.h.bf16 %v5032_v52  ;;  %v5033_v56 = vunpack.i.l.bf16 %v5032_v52 }
 0x6b1   : > { %v2056_v60 = vsel %vm2054_vm6, %v2053_v58, %v5034_v55  ;;  %v2055_v62 = vsel %vm2054_vm6, %v2052_v59, %v5033_v56  ;;  %v4508_v55 = vld [vmem:[%s6328_s3] ss:$0 sm:$0xff] }
 0x6b2   : > { %v2057_v63 = vpack.c.bf16 %v2056_v60, %v2055_v62  ;;  %v4509_v60 = vld [vmem:[%s6330_s21] ss:$0 sm:$0xff]  ;;  %s6348_s21 = sld [smem:[#allocation20_spill]] (!%p4622_p8) }
 0x6b4   : > { %4854 = vmatmul.mubr.bf16.vlgmr.msra.gmra.mxu0 %v2057_v63 }
 0x6b5   : > { %2469 = vmatprep.mubr.bf16.mxu0 %v5342_v4  ;;  %2438 = vmatpush1.bf16.msra.mxu0 %v5090_v9 }
 0x6b6   : > { %2439 = vmatprep.subr.bf16.mxu0 %v5095_v11 }
 0x6b9   : > { %2440 = vmatpush1.bf16.msra.mxu0 %v5093_v13 }
 0x6ba   : > { %2441 = vmatprep.subr.bf16.mxu0 %v5098_v14 }
 0x774   : > { %v2146_v46 = vpop.f32.mrf.mxu0 }
 0x775   : > { %v2147_v0 = vadd.f32 %v4499_v42, %v2146_v46 }
 0x776   : > { %v4855_v57 = vpop.f32.mrf.mxu0 }
 0x777   : > { %v2153_v1 = vadd.f32 %v2147_v0, %v5690_v25  ;;  %v5096_v25 = vld [vmem:[%s5595_s2 + $0x50] ss:$8 sps:$4 sm:$0xff]   ;;  %v2228_v0 = vld [vmem:[%s5601_s28] sm:$0x3]  ;;  %s6331_s28 = scalar_lea.vmem %s6233_s13, %s5526_s0 }
 0x778   : > { %v2149_v3 = vpop.f32.mrf.mxu0  ;;  %2442 = vmatpush1.bf16.msra.mxu0 %v5096_v25  ;;  %v2350_v57 = vrot.slane %v2228_v0, %v5719_v40  ;;  %v4510_v14 = vld [vmem:[%s6331_s28] ss:$0 sm:$0xff] }
 0x779   : > { %v2150_v6 = vadd.f32 %v4499_v42, %v2149_v3  ;;  %2155 = vadd.xlane.f32.xlu0 %v2153_v1  ;;  %2443 = vmatprep.subr.bf16.mxu0 %v5102_v22  ;;  %v5928_v22 = vld [vmem:[%s6334_s7] ss:$0 sm:$0xff] }
 0x77a   : > { %v4856_v7 = vpop.f32.mrf.mxu0 }
 0x77b   : > { %v2154_v8 = vadd.f32 %v2150_v6, %v5692_v26 }
 0x77c   : > { %2444 = vmatpush1.bf16.msra.mxu0 %v5100_v2 }
 0x77d   : > { %2157 = vadd.xlane.f32.xlu1 %v2154_v8  ;;  %2445 = vmatprep.subr.bf16.mxu0 %v5106_v24 }
 0x780   : > { %2446 = vmatpush1.bf16.msra.mxu0 %v5104_v27 }
 0x781   : > { %2447 = vmatprep.subr.bf16.mxu0 %v5110_v29 }
 0x784   : > { %2448 = vmatpush1.bf16.msra.mxu0 %v5108_v30 }
 0x785   : > { %2449 = vmatprep.subr.bf16.mxu0 %v5114_v31 }
 0x788   : > { %2450 = vmatpush1.bf16.msra.mxu0 %v5112_v34 }
 0x789   : > { %2451 = vmatprep.subr.bf16.mxu0 %v5118_v35 }
 0x78c   : > { %2452 = vmatpush1.bf16.msra.mxu0 %v5116_v37 }
 0x78d   : > { %4901 = vmatprep.subr.bf16.mxu0 %v5343_v5 }
 0x78f   : > { %2470 = vmatmul.mubr.bf16.vlgmr.msra.gmra.mxu0 %v2345_v41 }
 0x790   : > { %4903 = vmatprep.mubr.msk.bf16.mxu0 %vm5344_vm0, %v5343_v5 }
 0x802   : > { %v2156_v26 = vpop.xlane.xlu0 %2155 }
 0x803   : > { %v2160_v15 = vmul.f32 0.0078125, %v2156_v26 }
 0x805   : > { %v5854_v16 = vsub.f32 %v2153_v1, %v2160_v15  ;;  %v2354_v1 = vrot.slane %v2228_v0, %v5714_v33 }
 0x806   : > { %v2158_v17 = vpop.xlane.xlu1 %2157 }
 0x807   : > { %v2161_v18 = vmul.f32 0.0078125, %v2158_v17  ;;  %v2164_v19 = vmul.f32 %v5854_v16, %v5854_v16 }
 0x809   : > { %v2163_v20 = vsub.f32 %v2154_v8, %v2161_v18  ;;  %2166 = vadd.xlane.f32.xlu0 %v2164_v19 }
 0x80b   : > { %v2165_v21 = vmul.f32 %v2163_v20, %v2163_v20 }
 0x80d   : > { %2168 = vadd.xlane.f32.xlu0 %v2165_v21 }
 0x84f   : > { %v2471_v3 = vpop.f32.mrf.mxu0 }
 0x850   : > { %v2472_v6 = vadd.f32 %v2471_v3, %v2350_v57 }
 0x851   : > { %v2473_v7 = vpop.f32.mrf.mxu0 }
 0x852   : > { %v2474_v8 = vadd.f32 %v2473_v7, %v2354_v1  ;;  %v2479_v10 = vpack.c.bf16 %v2472_v6, %v2472_v6 }
 0x853   : > { %v2475_v9 = vpop.f32.mrf.mxu0 }
 0x854   : > { %v2484_v12 = vsel %vm1526_vm1, %v2479_v10, 0  ;;  %v5915_v15 = vpack.c.bf16 %v2474_v8, %v2474_v8 }
 0x855   : > { %v2476_v11 = vpop.f32.mrf.mxu0 }
 0x892   : > { %v2167_v45 = vpop.xlane.xlu0 %2166 }
 0x893   : > { %v2170_v47 = vmul.f32 0.0078125, %v2167_v45 }
 0x895   : > { %v2172_v48 = vadd.f32 1e-05, %v2170_v47 }
 0x896   : > { %v2169_v50 = vpop.xlane.xlu0 %2168 }
 0x897   : > { %5242 = vrsqrt.f32 %v2172_v48  ;;  %v2171_v51 = vmul.f32 0.0078125, %v2169_v50 }
 0x899   : > { %v2173_v52 = vadd.f32 1e-05, %v2171_v51 }
 0x89b   : > { %5244 = vrsqrt.f32 %v2173_v52 }
 0x8a4   : > { %v5243_v53 = vpop.eup %5242 }
 0x8a5   : > { %v2176_v54 = vmul.f32 %v5243_v53, %v5854_v16 }
 0x8a7   : > { %v2184_v59 = vmul.f32 %v4508_v55, %v2176_v54 }
 0x8a8   : > { %v5245_v56 = vpop.eup %5244 }
 0x8a9   : > { %v2177_v58 = vmul.f32 %v5245_v56, %v2163_v20  ;;  %v5897_v63 = vadd.f32 %v4509_v60, %v2184_v59  ;;  %v2567_v20 = vsel %vm2565_vm7, %v5915_v15, 0 }
 0x8ab   : > { %v2185_v62 = vmul.f32 %v4508_v55, %v2177_v58 }
 0x8ad   : > { %v5899_v42 = vadd.f32 %v4509_v60, %v2185_v62 }
 0x8af   : > { %v2249_v46 = vpack.c.bf16 %v5899_v42, %v5897_v63 }
 0x8b1   : > { %4874 = vmatmul.mubr.bf16.vlgmr.msra.gmra.mxu1 %v2249_v46 }
 0x8b2   : > { %4879 = vmatprep.mubr.msk.bf16.mxu1 %vm5344_vm0, %v5343_v5  ;;  %4878 = vmatpush3.bf16.xpose.msra.mxu1 %v2484_v12 }
 0x8b3   : > { %4883 = vmatprep.subr.bf16.mxu1 %v5343_v5 }
 0x971   : > { %v2338_v13 = vpop.f32.mrf.mxu1 }
 0x972   : > { %v2339_v16 = vadd.f32 %v4510_v14, %v2338_v13 }
 0x973   : > { %v4875_v25 = vpop.f32.mrf.mxu1 }
 0x975   : > { %v2341_v26 = vpop.f32.mrf.mxu1 }
 0x976   : > { %v2342_v17 = vadd.f32 %v4510_v14, %v2341_v26 }
 0x977   : > { %v4876_v18 = vpop.f32.mrf.mxu1 }
 0x978   : > { %v2478_v19 = vpack.c.bf16 %v2342_v17, %v2339_v16 }
 0x97a   : > { %4880 = vmatmul.mubr.msk.bf16.vlgmr.msra.gmra.mxu1 %vm1526_vm1, %v2478_v19 }
 0x97b   : > { %4884 = vmatpush3.bf16.msra.mxu1 %v2567_v20  ;;  %4885 = vmatprep.mubr.msk.bf16.mxu1 %vm5344_vm0, %v5343_v5 }
 0x97c   : > { %4889 = vmatprep.subr.bf16.mxu1 %v5343_v5 }
 0xa3a   : > { %v2520_v21 = vpop.f32.mrf.mxu1 }
 0xa3b   : > { %v2527_v2 = vmul.f32 0.17677669, %v2520_v21 }
 0xa3c   : > { %v4881_v23 = vpop.f32.mrf.mxu1 }
 0xa3d   : > { %v2535_v24 = vadd.f32 %v5928_v22, %v2527_v2 }
 0xa3e   : > { %v2523_v27 = vpop.f32.mrf.mxu1 }
 0xa3f   : > { %v2528_v28 = vmul.f32 0.17677669, %v2523_v27  ;;  %v2538_v29 = vsel %vm2537_vm8, %v2535_v24, -inf }
 0xa40   : > { %2539 = vmax.xlane.f32.xlu0 %v2538_v29  ;;  %v4882_v30 = vpop.f32.mrf.mxu1 }
 0xa41   : > { %v2536_v61 = vadd.f32 %v5928_v22, %v2528_v28 }
 0xa43   : > { %v2541_v31 = vsel %vm2537_vm8, %v2536_v61, -inf }
 0xa44   : > { %2542 = vmax.xlane.f32.xlu1 %v2541_v31 }
 0xac9   : > { %v2540_v34 = vpop.xlane.xlu0 %2539 }
 0xaca   : > { %v2544_v35 = vsub.f32 %v2535_v24, %v2540_v34 }
 0xacc   : > { %v2546_v36 = vmul.f32 1.442695, %v2544_v35 }
 0xacd   : > { %v2543_v37 = vpop.xlane.xlu1 %2542 }
 0xace   : > { %5246 = vpow2.f32 %v2546_v36  ;;  %v2545_v38 = vsub.f32 %v2536_v61, %v2543_v37 }
 0xad0   : > { %v2548_v39 = vmul.f32 1.442695, %v2545_v38 }
 0xad2   : > { %5248 = vpow2.f32 %v2548_v39 }
 0xadb   : > { %v5247_v41 = vpop.eup %5246 }
 0xadc   : > { %v2550_v43 = vsel %vm2537_vm8, %v5247_v41, 0.0 }
 0xadd   : > { %2551 = vadd.xlane.f32.xlu0 %v2550_v43 }
 0xadf   : > { %v5249_v44 = vpop.eup %5248 }
 0xae0   : > { %v2553_v45 = vsel %vm2537_vm8, %v5249_v44, 0.0 }
 0xae1   : > { %2554 = vadd.xlane.f32.xlu1 %v2553_v45 }
 0xaf2   : > { %2611 = vrot.lane.b32.xlu1 %v2478_v19, %s5345_s16 }
 0xaf3   : > { %2614 = vrot.lane.b32.xlu0 %v2479_v10, %s5345_s16 }
 0xaf6   : > { %2744 = vrot.lane.b32.xlu1 %v2479_v10, %s5347_s18 }
 0xaf7   : > { %2873 = vrot.lane.b32.xlu0 %v2479_v10, %s5346_s17 }
 0xafa   : > { %2742 = vrot.lane.b32.xlu1 %v2478_v19, %s5347_s18 }
 0xafe   : > { %2871 = vrot.lane.b32.xlu1 %v2478_v19, %s5346_s17 }
 0xb66   : > { %v2552_v47 = vpop.xlane.xlu0 %2551 }
 0xb67   : > { %5250 = vrcp.f32 %v2552_v47 }
 0xb6a   : > { %v2555_v48 = vpop.xlane.xlu1 %2554  ;;  %v2615_v51 = vpop.permute.xlu0 %2614 }
 0xb6b   : > { %5252 = vrcp.f32 %v2555_v48  ;;  %v2620_v0 = vsel %vm1526_vm1, %v2615_v51, 0 }
 0xb6e   : > { %v2612_v50 = vpop.permute.xlu1 %2611  ;;  %v2874_v56 = vpop.permute.xlu0 %2873 }
 0xb6f   : > { %v2879_v62 = vsel %vm1526_vm1, %v2874_v56, 0 }
 0xb72   : > { %v2745_v52 = vpop.permute.xlu1 %2744 }
 0xb73   : > { %v2750_v53 = vsel %vm1526_vm1, %v2745_v52, 0 }
 0xb74   : > { %4902 = vmatpush3.bf16.xpose.msra.mxu0 %v2750_v53  ;;  %v5251_v54 = vpop.eup %5250 }
 0xb75   : > { %4913 = vmatprep.subr.bf16.mxu0 %v5343_v5  ;;  %v5944_v58 = vmul.f32 %v5251_v54, %v5247_v41 }
 0xb76   : > { %v2743_v60 = vpop.permute.xlu1 %2742 }
 0xb78   : > { %v5253_v55 = vpop.eup %5252 }
 0xb79   : > { %v5946_v59 = vmul.f32 %v5253_v55, %v5249_v44 }
 0xb7a   : > { %v2872_v57 = vpop.permute.xlu1 %2871 }
 0xb7b   : > { %4904 = vmatmul.mubr.msk.bf16.vlgmr.msra.gmra.mxu0 %vm1526_vm1, %v2743_v60  ;;  %v2560_v46 = vpack.c.bf16 %v5946_v59, %v5944_v58 }
 0xb7c   : > { %4914 = vmatpush3.bf16.xpose.msra.mxu0 %v2879_v62  ;;  %4915 = vmatprep.mubr.msk.bf16.mxu0 %vm5344_vm0, %v5343_v5 }
 0xb7d   : > { %4886 = vmatmul.mubr.msk.bf16.vlgmr.msra.gmra.mxu1 %vm2537_vm8, %v2560_v46  ;;  %4925 = vmatprep.subr.bf16.mxu0 %v5343_v5 }
 0xb7e   : > { %4890 = vmatpush3.bf16.xpose.msra.mxu1 %v2620_v0  ;;  %4891 = vmatprep.mubr.msk.bf16.mxu1 %vm5344_vm0, %v5343_v5 }
 0xb7f   : > { %4895 = vmatprep.subr.bf16.mxu1 %v5343_v5 }
 0xb83   : > { %4916 = vmatmul.mubr.msk.bf16.vlgmr.msra.gmra.mxu0 %vm1526_vm1, %v2872_v57 }
 0xb84   : > { %4941 = vmatprep.mubr.msk.bf16.mxu0 %vm5344_vm0, %v5343_v5 }
 0xb85   : > { %4892 = vmatmul.mubr.msk.bf16.vlgmr.msra.gmra.mxu1 %vm1526_vm1, %v2612_v50 }
 0xb86   : > { %4897 = vmatprep.mubr.msk.bf16.mxu1 %vm5344_vm0, %v5343_v5 }
 0xc3b   : > { %v2786_v1 = vpop.f32.mrf.mxu0 }
 0xc3c   : > { %v2793_v13 = vmul.f32 0.17677669, %v2786_v1 }
 0xc3d   : > { %v5966_v3 = vpop.f32.mrf.mxu1  ;;  %v4905_v6 = vpop.f32.mrf.mxu0 }
 0xc3e   : > { %v2795_v2 = vadd.f32 %v5928_v22, %v2793_v13 }
 0xc3f   : > { %v4887_v7 = vpop.f32.mrf.mxu1  ;;  %v2789_v8 = vpop.f32.mrf.mxu0 }
 0xc40   : > { %v2794_v19 = vmul.f32 0.17677669, %v2789_v8  ;;  %v2797_v30 = vsel %vm2537_vm8, %v2795_v2, -inf }
 0xc41   : > { %v5968_v9 = vpop.f32.mrf.mxu1  ;;  %v4906_v10 = vpop.f32.mrf.mxu0 }
 0xc42   : > { %v2796_v34 = vadd.f32 %v5928_v22, %v2794_v19 }
 0xc43   : > { %v4888_v11 = vpop.f32.mrf.mxu1  ;;  %v2915_v12 = vpop.f32.mrf.mxu0 }
 0xc44   : > { %v2922_v61 = vmul.f32 0.17677669, %v2915_v12  ;;  %v2800_v36 = vsel %vm2537_vm8, %v2796_v34, -inf }
 0xc45   : > { %v2656_v14 = vpop.f32.mrf.mxu1  ;;  %v4917_v25 = vpop.f32.mrf.mxu0 }
 0xc46   : > { %v2663_v26 = vmul.f32 0.17677669, %v2656_v14  ;;  %v2924_v38 = vadd.f32 %v5928_v22, %v2922_v61 }
 0xc47   : > { %v4893_v16 = vpop.f32.mrf.mxu1  ;;  %v2918_v17 = vpop.f32.mrf.mxu0 }
 0xc48   : > { %v2665_v18 = vadd.f32 %v5928_v22, %v2663_v26  ;;  %v2923_v23 = vmul.f32 0.17677669, %v2918_v17  ;;  %v2926_v39 = vsel %vm2537_vm8, %v2924_v38, -inf }
 0xc49   : > { %v2659_v20 = vpop.f32.mrf.mxu1  ;;  %v4918_v21 = vpop.f32.mrf.mxu0 }
 0xc4a   : > { %v2664_v24 = vmul.f32 0.17677669, %v2659_v20  ;;  %v2667_v27 = vsel %vm2537_vm8, %v2665_v18, -inf  ;;  %v2925_v35 = vadd.f32 %v5928_v22, %v2923_v23 }
 0xc4b   : > { %2668 = vmax.xlane.f32.xlu0 %v2667_v27  ;;  %v4894_v28 = vpop.f32.mrf.mxu1 }
 0xc4c   : > { %v2666_v29 = vadd.f32 %v5928_v22, %v2664_v24  ;;  %v2929_v37 = vsel %vm2537_vm8, %v2925_v35, -inf }
 0xc4e   : > { %v2670_v31 = vsel %vm2537_vm8, %v2666_v29, -inf }
 0xc4f   : > { %2798 = vmax.xlane.f32.xlu0 %v2797_v30  ;;  %2671 = vmax.xlane.f32.xlu1 %v2670_v31 }
 0xc53   : > { %2801 = vmax.xlane.f32.xlu0 %v2800_v36  ;;  %2930 = vmax.xlane.f32.xlu1 %v2929_v37 }
 0xc57   : > { %2927 = vmax.xlane.f32.xlu0 %v2926_v39 }
 0xcd4   : > { %v2669_v41 = vpop.xlane.xlu0 %2668 }
 0xcd5   : > { %v2673_v53 = vsub.f32 %v2665_v18, %v2669_v41 }
 0xcd7   : > { %v2675_v62 = vmul.f32 1.442695, %v2673_v53 }
 0xcd8   : > { %v2799_v43 = vpop.xlane.xlu0 %2798  ;;  %v2672_v44 = vpop.xlane.xlu1 %2671 }
 0xcd9   : > { %v2803_v45 = vsub.f32 %v2795_v2, %v2799_v43  ;;  %v2674_v54 = vsub.f32 %v2666_v29, %v2672_v44 }
 0xcdb   : > { %v2805_v47 = vmul.f32 1.442695, %v2803_v45  ;;  %v2677_v46 = vmul.f32 1.442695, %v2674_v54 }
 0xcdc   : > { %v2802_v48 = vpop.xlane.xlu0 %2801  ;;  %v2931_v50 = vpop.xlane.xlu1 %2930 }
 0xcdd   : > { %5254 = vpow2.f32 %v2805_v47  ;;  %v2804_v51 = vsub.f32 %v2796_v34, %v2802_v48  ;;  %v2933_v52 = vsub.f32 %v2925_v35, %v2931_v50 }
 0xcdf   : > { %v2807_v55 = vmul.f32 1.442695, %v2804_v51  ;;  %v2936_v56 = vmul.f32 1.442695, %v2933_v52 }
 0xce0   : > { %v2928_v22 = vpop.xlane.xlu0 %2927 }
 0xce1   : > { %5256 = vpow2.f32 %v2807_v55  ;;  %v2932_v60 = vsub.f32 %v2924_v38, %v2928_v22  ;;  %v5122_v55 = vld [vmem:[%s5606_s9 + $0x38] sm:$0xff]   ;;  %v5124_v22 = vld [vmem:[%s5606_s9 + $0x28] sm:$0xff]  }
 0xce2   : > { %5258 = vpow2.f32 %v2936_v56  ;;  %4926 = vmatpush3.bf16.msra.mxu0 %v5122_v55  ;;  %v5123_v56 = vld [vmem:[%s5606_s9 + $0x30] sm:$0xff]  }
 0xce3   : > { %v2934_v0 = vmul.f32 1.442695, %v2932_v60  ;;  %4927 = vmatprep.subr.bf16.mxu0 %v5343_v5  ;;  %v5125_v60 = vld [vmem:[%s5606_s9 + $0x20] sm:$0xff]  }
 0xce5   : > { %5260 = vpow2.f32 %v2934_v0 }
 0xce6   : > { %5262 = vpow2.f32 %v2675_v62  ;;  %4928 = vmatpush3.bf16.msra.mxu0 %v5123_v56  ;;  %v5126_v62 = vld [vmem:[%s5606_s9 + $0x18] sm:$0xff]  }
 0xce7   : > { %5264 = vpow2.f32 %v2677_v46  ;;  %4929 = vmatprep.subr.bf16.mxu0 %v5343_v5 }
 0xcea   : > { %v5255_v57 = vpop.eup %5254  ;;  %4930 = vmatpush3.bf16.msra.mxu0 %v5124_v22 }
 0xceb   : > { %v2809_v1 = vsel %vm2537_vm8, %v5255_v57, 0.0  ;;  %4931 = vmatprep.subr.bf16.mxu0 %v5343_v5 }
 0xcec   : > { %2810 = vadd.xlane.f32.xlu0 %v2809_v1 }
 0xcee   : > { %v5257_v6 = vpop.eup %5256  ;;  %4932 = vmatpush3.bf16.msra.mxu0 %v5125_v60 }
 0xcef   : > { %v2812_v7 = vsel %vm2537_vm8, %v5257_v6, 0.0  ;;  %v5259_v8 = vpop.eup %5258  ;;  %4933 = vmatprep.subr.bf16.mxu0 %v5343_v5 }
 0xcf0   : > { %2813 = vadd.xlane.f32.xlu1 %v2812_v7  ;;  %v2941_v13 = vsel %vm2537_vm8, %v5259_v8, 0.0  ;;  %v5128_v7 = vld [vmem:[%s5606_s9 + $0x8] sm:$0xff]  }
 0xcf2   : > { %v5261_v10 = vpop.eup %5260  ;;  %4934 = vmatpush3.bf16.msra.mxu0 %v5126_v62 }
 0xcf3   : > { %v5263_v11 = vpop.eup %5262  ;;  %v2938_v12 = vsel %vm2537_vm8, %v5261_v10, 0.0  ;;  %4935 = vmatprep.subr.bf16.mxu0 %v5343_v5 }
 0xcf4   : > { %v5265_v14 = vpop.eup %5264  ;;  %2939 = vadd.xlane.f32.xlu0 %v2938_v12  ;;  %2942 = vadd.xlane.f32.xlu1 %v2941_v13  ;;  %v2679_v25 = vsel %vm2537_vm8, %v5263_v11, 0.0  ;;  %v5129_v12 = vld [vmem:[%s5606_s9] sm:$0xff]  }
 0xcf5   : > { %v2682_v26 = vsel %vm2537_vm8, %v5265_v14, 0.0 }
 0xcf8   : > { %2680 = vadd.xlane.f32.xlu0 %v2679_v25  ;;  %2683 = vadd.xlane.f32.xlu1 %v2682_v26 }
 0xd09   : > { %2820 = vrot.lane.b32.xlu1 %v5915_v15, %s5347_s18 }
 0xd0d   : > { %2949 = vrot.lane.b32.xlu1 %v5915_v15, %s5346_s17 }
 0xd0e   : > { %2691 = vrot.lane.b32.xlu0 %v5915_v15, %s5345_s16 }
 0xd75   : > { %v2811_v16 = vpop.xlane.xlu0 %2810 }
 0xd76   : > { %5266 = vrcp.f32 %v2811_v16 }
 0xd79   : > { %v2814_v17 = vpop.xlane.xlu1 %2813 }
 0xd7a   : > { %5268 = vrcp.f32 %v2814_v17 }
 0xd7d   : > { %v2940_v18 = vpop.xlane.xlu0 %2939  ;;  %v2943_v19 = vpop.xlane.xlu1 %2942 }
 0xd81   : > { %v2681_v20 = vpop.xlane.xlu0 %2680  ;;  %v2684_v21 = vpop.xlane.xlu1 %2683 }
 0xd82   : > { %5270 = vrcp.f32 %v2681_v20 }
 0xd83   : > { %5272 = vrcp.f32 %v2684_v21  ;;  %v5267_v24 = vpop.eup %5266 }
 0xd84   : > { %5274 = vrcp.f32 %v2940_v18  ;;  %v2816_v36 = vmul.f32 %v5267_v24, %v5255_v57  ;;  %v5127_v57 = vld [vmem:[%s5606_s9 + $0x10] sm:$0xff]   ;;  %s6335_s9 = sld [smem:[#allocation14_spill]] }
 0xd85   : > { %5276 = vrcp.f32 %v2943_v19  ;;  %v2692_v2 = vpop.permute.xlu0 %2691  ;;  %v2821_v34 = vpop.permute.xlu1 %2820  ;;  %4936 = vmatpush3.bf16.msra.mxu0 %v5127_v57 }
 0xd86   : > { %v2697_v23 = vsel %vm2565_vm7, %v2692_v2, 0  ;;  %v2826_v44 = vsel %vm2565_vm7, %v2821_v34, 0  ;;  %4937 = vmatprep.subr.bf16.mxu0 %v5343_v5 }
 0xd87   : > { %4896 = vmatpush3.bf16.msra.mxu1 %v2697_v23  ;;  %v5269_v15 = vpop.eup %5268 }
 0xd88   : > { %4907 = vmatprep.subr.bf16.mxu1 %v5343_v5  ;;  %v2818_v39 = vmul.f32 %v5269_v15, %v5257_v6 }
 0xd89   : > { %v2950_v51 = vpop.permute.xlu1 %2949  ;;  %4938 = vmatpush3.bf16.msra.mxu0 %v5128_v7 }
 0xd8a   : > { %v2819_v52 = vpack.c.bf16 %v2818_v39, %v2816_v36  ;;  %v2955_v53 = vsel %vm2565_vm7, %v2950_v51, 0  ;;  %4939 = vmatprep.subr.bf16.mxu0 %v5343_v5  ;;  %v5138_v22 = vld [vmem:[%s6335_s9 + $0xc4] ss:$16 sps:$4 sm:$0xff]   ;;  %v5141_v60 = vld [vmem:[%s6335_s9 + $0xcc] ss:$16 sps:$4 sm:$0xff]  }
 0xd8b   : > { %v5136_v62 = vld [vmem:[%s6335_s9 + $0xc0] ss:$16 sps:$4 sm:$0xff]   ;;  %v5147_v57 = vld [vmem:[%s6335_s9 + $0xac] ss:$16 sps:$4 sm:$0xff]  }
 0xd8c   : > { %v5148_v7 = vld [vmem:[%s6335_s9 + $0x80] ss:$16 sps:$4 sm:$0xff]  }
 0xd8d   : > { %4940 = vmatpush3.bf16.msra.mxu0 %v5129_v12  ;;  %v5156_v12 = vld [vmem:[%s6335_s9 + $0x64] ss:$16 sps:$4 sm:$0xff]  }
 0xd8f   : > { %v5271_v27 = vpop.eup %5270 }
 0xd90   : > { %v5273_v28 = vpop.eup %5272  ;;  %v2686_v29 = vmul.f32 %v5271_v27, %v5263_v11 }
 0xd91   : > { %v5275_v30 = vpop.eup %5274  ;;  %v2688_v61 = vmul.f32 %v5273_v28, %v5265_v14 }
 0xd92   : > { %v5277_v31 = vpop.eup %5276  ;;  %v2740_v35 = vadd.f32 %v2686_v29, %v5944_v58  ;;  %v2945_v43 = vmul.f32 %v5275_v30, %v5261_v10 }
 0xd93   : > { %v2689_v37 = vpack.c.bf16 %v2688_v61, %v2686_v29  ;;  %v2741_v38 = vadd.f32 %v2688_v61, %v5946_v59  ;;  %v2947_v47 = vmul.f32 %v5277_v31, %v5259_v8 }
 0xd94   : > { %v2869_v41 = vadd.f32 %v2816_v36, %v2740_v35 }
 0xd95   : > { %4898 = vmatmul.mubr.msk.bf16.vlgmr.msra.gmra.mxu1 %vm2537_vm8, %v2689_v37  ;;  %v2870_v45 = vadd.f32 %v2818_v39, %v2741_v38  ;;  %v2948_v54 = vpack.c.bf16 %v2947_v47, %v2945_v43 }
 0xd96   : > { %4908 = vmatpush3.bf16.msra.mxu1 %v2826_v44  ;;  %4909 = vmatprep.mubr.msk.bf16.mxu1 %vm5344_vm0, %v5343_v5  ;;  %v2998_v48 = vadd.f32 %v2945_v43, %v2869_v41 }
 0xd97   : > { %4919 = vmatprep.subr.bf16.mxu1 %v5343_v5  ;;  %v2999_v58 = vadd.f32 %v2947_v47, %v2870_v45  ;;  %v5130_v47 = vld [vmem:[%s6335_s9 + $0xe0] ss:$16 sps:$4 sm:$0xff]  }
 0xd98   : > { %v6003_v59 = vmul.f32 0.25, %v2998_v48  ;;  %v5132_v48 = vld [vmem:[%s6335_s9 + $0xe4] ss:$16 sps:$4 sm:$0xff]  }
 0xd99   : > { %v6005_v50 = vmul.f32 0.25, %v2999_v58  ;;  %v5135_v58 = vld [vmem:[%s6335_s9 + $0xec] ss:$16 sps:$4 sm:$0xff]  }
 0xd9a   : > { %3493 = vmatprep.subr.bf16.mxu0 %v5135_v58  ;;  %v5182_v58 = vld [vmem:[%s5635_s6 + $0x70] sm:$0xff]  }
 0xd9d   : > { %4910 = vmatmul.mubr.msk.bf16.vlgmr.msra.gmra.mxu1 %vm2537_vm8, %v2819_v52 }
 0xd9e   : > { %4920 = vmatpush3.bf16.msra.mxu1 %v2955_v53  ;;  %4921 = vmatprep.mubr.msk.bf16.mxu1 %vm5344_vm0, %v5343_v5 }
 0xd9f   : > { %3450 = vmatprep.subr.bf16.mxu1 %v5132_v48  ;;  %v5181_v48 = vld [vmem:[%s5635_s6 + $0xb8] sm:$0xff]  }
 0xda5   : > { %4922 = vmatmul.mubr.msk.bf16.vlgmr.msra.gmra.mxu1 %vm2537_vm8, %v2948_v54 }
 0xda6   : > { %3482 = vmatprep.mubr.bf16.mxu1 %v5342_v4  ;;  %3451 = vmatpush1.bf16.msra.mxu1 %v5130_v47  ;;  %v5180_v47 = vld [vmem:[%s5635_s6 + $0x38] sm:$0xff]  }
 0xda7   : > { %3452 = vmatprep.subr.bf16.mxu1 %v5138_v22  ;;  %v5191_v22 = vld [vmem:[%s5635_s6 + $0xe0] sm:$0xff]  }
 0xdaa   : > { %3453 = vmatpush1.bf16.msra.mxu1 %v5136_v62  ;;  %v5193_v62 = vld [vmem:[%s5635_s6 + $0xa0] sm:$0xff]  }
 0xe55   : > { %v2733_v46 = vpop.f32.mrf.mxu1 }
 0xe57   : > { %v4899_v0 = vpop.f32.mrf.mxu1 }
 0xe58   : > { %v5144_v0 = vld [vmem:[%s6335_s9 + $0xa4] ss:$16 sps:$4 sm:$0xff]  }
 0xe59   : > { %v2736_v1 = vpop.f32.mrf.mxu1  ;;  %3454 = vmatprep.subr.bf16.mxu1 %v5144_v0  ;;  %v5195_v0 = vld [vmem:[%s5635_s6 + $0xd8] sm:$0xff]  }
 0xe5a   : > { %v5035_v6 = vpack.i.bf16 %v2736_v1, %v2733_v46  ;;  %v5139_v46 = vld [vmem:[%s6335_s9 + $0xc8] ss:$16 sps:$4 sm:$0xff]   ;;  %v5142_v1 = vld [vmem:[%s6335_s9 + $0xa0] ss:$16 sps:$4 sm:$0xff]  }
 0xe5b   : > { %v4900_v8 = vpop.f32.mrf.mxu1  ;;  %3455 = vmatpush1.bf16.msra.mxu1 %v5142_v1  ;;  %v5197_v1 = vld [vmem:[%s5635_s6 + $0x98] sm:$0xff]  }
 0xe5c   : > { %5036 = vrot.lane.b32.xlu1 %v5035_v6, %s5346_s17  ;;  %v5145_v6 = vld [vmem:[%s6335_s9 + $0xa8] ss:$16 sps:$4 sm:$0xff]   ;;  %v5150_v8 = vld [vmem:[%s6335_s9 + $0x84] ss:$16 sps:$4 sm:$0xff]  }
 0xe5d   : > { %v2862_v10 = vpop.f32.mrf.mxu1  ;;  %3456 = vmatprep.subr.bf16.mxu1 %v5150_v8  ;;  %v5200_v8 = vld [vmem:[%s5635_s6 + $0x10] sm:$0xff]  }
 0xe5f   : > { %v4911_v11 = vpop.f32.mrf.mxu1  ;;  %3457 = vmatpush1.bf16.msra.mxu1 %v5148_v7  ;;  %v5199_v7 = vld [vmem:[%s5635_s6 + $0xd0] sm:$0xff]  }
 0xe60   : > { %v5153_v11 = vld [vmem:[%s6335_s9 + $0x8c] ss:$16 sps:$4 sm:$0xff]   ;;  %3458 = vmatprep.subr.bf16.mxu1 %v5156_v12 }
 0xe61   : > { %v2865_v13 = vpop.f32.mrf.mxu1  ;;  %v5203_v12 = vld [vmem:[%s5635_s6 + $0xc8] sm:$0xff]  }
 0xe62   : > { %v5040_v14 = vpack.i.bf16 %v2865_v13, %v2862_v10  ;;  %v5151_v10 = vld [vmem:[%s6335_s9 + $0x88] ss:$16 sps:$4 sm:$0xff]   ;;  %v5159_v13 = vld [vmem:[%s6335_s9 + $0x6c] ss:$16 sps:$4 sm:$0xff]  }
 0xe63   : > { %v4912_v25 = vpop.f32.mrf.mxu1 }
 0xe64   : > { %5041 = vrot.lane.b32.xlu0 %v5040_v14, %s5347_s18  ;;  %s6336_s18 = sld [smem:[#allocation31_spill]]  ;;  %v5154_v14 = vld [vmem:[%s6335_s9 + $0x60] ss:$16 sps:$4 sm:$0xff]   ;;  %v5157_v25 = vld [vmem:[%s6335_s9 + $0x68] ss:$16 sps:$4 sm:$0xff]  }
 0xe65   : > { %v2991_v26 = vpop.f32.mrf.mxu1  ;;  %3459 = vmatpush1.bf16.msra.mxu1 %v5154_v14  ;;  %v5205_v14 = vld [vmem:[%s5635_s6 + $0x88] sm:$0xff]  }
 0xe67   : > { %v4923_v16 = vpop.f32.mrf.mxu1 }
 0xe68   : > { %v5165_v16 = vld [vmem:[%s6335_s9 + $0x4c] ss:$16 sps:$4 sm:$0xff]  }
 0xe69   : > { %v2994_v17 = vpop.f32.mrf.mxu1 }
 0xe6a   : > { %v5045_v18 = vpack.i.bf16 %v2994_v17, %v2991_v26  ;;  %s6337_s8 = scalar_lea.vmem %s6336_s18, %s5526_s0  ;;  %v5162_v26 = vld [vmem:[%s6335_s9 + $0x44] ss:$16 sps:$4 sm:$0xff]   ;;  %v5160_v17 = vld [vmem:[%s6335_s9 + $0x40] ss:$16 sps:$4 sm:$0xff]  }
 0xe6b   : > { %v4924_v19 = vpop.f32.mrf.mxu1  ;;  %3460 = vmatprep.subr.bf16.mxu1 %v5162_v26  ;;  %v5207_v26 = vld [vmem:[%s5635_s6 + $0xc0] sm:$0xff]  }
 0xe6c   : > { %5046 = vrot.lane.b32.xlu1 %v5045_v18, %s5345_s16  ;;  %v5163_v18 = vld [vmem:[%s6335_s9 + $0x48] ss:$16 sps:$4 sm:$0xff]   ;;  %v5168_v19 = vld [vmem:[%s6335_s9 + $0x24] ss:$16 sps:$4 sm:$0xff]   ;;  %3461 = vmatpush1.bf16.msra.mxu1 %v5160_v17 }
 0xe6d   : > { %3462 = vmatprep.subr.bf16.mxu1 %v5168_v19  ;;  %v5209_v17 = vld [vmem:[%s5635_s6 + $0x80] sm:$0xff]  }
 0xe6e   : > { %v3200_v19 = vld [vmem:[%s5630_s24] sm:$0xf] }
 0xece   : > { %v5037_v20 = vpop.permute.xlu1 %5036 }
 0xecf   : > { %v5039_v2 = vunpack.i.h.bf16 %v5037_v20  ;;  %v5038_v23 = vunpack.i.l.bf16 %v5037_v20  ;;  %v5171_v20 = vld [vmem:[%s6335_s9 + $0x2c] ss:$16 sps:$4 sm:$0xff]  }
 0xed1   : > { %v3025_v27 = vsel %vm1526_vm1, %v5968_v9, %v5039_v2  ;;  %v3024_v28 = vsel %vm1526_vm1, %v5966_v3, %v5038_v23  ;;  %v4544_v3 = vld [vmem:[%s6337_s8] ss:$0 sm:$0xff]  ;;  %v5169_v2 = vld [vmem:[%s6335_s9 + $0x28] ss:$16 sps:$4 sm:$0xff]   ;;  %v5174_v23 = vld [vmem:[%s6335_s9 + $0x4] ss:$16 sps:$4 sm:$0xff]  }
 0xed6   : > { %v5042_v21 = vpop.permute.xlu0 %5041 }
 0xed7   : > { %v5044_v5 = vunpack.i.h.bf16 %v5042_v21  ;;  %v5043_v24 = vunpack.i.l.bf16 %v5042_v21  ;;  %v5166_v21 = vld [vmem:[%s6335_s9 + $0x20] ss:$16 sps:$4 sm:$0xff]  }
 0xed8   : > { %3463 = vmatpush1.bf16.msra.mxu1 %v5166_v21 }
 0xed9   : > { %v3027_v61 = vsel %vm2051_vm5, %v3025_v27, %v5044_v5  ;;  %v3026_v31 = vsel %vm2051_vm5, %v3024_v28, %v5043_v24  ;;  %v5177_v5 = vld [vmem:[%s6335_s9 + $0xc] ss:$16 sps:$4 sm:$0xff]   ;;  %v5172_v24 = vld [vmem:[%s6335_s9] ss:$16 sps:$4 sm:$0xff]   ;;  %3464 = vmatprep.subr.bf16.mxu1 %v5174_v23 }
 0xeda   : > { %v5178_v27 = vld [vmem:[%s5635_s6 + $0x78] sm:$0xff]  }
 0xedb   : > { %v5179_v28 = vld [vmem:[%s5635_s6 + $0xf8] sm:$0xff]  }
 0xedc   : > { %3465 = vmatpush1.bf16.msra.mxu1 %v5172_v24  ;;  %v3281_v24 = vrot.slane %v3200_v19, %v1307_v49 }
 0xedd   : > { %4713 = vmatprep.subr.bf16.mxu1 %v5178_v27 }
 0xede   : > { %v5047_v15 = vpop.permute.xlu1 %5046 }
 0xedf   : > { %v5049_v29 = vunpack.i.h.bf16 %v5047_v15  ;;  %v5048_v30 = vunpack.i.l.bf16 %v5047_v15  ;;  %v5175_v15 = vld [vmem:[%s6335_s9 + $0x8] ss:$16 sps:$4 sm:$0xff]  }
 0xee1   : > { %v3029_v34 = vsel %vm2054_vm6, %v3027_v61, %v5049_v29  ;;  %v3028_v35 = vsel %vm2054_vm6, %v3026_v31, %v5048_v30 }
 0xee2   : > { %v3030_v36 = vpack.c.bf16 %v3029_v34, %v3028_v35 }
 0xee4   : > { %4942 = vmatmul.mubr.bf16.vlgmr.msra.gmra.mxu0 %v3030_v36 }
 0xee5   : > { %3525 = vmatprep.mubr.bf16.mxu0 %v5342_v4  ;;  %v5133_v4 = vld [vmem:[%s6335_s9 + $0xe8] ss:$16 sps:$4 sm:$0xff]  }
 0xee6   : > { %3494 = vmatpush1.bf16.msra.mxu0 %v5133_v4 }
 0xee7   : > { %3495 = vmatprep.subr.bf16.mxu0 %v5141_v60  ;;  %v5192_v60 = vld [vmem:[%s5635_s6 + $0x20] sm:$0xff]  }
 0xeea   : > { %3496 = vmatpush1.bf16.msra.mxu0 %v5139_v46  ;;  %v5194_v46 = vld [vmem:[%s5635_s6 + $0x58] sm:$0xff]  }
 0xeeb   : > { %3497 = vmatprep.subr.bf16.mxu0 %v5147_v57  ;;  %v5196_v57 = vld [vmem:[%s5635_s6 + $0x18] sm:$0xff]  }
 0xeee   : > { %3498 = vmatpush1.bf16.msra.mxu0 %v5145_v6  ;;  %v5198_v6 = vld [vmem:[%s5635_s6 + $0x50] sm:$0xff]  }
 0xeef   : > { %3499 = vmatprep.subr.bf16.mxu0 %v5153_v11  ;;  %v5202_v11 = vld [vmem:[%s5635_s6 + $0x48] sm:$0xff]  }
 0xef2   : > { %3500 = vmatpush1.bf16.msra.mxu0 %v5151_v10  ;;  %v5201_v10 = vld [vmem:[%s5635_s6 + $0x90] sm:$0xff]  }
 0xef3   : > { %3501 = vmatprep.subr.bf16.mxu0 %v5159_v13  ;;  %v5204_v13 = vld [vmem:[%s5635_s6 + $0x8] sm:$0xff]  }
 0xef6   : > { %3502 = vmatpush1.bf16.msra.mxu0 %v5157_v25  ;;  %v5206_v25 = vld [vmem:[%s5635_s6 + $0x40] sm:$0xff]  }
 0xef7   : > { %3503 = vmatprep.subr.bf16.mxu0 %v5165_v16  ;;  %v5208_v16 = vld [vmem:[%s5635_s6] sm:$0xff]  }
 0xefa   : > { %3504 = vmatpush1.bf16.msra.mxu0 %v5163_v18  ;;  %v3284_v18 = vsub.s32 3, %v5711_v32 }
 0xefb   : > { %3505 = vmatprep.subr.bf16.mxu0 %v5171_v20 }
 0xefc   : > { %v3285_v23 = vrot.slane %v3200_v19, %v3284_v18 }
 0xefe   : > { %3506 = vmatpush1.bf16.msra.mxu0 %v5169_v2  ;;  %v3277_v2 = vrot.slane %v3200_v19, %v5714_v33 }
 0xeff   : > { %3507 = vmatprep.subr.bf16.mxu0 %v5177_v5  ;;  %v3273_v5 = vrot.slane %v3200_v19, %v5719_v40 }
 0xf02   : > { %3508 = vmatpush1.bf16.msra.mxu0 %v5175_v15 }
 0xf03   : > { %4735 = vmatprep.subr.bf16.mxu0 %v5179_v28 }
 0xfa4   : > { %v3119_v9 = vpop.f32.mrf.mxu0 }
 0xfa5   : > { %v3120_v37 = vadd.f32 %v4544_v3, %v3119_v9  ;;  %v4553_v9 = vld [vmem:[%s6339_s11] ss:$0 sm:$0xff]  ;;  %s6347_s11 = sld [smem:[#allocation12_spill]] (!%p4622_p8) }
 0xfa6   : > { %v4943_v38 = vpop.f32.mrf.mxu0 }
 0xfa7   : > { %v3126_v39 = vadd.f32 %v3120_v37, %v5897_v63 }
 0xfa8   : > { %v3122_v41 = vpop.f32.mrf.mxu0 }
 0xfa9   : > { %v3123_v43 = vadd.f32 %v4544_v3, %v3122_v41  ;;  %3128 = vadd.xlane.f32.xlu0 %v3126_v39  ;;  %v4554_v41 = vld [vmem:[%s6341_s23] ss:$0 sm:$0xff] }
 0xfaa   : > { %v4944_v44 = vpop.f32.mrf.mxu0 }
 0xfab   : > { %v3127_v45 = vadd.f32 %v3123_v43, %v5899_v42 }
 0xfad   : > { %3130 = vadd.xlane.f32.xlu1 %v3127_v45 }
0x1032   : > { %v3129_v63 = vpop.xlane.xlu0 %3128 }
0x1033   : > { %v3132_v51 = vmul.f32 0.0078125, %v3129_v63  ;;  %v5183_v63 = vld [vmem:[%s5635_s6 + $0xf0] sm:$0xff]  }
0x1035   : > { %v6051_v52 = vsub.f32 %v3126_v39, %v3132_v51  ;;  %v5184_v51 = vld [vmem:[%s5635_s6 + $0x30] sm:$0xff]  }
0x1036   : > { %v3131_v53 = vpop.xlane.xlu1 %3130 }
0x1037   : > { %v3133_v42 = vmul.f32 0.0078125, %v3131_v53  ;;  %v3136_v54 = vmul.f32 %v6051_v52, %v6051_v52  ;;  %v5186_v53 = vld [vmem:[%s5635_s6 + $0x68] sm:$0xff]  }
0x1039   : > { %v6055_v55 = vsub.f32 %v3127_v45, %v3133_v42  ;;  %3138 = vadd.xlane.f32.xlu0 %v3136_v54  ;;  %v5187_v42 = vld [vmem:[%s5635_s6 + $0xe8] sm:$0xff]  }
0x103a   : > { %v5188_v54 = vld [vmem:[%s5635_s6 + $0x28] sm:$0xff]  }
0x103b   : > { %v3137_v56 = vmul.f32 %v6055_v55, %v6055_v55 }
0x103d   : > { %3140 = vadd.xlane.f32.xlu0 %v3137_v56  ;;  %v5190_v56 = vld [vmem:[%s5635_s6 + $0x60] sm:$0xff]  }
0x10c2   : > { %v3139_v29 = vpop.xlane.xlu0 %3138 }
0x10c3   : > { %v3142_v30 = vmul.f32 0.0078125, %v3139_v29 }
0x10c5   : > { %v3144_v61 = vadd.f32 1e-05, %v3142_v30 }
0x10c6   : > { %v3141_v31 = vpop.xlane.xlu0 %3140 }
0x10c7   : > { %5278 = vrsqrt.f32 %v3144_v61  ;;  %v3143_v34 = vmul.f32 0.0078125, %v3141_v31 }
0x10c9   : > { %v3145_v35 = vadd.f32 1e-05, %v3143_v34 }
0x10cb   : > { %5280 = vrsqrt.f32 %v3145_v35 }
0x10d4   : > { %v5279_v36 = vpop.eup %5278 }
0x10d5   : > { %v3148_v3 = vmul.f32 %v5279_v36, %v6051_v52  ;;  %v5185_v52 = vld [vmem:[%s5635_s6 + $0xb0] sm:$0xff]  }
0x10d7   : > { %v3156_v39 = vmul.f32 %v4553_v9, %v3148_v3 }
0x10d8   : > { %v5281_v37 = vpop.eup %5280 }
0x10d9   : > { %v3149_v38 = vmul.f32 %v5281_v37, %v6055_v55  ;;  %v6101_v44 = vadd.f32 %v4554_v41, %v3156_v39  ;;  %v5189_v55 = vld [vmem:[%s5635_s6 + $0xa8] sm:$0xff]  }
0x10db   : > { %v3157_v43 = vmul.f32 %v4553_v9, %v3149_v38 }
0x10dd   : > { %v6103_v45 = vadd.f32 %v4554_v41, %v3157_v43 }
0x10df   : > { %v3268_v4 = vpack.c.bf16 %v6103_v45, %v6101_v44 }
0x10e1   : > { %3483 = vmatmul.mubr.bf16.vlgmr.msra.gmra.mxu1 %v3268_v4  ;;  %3526 = vmatmul.mubr.bf16.vlgmr.msra.gmra.mxu0 %v3268_v4 }
0x10e2   : > { %4714 = vmatpush3.bf16.msra.mxu1 %v5180_v47  ;;  %4736 = vmatpush3.bf16.msra.mxu0 %v5181_v48 }
0x10e3   : > { %4715 = vmatprep.subr.bf16.mxu1 %v5182_v58  ;;  %4737 = vmatprep.subr.bf16.mxu0 %v5183_v63 }
0x10e6   : > { %4716 = vmatpush3.bf16.msra.mxu1 %v5184_v51  ;;  %4738 = vmatpush3.bf16.msra.mxu0 %v5185_v52 }
0x10e7   : > { %4717 = vmatprep.subr.bf16.mxu1 %v5186_v53  ;;  %4739 = vmatprep.subr.bf16.mxu0 %v5187_v42  ;;  %v4587_v53 = vld [vmem:[%s1206_s29] ss:$0 sm:$0xff] }
0x10ea   : > { %4718 = vmatpush3.bf16.msra.mxu1 %v5188_v54  ;;  %4740 = vmatpush3.bf16.msra.mxu0 %v5189_v55 }
0x10eb   : > { %4719 = vmatprep.subr.bf16.mxu1 %v5190_v56  ;;  %4741 = vmatprep.subr.bf16.mxu0 %v5191_v22 }
0x10ee   : > { %4720 = vmatpush3.bf16.msra.mxu1 %v5192_v60  ;;  %4742 = vmatpush3.bf16.msra.mxu0 %v5193_v62 }
0x10ef   : > { %4721 = vmatprep.subr.bf16.mxu1 %v5194_v46  ;;  %4743 = vmatprep.subr.bf16.mxu0 %v5195_v0 }
0x10f2   : > { %4722 = vmatpush3.bf16.msra.mxu1 %v5196_v57  ;;  %4744 = vmatpush3.bf16.msra.mxu0 %v5197_v1 }
0x10f3   : > { %4723 = vmatprep.subr.bf16.mxu1 %v5198_v6  ;;  %4745 = vmatprep.subr.bf16.mxu0 %v5199_v7 }
0x10f6   : > { %4724 = vmatpush3.bf16.msra.mxu1 %v5200_v8  ;;  %4746 = vmatpush3.bf16.msra.mxu0 %v5201_v10 }
0x10f7   : > { %4725 = vmatprep.subr.bf16.mxu1 %v5202_v11  ;;  %4747 = vmatprep.subr.bf16.mxu0 %v5203_v12 }
0x10fa   : > { %4726 = vmatpush3.bf16.msra.mxu1 %v5204_v13  ;;  %4748 = vmatpush3.bf16.msra.mxu0 %v5205_v14 }
0x10fb   : > { %4727 = vmatprep.subr.bf16.mxu1 %v5206_v25  ;;  %4749 = vmatprep.subr.bf16.mxu0 %v5207_v26 }
0x10fe   : > { %4728 = vmatpush3.bf16.msra.mxu1 %v5208_v16  ;;  %4750 = vmatpush3.bf16.msra.mxu0 %v5209_v17 }
0x11a1   : > { %v3484_v20 = vpop.f32.mrf.mxu1  ;;  %v3527_v21 = vpop.f32.mrf.mxu0 }
0x11a2   : > { %v3485_v35 = vadd.f32 %v3484_v20, %v3273_v5  ;;  %v3528_v36 = vadd.f32 %v3527_v21, %v3281_v24 }
0x11a3   : > { %v3486_v15 = vpop.f32.mrf.mxu1  ;;  %v3529_v27 = vpop.f32.mrf.mxu0 }
0x11a4   : > { %v3487_v30 = vadd.f32 %v3486_v15, %v3277_v2  ;;  %v3530_v61 = vadd.f32 %v3529_v27, %v3285_v23  ;;  %v3536_v43 = vmax.f32 %v3485_v35, 0.0  ;;  %v3538_v47 = vmax.f32 %v3528_v36, 0.0  ;;  %v4621_v15 = vld [vmem:[%s1212_s14] ss:$0 sm:$0xff] }
0x11a5   : > { %v3488_v28 = vpop.f32.mrf.mxu1  ;;  %v3531_v29 = vpop.f32.mrf.mxu0 }
0x11a6   : > { %v3489_v31 = vadd.f32 %v3488_v28, %v3273_v5  ;;  %v3532_v34 = vadd.f32 %v3531_v29, %v3281_v24  ;;  %v3537_v40 = vmax.f32 %v3487_v30, 0.0  ;;  %v3539_v32 = vmax.f32 %v3530_v61, 0.0  ;;  %v4620_v5 = vld [vmem:[%s1209_s12] ss:$0 sm:$0xff]  ;;  %s6346_s12 = sld [smem:[#allocation19_spill]] (!%p4622_p8) }
0x11a7   : > { %v3490_v3 = vpop.f32.mrf.mxu1  ;;  %v3533_v9 = vpop.f32.mrf.mxu0 }
0x11a8   : > { %v3491_v37 = vadd.f32 %v3490_v3, %v3277_v2  ;;  %v3534_v33 = vadd.f32 %v3533_v9, %v3285_v23  ;;  %v3540_v38 = vmax.f32 %v3489_v31, 0.0  ;;  %v3542_v39 = vmax.f32 %v3532_v34, 0.0 }
0x11aa   : > { %v3541_v49 = vmax.f32 %v3491_v37, 0.0  ;;  %v3543_v41 = vmax.f32 %v3534_v33, 0.0  ;;  %v3544_v58 = vpack.c.bf16 %v3540_v38, %v3536_v43  ;;  %v3546_v63 = vpack.c.bf16 %v3542_v39, %v3538_v47 }
0x11ac   : > { %v3545_v48 = vpack.c.bf16 %v3541_v49, %v3537_v40  ;;  %v3547_v4 = vpack.c.bf16 %v3543_v41, %v3539_v32 }
0x11ae   : > { %3778 = vmatprep.mubr.bf16.mxu1 %v3545_v48  ;;  %3819 = vmatprep.mubr.bf16.mxu0 %v3547_v4 }
0x11af   : > { %3779 = vmatmul.mubr.bf16.vlgmr.msra.gmra.mxu1 %v3544_v58  ;;  %3820 = vmatmul.mubr.bf16.vlgmr.msra.gmra.mxu0 %v3546_v63 }
0x126f   : > { %v4729_v51 = vpop.f32.mrf.mxu1  ;;  %v4751_v52 = vpop.f32.mrf.mxu0 }
0x1271   : > { %v4730_v42 = vpop.f32.mrf.mxu1  ;;  %v4752_v54 = vpop.f32.mrf.mxu0 }
0x1272   : > { %v4731_v55 = vadd.f32 %v4730_v42, %v4729_v51  ;;  %v4753_v62 = vadd.f32 %v4752_v54, %v4751_v52 }
0x1273   : > { %v4732_v56 = vpop.f32.mrf.mxu1  ;;  %v4754_v22 = vpop.f32.mrf.mxu0 }
0x1274   : > { %v3781_v60 = vadd.f32 %v4731_v55, %v4587_v53 }
0x1275   : > { %v4733_v46 = vpop.f32.mrf.mxu1  ;;  %v4755_v0 = vpop.f32.mrf.mxu0 }
0x1276   : > { %v3822_v57 = vadd.f32 %v4753_v62, %v3781_v60  ;;  %v4734_v1 = vadd.f32 %v4733_v46, %v4732_v56  ;;  %v4756_v7 = vadd.f32 %v4755_v0, %v4754_v22 }
0x1278   : > { %v3784_v6 = vadd.f32 %v4734_v1, %v4587_v53  ;;  %v3828_v8 = vadd.f32 %v3822_v57, %v6101_v44 }
0x127a   : > { %v3825_v10 = vadd.f32 %v4756_v7, %v3784_v6  ;;  %3830 = vadd.xlane.f32.xlu0 %v3828_v8 }
0x127c   : > { %v3829_v11 = vadd.f32 %v3825_v10, %v6103_v45 }
0x127e   : > { %3832 = vadd.xlane.f32.xlu1 %v3829_v11 }
0x1303   : > { %v3831_v12 = vpop.xlane.xlu0 %3830 }
0x1304   : > { %v3834_v13 = vmul.f32 0.0078125, %v3831_v12 }
0x1306   : > { %v3836_v14 = vsub.f32 %v3828_v8, %v3834_v13 }
0x1307   : > { %v3833_v25 = vpop.xlane.xlu1 %3832 }
0x1308   : > { %v3835_v26 = vmul.f32 0.0078125, %v3833_v25  ;;  %v3838_v16 = vmul.f32 %v3836_v14, %v3836_v14 }
0x130a   : > { %v3837_v17 = vsub.f32 %v3829_v11, %v3835_v26  ;;  %3840 = vadd.xlane.f32.xlu0 %v3838_v16 }
0x130c   : > { %v3839_v18 = vmul.f32 %v3837_v17, %v3837_v17 }
0x130e   : > { %3842 = vadd.xlane.f32.xlu1 %v3839_v18 }
0x1393   : > { %v3841_v19 = vpop.xlane.xlu0 %3840 }
0x1394   : > { %v3844_v20 = vmul.f32 0.0078125, %v3841_v19 }
0x1396   : > { %v3846_v44 = vadd.f32 1e-05, %v3844_v20 }
0x1397   : > { %v3843_v21 = vpop.xlane.xlu1 %3842 }
0x1398   : > { %5282 = vrsqrt.f32 %v3846_v44  ;;  %v3845_v2 = vmul.f32 0.0078125, %v3843_v21 }
0x139a   : > { %v3847_v45 = vadd.f32 1e-05, %v3845_v2 }
0x139c   : > { %5284 = vrsqrt.f32 %v3847_v45 }
0x13a5   : > { %v5283_v23 = vpop.eup %5282 }
0x13a6   : > { %v3850_v24 = vmul.f32 %v5283_v23, %v3836_v14 }
0x13a8   : > { %v3858_v27 = vmul.f32 %v4620_v5, %v3850_v24 }
0x13a9   : > { %v5285_v28 = vpop.eup %5284 }
0x13aa   : > { %v3866_v29 = vadd.f32 %v4621_v15, %v3858_v27  ;;  %v3851_v30 = vmul.f32 %v5285_v28, %v3837_v17 }
0x13ac   : > { %3868 = vst [vmem:[#allocation2] sm:$0xff] %v3866_v29  ;;  %v3859_v61 = vmul.f32 %v4620_v5, %v3851_v30  ;;  %3873 = sbr.rel (%p4622_p8) target bundleno = 5553 (0x15b1), region = 132 }
0x13ae   : > { %v3867_v31 = vadd.f32 %v4621_v15, %v3859_v61 }
0x13b0   : > { %3869 = vst [vmem:[#allocation2 + $0x8] sm:$0xff] %v3867_v31 }
0x13b1   : > { %v3874_v34 = vsel %vm2537_vm8, %v6003_v59, -inf  ;;  %v3877_v35 = vsel %vm2537_vm8, %v6005_v50, -inf  ;;  %v5286_v36 = vld [vmem:[%s6346_s12 + $0x38] sm:$0xff]   ;;  %v5348_v3 = vmov 0.0   ;;  %v5287_v9 = vld [vmem:[%s6346_s12 + $0x30] sm:$0xff]   ;;  %v5288_v37 = vld [vmem:[%s6346_s12 + $0x28] sm:$0xff]   ;;  %v3980_v51 = vpack.c.bf16 %v3867_v31, %v3866_v29 }
0x13b2   : > { %3875 = vmax.xlane.f32.xlu0 %v3874_v34  ;;  %4950 = vmatprep.subr.bf16.mxu1 %v5348_v3  ;;  %v5289_v33 = vld [vmem:[%s6346_s12 + $0x20] sm:$0xff]   ;;  %v5290_v38 = vld [vmem:[%s6346_s12 + $0x18] sm:$0xff]   ;;  %v5291_v39 = vld [vmem:[%s6346_s12 + $0x10] sm:$0xff]   ;;  %vm5349_vm9 = vmmov 0   ;;  %vm4093_vm10 = vcmask 269312  }
0x13b3   : > { %4951 = vmatpush3.bf16.msra.mxu1 %v5286_v36  ;;  %4966 = vmatprep.mubr.msk.bf16.mxu1 %vm5349_vm9, %v5348_v3  ;;  %v3896_v52 = vld [vmem:[%s6347_s11] sm:$0xff] }
0x13b4   : > { %4952 = vmatprep.subr.bf16.mxu1 %v5348_v3  ;;  %4945 = vmatprep.subr.mxu0 %v3896_v52  ;;  %v4625_v60 = vld [vmem:[%s6348_s21] ss:$0 sm:$0xff] }
0x13b5   : > { %4946 = vmatpush3.msra.mxu0 %v3896_v52 }
0x13b6   : > { %3878 = vmax.xlane.f32.xlu0 %v3877_v35 }
0x13b7   : > { %4953 = vmatpush3.bf16.msra.mxu1 %v5287_v9 }
0x13b8   : > { %4954 = vmatprep.subr.bf16.mxu1 %v5348_v3 }
0x13bb   : > { %4955 = vmatpush3.bf16.msra.mxu1 %v5288_v37 }
0x13bc   : > { %4956 = vmatprep.subr.bf16.mxu1 %v5348_v3 }
0x13bf   : > { %4957 = vmatpush3.bf16.msra.mxu1 %v5289_v33 }
0x13c0   : > { %4958 = vmatprep.subr.bf16.mxu1 %v5348_v3 }
0x13c3   : > { %4959 = vmatpush3.bf16.msra.mxu1 %v5290_v38 }
0x13c4   : > { %4960 = vmatprep.subr.bf16.mxu1 %v5348_v3 }
0x13c7   : > { %4961 = vmatpush3.bf16.msra.mxu1 %v5291_v39 }
0x13c8   : > { %4962 = vmatprep.subr.bf16.mxu1 %v5348_v3 }
0x143b   : > { %v3876_v40 = vpop.xlane.xlu0 %3875 }
0x143c   : > { %v3880_v32 = vsub.f32 %v6003_v59, %v3876_v40  ;;  %v5292_v59 = vld [vmem:[%s6346_s12 + $0x8] sm:$0xff]  }
0x143d   : > { %4963 = vmatpush3.bf16.msra.mxu1 %v5292_v59 }
0x143e   : > { %v3882_v49 = vmul.f32 1.442695, %v3880_v32  ;;  %4964 = vmatprep.subr.bf16.mxu1 %v5348_v3 }
0x143f   : > { %v3879_v41 = vpop.xlane.xlu0 %3878 }
0x1440   : > { %5294 = vpow2.f32 %v3882_v49  ;;  %v3881_v43 = vsub.f32 %v6005_v50, %v3879_v41  ;;  %v5293_v50 = vld [vmem:[%s6346_s12] sm:$0xff]  }
0x1441   : > { %4965 = vmatpush3.bf16.msra.mxu1 %v5293_v50 }
0x1442   : > { %v3884_v47 = vmul.f32 1.442695, %v3881_v43 }
0x1444   : > { %5296 = vpow2.f32 %v3884_v47  ;;  %4967 = vmatmul.mubr.bf16.vlgmr.msra.gmra.mxu1 %v3980_v51 }
0x144d   : > { %v5295_v48 = vpop.eup %5294 }
0x144e   : > { %v3886_v4 = vsel %vm2537_vm8, %v5295_v48, 0.0 }
0x144f   : > { %3887 = vadd.xlane.f32.xlu1 %v3886_v4 }
0x1451   : > { %v5297_v58 = vpop.eup %5296 }
0x1452   : > { %v3889_v63 = vsel %vm2537_vm8, %v5297_v58, 0.0 }
0x1453   : > { %3890 = vadd.xlane.f32.xlu1 %v3889_v63 }
0x14d8   : > { %v3888_v53 = vpop.xlane.xlu1 %3887 }
0x14d9   : > { %5298 = vrcp.f32 %v3888_v53 }
0x14dc   : > { %v3891_v42 = vpop.xlane.xlu1 %3890 }
0x14dd   : > { %5300 = vrcp.f32 %v3891_v42 }
0x14e6   : > { %v5299_v54 = vpop.eup %5298 }
0x14e7   : > { %v3893_v55 = vmul.f32 %v5299_v54, %v5295_v48 }
0x14e9   : > { %4947 = vmatprep.mubr.msk.f32.mxu0 %vm2537_vm8, %v3893_v55 }
0x14ea   : > { %v5301_v56 = vpop.eup %5300 }
0x14eb   : > { %v3895_v22 = vmul.f32 %v5301_v56, %v5297_v58 }
0x14ed   : > { %4948 = vmatmul.mubr.msk.f32.vlgmr.msra.gmra.mxu0 %vm2537_vm8, %v3895_v22 }
0x1504   : > { %v4086_v62 = vpop.f32.mrf.mxu1 }
0x1505   : > { %v4087_v46 = vadd.f32 %v4625_v60, %v4086_v62 }
0x1506   : > { %v4968_v0 = vpop.f32.mrf.mxu1 }
0x1507   : > { %4094 = vst.msk [vmem:[%s5653_s22] sm:$0xff] %vm4093_vm10, %v4087_v46 }
0x1508   : > { %v4089_v57 = vpop.f32.mrf.mxu1 }
0x1509   : > { %v4090_v1 = vadd.f32 %v4625_v60, %v4089_v57 }
0x150a   : > { %v4969_v6 = vpop.f32.mrf.mxu1 }
0x150b   : > { %4095 = vst.msk [vmem:[%s5653_s22 + $0x8] sm:$0xff] %vm4093_vm10, %v4090_v1 }
0x15ad   : > { %v4949_v7 = vpop.f32.mrf.mxu0 }
0x15ae   : > { %3979 = vst.msk [vmem:[%s5659_s4 + $0x8] sm:$0xff] %vm1526_vm1, %v4949_v7 }
0x15af   : > { %v3969_v8 = vpop.f32.mrf.mxu0 }
0x15b0   : > { %3978 = vst.msk [vmem:[%s5659_s4] sm:$0xff] %vm1526_vm1, %v3969_v8 }
0x15b1 PF: > { %s6349_s29 = sld [smem:[#allocation6_spill]] }
0x15b2   : > { %s6350_s7 = sld [smem:[#allocation4_spill]] }
0x15b3   : > { %s6351_s4 = sld [smem:[#allocation5_spill]] }
0x15b4   : > { %s6352_s8 = sld [smem:[#allocation7_spill]] }
0x15b5   : > { %s6353_s30 = sld [smem:[#allocation8_spill]] }
0x15b7   : > { %s38_s9 = sadd.s32 1, %s6349_s29  }
0x15b8   : > { %p35_p9 = scmp.ge.s32.totalorder %s38_s9, 10  }
0x15ba   :  { %37 = sbr.rel (!%p35_p9) target bundleno = 28 (0x1c), region = 243 }

</bundles_post_ra>
